<compile_context>
chip_gen: v5e
topology: v5e:2x2
jax: 0.10.0
libtpu: 0.0.40
codegen_flags: <defaults>
</compile_context>

<pallas_src>
import jax
import jax.numpy as jnp
import numpy as np
from jax.experimental import pallas as pl
from jax.experimental.pallas import tpu as pltpu


# --------------------------------------------------------------------------
# Pallas kernel: fused (1x1 conv -> ReLU -> 1x1 conv -> ReLU -> 1x1 conv)
# on one (Cin, pixel_tile) slab.  Weights (Cout, Cin) bf16, biases (Cout, 1)
# f32; all matmuls run bf16 operands with f32 accumulation on the MXU.
# --------------------------------------------------------------------------
def _fc_head_kernel(x_ref, w1_ref, b1_ref, w2_ref, b2_ref, w3_ref, b3_ref,
                    o_ref):
    x = x_ref[...].astype(jnp.bfloat16)                            # (1024, tp)
    h1 = jnp.dot(w1_ref[...], x, preferred_element_type=jnp.float32)
    h1 = jnp.maximum(h1 + b1_ref[...], 0.0).astype(jnp.bfloat16)   # (512, tp)
    h2 = jnp.dot(w2_ref[...], h1, preferred_element_type=jnp.float32)
    h2 = jnp.maximum(h2 + b2_ref[...], 0.0).astype(jnp.bfloat16)   # (128, tp)
    h3 = jnp.dot(w3_ref[...], h2, preferred_element_type=jnp.float32)
    o_ref[...] = (h3 + b3_ref[...]).astype(o_ref.dtype)            # (8, tp)


_HAS_BUFFERED = hasattr(pl, "Buffered")


def _resident_spec(shape, index_map):
    """BlockSpec for a grid-invariant (resident) operand.

    Single-buffer it when `pipeline_mode=pl.Buffered(1)` is available (its
    index_map is constant, so residency is unchanged and the duplicate buffer
    is reclaimed — pure VMEM headroom, mainly for v7x).
    """
    if _HAS_BUFFERED:
        try:
            return pl.BlockSpec(shape, index_map, pipeline_mode=pl.Buffered(1))
        except TypeError:
            pass
    return pl.BlockSpec(shape, index_map)


def _fc_head(x_bcp, w1, b1, w2, b2, w3, b3, *, tp=None):
    """x_bcp: (B, 1024, P), bf16 preferred (f32 also accepted).

    Weights (Cout, Cin) bf16, biases (Cout, 1) f32.
    Returns (B, 8, P) in x_bcp's dtype.
    """
    b, c_in, n_pix = x_bcp.shape
    c1 = w1.shape[0]
    c2 = w2.shape[0]
    c_out = w3.shape[0]

    # Adaptive pixel tile (lane axis).  Full-dim block is always legal, so a
    # spatial extent smaller than the tile is used directly.
    if tp is None:
        tp = 1024 if n_pix >= 2048 else 512
    tp_eff = min(tp, n_pix)

    # v7x megacore: guarantee >= 2 grid steps so both TensorCores get work.
    if b * pl.cdiv(n_pix, tp_eff) < 2 and n_pix > 128:
        half = pl.cdiv(n_pix, 2)
        tp_eff = max(128, ((half + 127) // 128) * 128)

    grid = (b, pl.cdiv(n_pix, tp_eff))

    const2 = lambda i, j: (0, 0)
    out = pl.pallas_call(
        _fc_head_kernel,
        out_shape=jax.ShapeDtypeStruct((b, c_out, n_pix), x_bcp.dtype),
        grid_spec=pltpu.PrefetchScalarGridSpec(
            num_scalar_prefetch=0,
            grid=grid,
            in_specs=[
                pl.BlockSpec((None, c_in, tp_eff), lambda i, j: (i, 0, j)),  # x
                _resident_spec((c1, c_in), const2),                          # w1
                _resident_spec((c1, 1), const2),                             # b1
                _resident_spec((c2, c1), const2),                            # w2
                _resident_spec((c2, 1), const2),                             # b2
                _resident_spec((c_out, c2), const2),                         # w3
                _resident_spec((c_out, 1), const2),                          # b3
            ],
            out_specs=pl.BlockSpec((None, c_out, tp_eff),
                                   lambda i, j: (i, 0, j)),
        ),
        compiler_params=pltpu.CompilerParams(
            dimension_semantics=("parallel", "parallel"),
            vmem_limit_bytes=32 * 1024 * 1024),
    )(x_bcp, w1, b1, w2, b2, w3, b3)

    return out


# --------------------------------------------------------------------------
# Module wrapper (reproduces resnet_duplicate.forward given the 1024-channel
# backbone feature map).
# --------------------------------------------------------------------------
def init_params(key):
    """Deterministic init of the fc head (Conv2d kernel_size=1 weights).

    Weights stored PyTorch-style (Cout, Cin), cast to bf16 ONCE here (frozen
    inference params); biases kept f32.  Uniform(-1/sqrt(fan_in), ...) like
    nn.Conv2d default init.
    """
    dims = [(512, 1024), (128, 512), (8, 128)]          # (Cout, Cin)
    params = {}
    keys = jax.random.split(key, 2 * len(dims))
    for idx, (cout, cin) in enumerate(dims):
        bound = 1.0 / np.sqrt(cin)
        w = jax.random.uniform(keys[2 * idx], (cout, cin), jnp.float32,
                               -bound, bound)
        bb = jax.random.uniform(keys[2 * idx + 1], (cout,), jnp.float32,
                                -bound, bound)
        params[f"w{idx + 1}"] = w.astype(jnp.bfloat16)   # one-time cast
        params[f"b{idx + 1}"] = bb                       # f32 bias
    return params


@jax.jit
def resnet_duplicate_forward(feat_nchw, params):
    """feat_nchw: (B, 1024, H, W) backbone features (output of resnet layer3),
    preferably bf16 as emitted by the (frozen) backbone.

    Returns (B, 8, H, W, H) — matching `x.unsqueeze(-1).repeat(1,1,1,1,h)` —
    in feat_nchw's dtype (bf16 features -> bf16 output, halving the dominant
    HBM write of the materialized repeat).
    """
    b, c, h, w = feat_nchw.shape
    # NCHW consumed directly: collapse spatial dims (free reshape, no HBM pass).
    x = feat_nchw.reshape(b, c, h * w)

    out = _fc_head(x,
                   params["w1"], params["b1"].reshape(-1, 1),
                   params["w2"], params["b2"].reshape(-1, 1),
                   params["w3"], params["b3"].reshape(-1, 1))   # (B, 8, H*W)
    out = out.reshape(b, 8, h, w)
    # unsqueeze(-1) + repeat(1,1,1,1,h)  (pure broadcast; materialized at the
    # jit boundary to match module semantics — keep it lazy downstream if
    # possible).
    out = jnp.broadcast_to(out[..., None], (b, 8, h, w, h))
    return out


def _reference_forward(feat_nchw, params):
    """Pure-jnp f32 reference for correctness checking."""
    b, c, h, w = feat_nchw.shape
    x = feat_nchw.astype(jnp.float32).reshape(b, c, h * w)
    w1 = params["w1"].astype(jnp.float32)
    w2 = params["w2"].astype(jnp.float32)
    w3 = params["w3"].astype(jnp.float32)
    h1 = jnp.maximum(
        jnp.einsum("oc,bcp->bop", w1, x) + params["b1"][None, :, None], 0.0)
    h2 = jnp.maximum(
        jnp.einsum("oc,bcp->bop", w2, h1) + params["b2"][None, :, None], 0.0)
    h3 = jnp.einsum("oc,bcp->bop", w3, h2) + params["b3"][None, :, None]
    out = h3.reshape(b, 8, h, w)
    return jnp.broadcast_to(out[..., None], (b, 8, h, w, h))


if __name__ == "__main__":
    key = jax.random.PRNGKey(0)
    k_feat, k_params = jax.random.split(key)

    # Small synthetic backbone feature map: batch=2, 1024 channels, 8x8 spatial
    # (a resnet50-through-layer3 output has 1024 channels).  bf16, as the frozen
    # backbone would emit it.
    B, C, H, W = 2, 1024, 8, 8
    feat = jax.random.normal(k_feat, (B, C, H, W), jnp.float32).astype(
        jnp.bfloat16)
    params = init_params(k_params)

    out = resnet_duplicate_forward(feat, params)
    out = jax.block_until_ready(out)

    assert out.shape == (B, 8, H, W, H), out.shape

    ref = _reference_forward(feat, params)
    # bf16 matmul operands / bf16 output vs. f32 reference -> loose tolerance.
    np.testing.assert_allclose(np.asarray(out.astype(jnp.float32)),
                               np.asarray(ref), rtol=3e-2, atol=3e-2)

    print("KERNEL_OK")
</pallas_src>

<mosaic_0001>
module attributes {stable_mosaic.version = 11 : i64} {
  func.func @_fc_head_kernel(%arg0: i32, %arg1: i32, %arg2: memref<1x1024x64xbf16, #tpu.memory_space<vmem>>, %arg3: memref<512x1024xbf16, #tpu.memory_space<vmem>>, %arg4: memref<512x1xf32, #tpu.memory_space<vmem>>, %arg5: memref<128x512xbf16, #tpu.memory_space<vmem>>, %arg6: memref<128x1xf32, #tpu.memory_space<vmem>>, %arg7: memref<8x128xbf16, #tpu.memory_space<vmem>>, %arg8: memref<8x1xf32, #tpu.memory_space<vmem>>, %arg9: memref<1x8x64xbf16, #tpu.memory_space<vmem>>) attributes {dimension_semantics = [#tpu.dimension_semantics<parallel>, #tpu.dimension_semantics<parallel>], iteration_bounds = array<i64: 2, 1>, scalar_prefetch = 0 : i64, scratch_operands = 0 : i64, tpu.core_type = #tpu.core_type<tc>, window_params = [{transform_indices = @transform_0, window_bounds = array<i64: 1, 1024, 64>}, {pipeline_mode = #tpu.pipeline_mode<synchronous>, transform_indices = @transform_1, window_bounds = array<i64: 512, 1024>}, {pipeline_mode = #tpu.pipeline_mode<synchronous>, transform_indices = @transform_2, window_bounds = array<i64: 512, 1>}, {pipeline_mode = #tpu.pipeline_mode<synchronous>, transform_indices = @transform_3, window_bounds = array<i64: 128, 512>}, {pipeline_mode = #tpu.pipeline_mode<synchronous>, transform_indices = @transform_4, window_bounds = array<i64: 128, 1>}, {pipeline_mode = #tpu.pipeline_mode<synchronous>, transform_indices = @transform_5, window_bounds = array<i64: 8, 128>}, {pipeline_mode = #tpu.pipeline_mode<synchronous>, transform_indices = @transform_6, window_bounds = array<i64: 8, 1>}, {transform_indices = @transform_7, window_bounds = array<i64: 1, 8, 64>}]} {
    %c0 = arith.constant 0 : index
    %c0_0 = arith.constant 0 : index
    %c0_1 = arith.constant 0 : index
    %0 = vector.load %arg2[%c0, %c0_0, %c0_1] : memref<1x1024x64xbf16, #tpu.memory_space<vmem>>, vector<1x1024x64xbf16>
    %1 = vector.shape_cast %0 : vector<1x1024x64xbf16> to vector<1024x64xbf16>
    %c0_2 = arith.constant 0 : index
    %c0_3 = arith.constant 0 : index
    %2 = vector.load %arg3[%c0_2, %c0_3] : memref<512x1024xbf16, #tpu.memory_space<vmem>>, vector<512x1024xbf16>
    %cst = arith.constant dense<0.000000e+00> : vector<512x64xf32>
    %3 = tpu.matmul %2, %1, %cst {dimension_numbers = #tpu.dot_dimension_numbers<[1], [0], [0], [1], [0, 0, 1, 1], [], []>} : vector<512x1024xbf16>, vector<1024x64xbf16>, vector<512x64xf32> -> vector<512x64xf32>
    %c0_4 = arith.constant 0 : index
    %c0_5 = arith.constant 0 : index
    %4 = vector.load %arg4[%c0_4, %c0_5] : memref<512x1xf32, #tpu.memory_space<vmem>>, vector<512x1xf32>
    %5 = vector.broadcast %4 : vector<512x1xf32> to vector<512x64xf32>
    %6 = arith.addf %3, %5 : vector<512x64xf32>
    %cst_6 = arith.constant 0.000000e+00 : f32
    %7 = vector.broadcast %cst_6 : f32 to vector<512x64xf32>
    %8 = arith.maximumf %6, %7 : vector<512x64xf32>
    %9 = arith.truncf %8 : vector<512x64xf32> to vector<512x64xbf16>
    %c0_7 = arith.constant 0 : index
    %c0_8 = arith.constant 0 : index
    %10 = vector.load %arg5[%c0_7, %c0_8] : memref<128x512xbf16, #tpu.memory_space<vmem>>, vector<128x512xbf16>
    %cst_9 = arith.constant dense<0.000000e+00> : vector<128x64xf32>
    %11 = tpu.matmul %10, %9, %cst_9 {dimension_numbers = #tpu.dot_dimension_numbers<[1], [0], [0], [1], [0, 0, 1, 1], [], []>} : vector<128x512xbf16>, vector<512x64xbf16>, vector<128x64xf32> -> vector<128x64xf32>
    %c0_10 = arith.constant 0 : index
    %c0_11 = arith.constant 0 : index
    %12 = vector.load %arg6[%c0_10, %c0_11] : memref<128x1xf32, #tpu.memory_space<vmem>>, vector<128x1xf32>
    %13 = vector.broadcast %12 : vector<128x1xf32> to vector<128x64xf32>
    %14 = arith.addf %11, %13 : vector<128x64xf32>
    %cst_12 = arith.constant 0.000000e+00 : f32
    %15 = vector.broadcast %cst_12 : f32 to vector<128x64xf32>
    %16 = arith.maximumf %14, %15 : vector<128x64xf32>
    %17 = arith.truncf %16 : vector<128x64xf32> to vector<128x64xbf16>
    %c0_13 = arith.constant 0 : index
    %c0_14 = arith.constant 0 : index
    %18 = vector.load %arg7[%c0_13, %c0_14] : memref<8x128xbf16, #tpu.memory_space<vmem>>, vector<8x128xbf16>
    %cst_15 = arith.constant dense<0.000000e+00> : vector<8x64xf32>
    %19 = tpu.matmul %18, %17, %cst_15 {dimension_numbers = #tpu.dot_dimension_numbers<[1], [0], [0], [1], [0, 0, 1, 1], [], []>} : vector<8x128xbf16>, vector<128x64xbf16>, vector<8x64xf32> -> vector<8x64xf32>
    %c0_16 = arith.constant 0 : index
    %c0_17 = arith.constant 0 : index
    %20 = vector.load %arg8[%c0_16, %c0_17] : memref<8x1xf32, #tpu.memory_space<vmem>>, vector<8x1xf32>
    %21 = vector.broadcast %20 : vector<8x1xf32> to vector<8x64xf32>
    %22 = arith.addf %19, %21 : vector<8x64xf32>
    %23 = arith.truncf %22 : vector<8x64xf32> to vector<8x64xbf16>
    %c0_18 = arith.constant 0 : index
    %c0_19 = arith.constant 0 : index
    %c0_20 = arith.constant 0 : index
    %24 = vector.load %arg9[%c0_18, %c0_19, %c0_20] : memref<1x8x64xbf16, #tpu.memory_space<vmem>>, vector<1x8x64xbf16>
    %25 = vector.shape_cast %24 : vector<1x8x64xbf16> to vector<8x64xbf16>
    %26 = vector.shape_cast %23 : vector<8x64xbf16> to vector<1x8x64xbf16>
    tpu.vector_store %arg9[%c0_18, %c0_19, %c0_20], %26 {strides = array<i32>} : memref<1x8x64xbf16, #tpu.memory_space<vmem>>, vector<1x8x64xbf16>,
    return
  }
  func.func @transform_0(%arg0: i32, %arg1: i32) -> (i32, i32, i32) {
    %c0_i32 = arith.constant 0 : i32
    %c0_i32_0 = arith.constant 0 : i32
    return %arg0, %c0_i32, %arg1 : i32, i32, i32
  }
  func.func @transform_1(%arg0: i32, %arg1: i32) -> (i32, i32) {
    %c0_i32 = arith.constant 0 : i32
    %c0_i32_0 = arith.constant 0 : i32
    %c0_i32_1 = arith.constant 0 : i32
    return %c0_i32, %c0_i32_0 : i32, i32
  }
  func.func @transform_2(%arg0: i32, %arg1: i32) -> (i32, i32) {
    %c0_i32 = arith.constant 0 : i32
    %c0_i32_0 = arith.constant 0 : i32
    %c0_i32_1 = arith.constant 0 : i32
    return %c0_i32, %c0_i32_0 : i32, i32
  }
  func.func @transform_3(%arg0: i32, %arg1: i32) -> (i32, i32) {
    %c0_i32 = arith.constant 0 : i32
    %c0_i32_0 = arith.constant 0 : i32
    %c0_i32_1 = arith.constant 0 : i32
    return %c0_i32, %c0_i32_0 : i32, i32
  }
  func.func @transform_4(%arg0: i32, %arg1: i32) -> (i32, i32) {
    %c0_i32 = arith.constant 0 : i32
    %c0_i32_0 = arith.constant 0 : i32
    %c0_i32_1 = arith.constant 0 : i32
    return %c0_i32, %c0_i32_0 : i32, i32
  }
  func.func @transform_5(%arg0: i32, %arg1: i32) -> (i32, i32) {
    %c0_i32 = arith.constant 0 : i32
    %c0_i32_0 = arith.constant 0 : i32
    %c0_i32_1 = arith.constant 0 : i32
    return %c0_i32, %c0_i32_0 : i32, i32
  }
  func.func @transform_6(%arg0: i32, %arg1: i32) -> (i32, i32) {
    %c0_i32 = arith.constant 0 : i32
    %c0_i32_0 = arith.constant 0 : i32
    %c0_i32_1 = arith.constant 0 : i32
    return %c0_i32, %c0_i32_0 : i32, i32
  }
  func.func @transform_7(%arg0: i32, %arg1: i32) -> (i32, i32, i32) {
    %c0_i32 = arith.constant 0 : i32
    %c0_i32_0 = arith.constant 0 : i32
    return %arg0, %c0_i32, %arg1 : i32, i32, i32
  }
}

</mosaic_0001>

<bundles_post_ra>
// kernel: resnet_duplicate_forward.1
= control target key start
LH: loop header
LB: loop body
LE: loop exit
PB: predicated region body
PF: predicated region fallthrough
CT: control target
= control target key end

     0   :  { %12 = vsyncpa [#allocation3], 0  ;;  %s6742_s24 = smov 0   ;;  %s6744_s25 = smov 0   ;;  %s7830_s0 = inlined_call_operand.vmem [shape: bf16[2,1024,64], index: 0, kind: input, shape index: {}]   ;;  %s7831_s1 = inlined_call_operand.hbm [shape: bf16[512,1024], index: 1, kind: input, shape index: {}]   ;;  %s7832_s2 = inlined_call_operand.vmem [shape: f32[512,1], index: 2, kind: input, shape index: {}]   ;;  %s7833_s3 = inlined_call_operand.vmem [shape: bf16[128,512], index: 3, kind: input, shape index: {}]   ;;  %s7834_s4 = inlined_call_operand.vmem [shape: f32[128,1], index: 4, kind: input, shape index: {}]   ;;  %s7835_s5 = inlined_call_operand.vmem [shape: bf16[8,128], index: 5, kind: input, shape index: {}]   ;;  %s7836_s6 = inlined_call_operand.vmem [shape: f32[8,1], index: 6, kind: input, shape index: {}]   ;;  %s7837_s7 = inlined_call_operand.vmem [shape: bf16[2,8,64], index: 7, kind: output, shape index: {}]  }
   0x1   :  { %s6746_s26 = smov 0  }
   0x2 LB: > { %s4826_s27 = sadd.s32 4294967295, %s6696_s26   ;;  %s30_s28 = sadd.s32 1, %s6692_s25  ;;  %s6696_s26 = sphi %s6746_s26, %s18_s26   ;;  %s6692_s25 = sphi %s6744_s25, %s7943_s25   ;;  %s6688_s24 = sphi %s6742_s24, %s7942_s24  }
   0x3   : > { %p32_p0 = scmp.ge.s32.totalorder %s30_s28, 2  ;;  %p4828_p1 = scmp.ge.s32.totalorder %s6696_s26, 1 }
   0x4   : > { %p217_p2 = scmp.lt.s32.totalorder %s6696_s26, 3  ;;  %p6607_p4 = scmp.eq.s32.totalorder %s4826_s27, 0 }
   0x5   : > { %s7945_s28 = smov (%p32_p0, %s30_s28), 0  ;;  %s228_s8 = sshll.u32 %s7831_s1, 4  ;;  %s229_s8 = int_to_ptr.hbm [resolvable:$true] %s228_s8 }
   0x6   : > { %p218_p3 = pnand %p4828_p1, %p217_p2  ;;  %s6698_s9 = smov [#allocation2]  }
   0x7   : > { %s230_s10 = sshll.u32 %s6698_s9, 4  ;;  %s6699_s11 = smov 512   ;;  %s231_s10 = int_to_ptr.vmem [resolvable:$true] %s230_s10 }
   0x8   : > { %p6603_p5 = pneg %p218_p3  ;;  %s6700_s12 = smov 32  }
   0x9   : > { %272 = sbr.rel (%p218_p3) target bundleno = 1664 (0x680), region = 48 }
   0xa   : > { %p6604_p6 = pnand %p6607_p4, %p6603_p5 }
   0xc   : > { %6606 = dma.hbm_to_vmem [thread:$0]  (!%p6604_p6), %s229_s8, 32768, %s231_s10, [#allocation3], %s6699_s11, %s6699_s11, %s6700_s12  }
   0xe   : > { %6683 = dma.done.wait (%p6607_p4), [#allocation3], 32768  }
   0xf   : > { %6685 = vsyncadd (%p6607_p4), [#allocation3], 4294934528  ;;  %p310_p7 = scmp.lt.s32.totalorder %s6688_s24, 1  ;;  %v6701_v0 = vmov 0   ;;  %v771_v1 = vld [vmem:[%s7832_s2 + $0x1f0] sm:$0xff]  ;;  %v772_v12 = vld [vmem:[%s7832_s2 + $0x1f8] sm:$0xff] }
  0x10   : > { %6639 = vset.pattern.permute.xlu2 %v6701_v0  ;;  %6638 = vset.pattern.permute.xlu1 %v6701_v0  ;;  %v755_v2 = vld [vmem:[%s7832_s2 + $0x170] sm:$0xff]  ;;  %v756_v13 = vld [vmem:[%s7832_s2 + $0x178] sm:$0xff]  ;;  %v753_v23 = vld [vmem:[%s7832_s2 + $0x160] sm:$0xff]  ;;  %vm4734_vm0 = vcmask 519168  }
  0x11   : > { %6637 = vset.pattern.permute.xlu0 %v6701_v0  ;;  %s7947_s24 = smov (!%p310_p7, %s6688_s24), 1  ;;  %v723_v3 = vld [vmem:[%s7832_s2 + $0x70] sm:$0xff]  ;;  %1085 = vperm.xlu2 %6639, %v771_v1   ;;  %v724_v14 = vld [vmem:[%s7832_s2 + $0x78] sm:$0xff]  ;;  %v754_v34 = vld [vmem:[%s7832_s2 + $0x168] sm:$0xff] }
  0x12   : > { %s6246_s13 = sshll.u32 %s7947_s24, 9  ;;  %1005 = vperm.xlu0 %6637, %v755_v2   ;;  %845 = vperm.xlu1 %6638, %v723_v3   ;;  %v739_v24 = vld [vmem:[%s7832_s2 + $0xf0] sm:$0xff]  ;;  %v740_v25 = vld [vmem:[%s7832_s2 + $0xf8] sm:$0xff]  ;;  %v722_v35 = vld [vmem:[%s7832_s2 + $0x68] sm:$0xff]  ;;  %s4835_s11 = sshll.u32 %s7947_s24, 2 }
  0x13   : > { %s6770_s16 = scalar_lea.vmem %s7830_s0, %s6246_s13  ;;  %v721_v36 = vld [vmem:[%s7832_s2 + $0x60] sm:$0xff]  ;;  %v4846_v49 = vld [vmem:[#allocation2 + $0x8] sm:$0xf]  ;;  %v6312_v51 = vld [vmem:[#allocation2 + $0xc] sm:$0xf]  ;;  %s324_s14 = scalar_lea.vmem %s7837_s7, %s4835_s11 }
  0x14   : > { %v6254_v4 = vld [vmem:[%s6770_s16 + $0x38] sm:$0xff]  ;;  %v6253_v8 = vld [vmem:[%s6770_s16 + $0x30] sm:$0xff]  ;;  %v6252_v15 = vld [vmem:[%s6770_s16 + $0x28] sm:$0xff] }
  0x15   : > { %v6262_v5 = vld [vmem:[%s6770_s16 + $0x78] sm:$0xff]  ;;  %2757 = vmatpush.bf16.msra.mxu0 %v6254_v4  ;;  %v6261_v9 = vld [vmem:[%s6770_s16 + $0x70] sm:$0xff]  ;;  %v6260_v16 = vld [vmem:[%s6770_s16 + $0x68] sm:$0xff] }
  0x16   : > { %v6270_v6 = vld [vmem:[%s6770_s16 + $0xb8] sm:$0xff]  ;;  %2926 = vmatpush.bf16.msra.mxu1 %v6262_v5  ;;  %v6269_v10 = vld [vmem:[%s6770_s16 + $0xb0] sm:$0xff]  ;;  %v6268_v17 = vld [vmem:[%s6770_s16 + $0xa8] sm:$0xff] }
  0x17   : > { %v6278_v7 = vld [vmem:[%s6770_s16 + $0xf8] sm:$0xff]  ;;  %3095 = vmatpush.bf16.msra.mxu2 %v6270_v6  ;;  %v6277_v11 = vld [vmem:[%s6770_s16 + $0xf0] sm:$0xff]  ;;  %v6276_v18 = vld [vmem:[%s6770_s16 + $0xe8] sm:$0xff] }
  0x18   : > { %3264 = vmatpush.bf16.msra.mxu3 %v6278_v7  ;;  %v6251_v19 = vld [vmem:[%s6770_s16 + $0x20] sm:$0xff]  ;;  %v6250_v26 = vld [vmem:[%s6770_s16 + $0x18] sm:$0xff]  ;;  %v6249_v30 = vld [vmem:[%s6770_s16 + $0x10] sm:$0xff] }
  0x19   : > { %2758 = vmatpush.bf16.msra.mxu0 %v6253_v8  ;;  %1090 = vperm.xlu2 %6639, %v772_v12   ;;  %v6259_v20 = vld [vmem:[%s6770_s16 + $0x60] sm:$0xff]  ;;  %v6258_v27 = vld [vmem:[%s6770_s16 + $0x58] sm:$0xff]  ;;  %v6257_v31 = vld [vmem:[%s6770_s16 + $0x50] sm:$0xff] }
  0x1a   : > { %2927 = vmatpush.bf16.msra.mxu1 %v6261_v9  ;;  %1010 = vperm.xlu0 %6637, %v756_v13   ;;  %v6267_v21 = vld [vmem:[%s6770_s16 + $0xa0] sm:$0xff]  ;;  %v6266_v28 = vld [vmem:[%s6770_s16 + $0x98] sm:$0xff]  ;;  %v6265_v32 = vld [vmem:[%s6770_s16 + $0x90] sm:$0xff] }
  0x1b   : > { %3096 = vmatpush.bf16.msra.mxu2 %v6269_v10  ;;  %850 = vperm.xlu1 %6638, %v724_v14   ;;  %v6275_v22 = vld [vmem:[%s6770_s16 + $0xe0] sm:$0xff]  ;;  %v6274_v29 = vld [vmem:[%s6770_s16 + $0xd8] sm:$0xff]  ;;  %v6273_v33 = vld [vmem:[%s6770_s16 + $0xd0] sm:$0xff] }
  0x1c   : > { %3265 = vmatpush.bf16.msra.mxu3 %v6277_v11  ;;  %v6248_v37 = vld [vmem:[%s6770_s16 + $0x8] sm:$0xff]  ;;  %v6247_v41 = vld [vmem:[%s6770_s16] sm:$0xff]  ;;  %v752_v61 = vld [vmem:[%s7832_s2 + $0x158] sm:$0xff] }
  0x1d   : > { %2759 = vmatpush.bf16.msra.mxu0 %v6252_v15  ;;  %v6256_v38 = vld [vmem:[%s6770_s16 + $0x48] sm:$0xff]  ;;  %v6255_v42 = vld [vmem:[%s6770_s16 + $0x40] sm:$0xff]  ;;  %v751_v62 = vld [vmem:[%s7832_s2 + $0x150] sm:$0xff] }
  0x1e   : > { %2928 = vmatpush.bf16.msra.mxu1 %v6260_v16  ;;  %v6264_v39 = vld [vmem:[%s6770_s16 + $0x88] sm:$0xff]  ;;  %v6263_v43 = vld [vmem:[%s6770_s16 + $0x80] sm:$0xff]  ;;  %v767_v7 = vld [vmem:[%s7832_s2 + $0x1d0] sm:$0xff] }
  0x1f   : > { %3097 = vmatpush.bf16.msra.mxu2 %v6268_v17  ;;  %v6272_v40 = vld [vmem:[%s6770_s16 + $0xc8] sm:$0xff]  ;;  %v6271_v44 = vld [vmem:[%s6770_s16 + $0xc0] sm:$0xff]  ;;  %v719_v8 = vld [vmem:[%s7832_s2 + $0x50] sm:$0xff] }
  0x20   : > { %3266 = vmatpush.bf16.msra.mxu3 %v6276_v18  ;;  %v4838_v45 = vld [vmem:[#allocation2] sm:$0xf]  ;;  %v6311_v47 = vld [vmem:[#allocation2 + $0x4] sm:$0xf]  ;;  %v6316_v50 = vld [vmem:[#allocation2 + $0x24] sm:$0xf0] }
  0x21   : > { %2760 = vmatpush.bf16.msra.mxu0 %v6251_v19  ;;  %995 = vperm.xlu2 %6639, %v753_v23   ;;  %v6315_v46 = vld [vmem:[#allocation2 + $0x1c] sm:$0xf0]  ;;  %v4840_v48 = vld [vmem:[#allocation2 + $0x20] sm:$0xf0]  ;;  %v4848_v52 = vld [vmem:[#allocation2 + $0x28] sm:$0xf0]  ;;  %v4847_v58 = vor.u32 %v6316_v50, %v4846_v49 }
  0x22   : > { %2929 = vmatpush.bf16.msra.mxu1 %v6259_v20  ;;  %925 = vperm.xlu0 %6637, %v739_v24   ;;  %v769_v53 = vld [vmem:[%s7832_s2 + $0x1e0] sm:$0xff]  ;;  %v4839_v55 = vor.u32 %v6315_v46, %v4838_v45  ;;  %v770_v56 = vld [vmem:[%s7832_s2 + $0x1e8] sm:$0xff]  ;;  %v4843_v57 = vor.u32 %v6311_v47, %v4840_v48  ;;  %v4851_v59 = vor.u32 %v6312_v51, %v4848_v52  ;;  %v720_v10 = vld [vmem:[%s7832_s2 + $0x58] sm:$0xff] }
  0x23   : > { %3098 = vmatpush.bf16.msra.mxu2 %v6267_v21  ;;  %930 = vperm.xlu1 %6638, %v740_v25   ;;  %v737_v54 = vld [vmem:[%s7832_s2 + $0xe0] sm:$0xff]  ;;  %v738_v60 = vld [vmem:[%s7832_s2 + $0xe8] sm:$0xff]  ;;  %v736_v14 = vld [vmem:[%s7832_s2 + $0xd8] sm:$0xff] }
  0x24   : > { %3267 = vmatpush.bf16.msra.mxu3 %v6275_v22  ;;  %v4870_v63 = vld [vmem:[#allocation2 + $0x40] sm:$0xf]  ;;  %v6319_v1 = vld [vmem:[#allocation2 + $0x44] sm:$0xf]  ;;  %v4878_v3 = vld [vmem:[#allocation2 + $0x48] sm:$0xf] }
  0x25   : > { %2761 = vmatpush.bf16.msra.mxu0 %v6250_v26  ;;  %v6323_v0 = vld [vmem:[#allocation2 + $0x5c] sm:$0xf0]  ;;  %v4872_v2 = vld [vmem:[#allocation2 + $0x60] sm:$0xf0]  ;;  %v6324_v4 = vld [vmem:[#allocation2 + $0x64] sm:$0xf0] }
  0x26   : > { %2930 = vmatpush.bf16.msra.mxu1 %v6258_v27  ;;  %v6320_v5 = vld [vmem:[#allocation2 + $0x4c] sm:$0xf]  ;;  %v4871_v9 = vor.u32 %v6323_v0, %v4870_v63  ;;  %v4875_v11 = vor.u32 %v6319_v1, %v4872_v2  ;;  %v4879_v12 = vor.u32 %v6324_v4, %v4878_v3  ;;  %v768_v15 = vld [vmem:[%s7832_s2 + $0x1d8] sm:$0xff]  ;;  %v735_v16 = vld [vmem:[%s7832_s2 + $0xd0] sm:$0xff] }
  0x27   : > { %3099 = vmatpush.bf16.msra.mxu2 %v6266_v28  ;;  %v4880_v6 = vld [vmem:[#allocation2 + $0x68] sm:$0xf0]  ;;  %v4902_v17 = vld [vmem:[#allocation2 + $0x80] sm:$0xf]  ;;  %v6327_v19 = vld [vmem:[#allocation2 + $0x84] sm:$0xf] }
  0x28   : > { %3268 = vmatpush.bf16.msra.mxu3 %v6274_v29  ;;  %v4883_v13 = vor.u32 %v6320_v5, %v4880_v6  ;;  %v6331_v18 = vld [vmem:[#allocation2 + $0x9c] sm:$0xf0]  ;;  %v4904_v20 = vld [vmem:[#allocation2 + $0xa0] sm:$0xf0]  ;;  %v4910_v21 = vld [vmem:[#allocation2 + $0x88] sm:$0xf] }
  0x29   : > { %2762 = vmatpush.bf16.msra.mxu0 %v6249_v30  ;;  %840 = vperm.xlu2 %6639, %v722_v35   ;;  %v6332_v22 = vld [vmem:[#allocation2 + $0xa4] sm:$0xf0]  ;;  %v6328_v23 = vld [vmem:[#allocation2 + $0x8c] sm:$0xf]  ;;  %v749_v25 = vld [vmem:[%s7832_s2 + $0x140] sm:$0xff]  ;;  %v4903_v27 = vor.u32 %v6331_v18, %v4902_v17  ;;  %v4907_v29 = vor.u32 %v6327_v19, %v4904_v20 }
  0x2a   : > { %2931 = vmatpush.bf16.msra.mxu1 %v6257_v31  ;;  %1000 = vperm.xlu0 %6637, %v754_v34   ;;  %v4912_v24 = vld [vmem:[#allocation2 + $0xa8] sm:$0xf0]  ;;  %v717_v26 = vld [vmem:[%s7832_s2 + $0x40] sm:$0xff]  ;;  %v4911_v30 = vor.u32 %v6332_v22, %v4910_v21  ;;  %v748_v50 = vld [vmem:[%s7832_s2 + $0x138] sm:$0xff] }
  0x2b   : > { %3100 = vmatpush.bf16.msra.mxu2 %v6265_v32  ;;  %835 = vperm.xlu1 %6638, %v721_v36   ;;  %v750_v28 = vld [vmem:[%s7832_s2 + $0x148] sm:$0xff]  ;;  %v4915_v31 = vor.u32 %v6328_v23, %v4912_v24  ;;  %v765_v34 = vld [vmem:[%s7832_s2 + $0x1c0] sm:$0xff]  ;;  %v716_v51 = vld [vmem:[%s7832_s2 + $0x38] sm:$0xff] }
  0x2c   : > { %3269 = vmatpush.bf16.msra.mxu3 %v6273_v33  ;;  %v718_v32 = vld [vmem:[%s7832_s2 + $0x48] sm:$0xff]  ;;  %v4934_v35 = vld [vmem:[#allocation2 + $0xc0] sm:$0xf]  ;;  %v715_v52 = vld [vmem:[%s7832_s2 + $0x30] sm:$0xff] }
  0x2d   : > { %2763 = vmatpush.bf16.msra.mxu0 %v6248_v37  ;;  %v766_v33 = vld [vmem:[%s7832_s2 + $0x1c8] sm:$0xff]  ;;  %v6339_v36 = vld [vmem:[#allocation2 + $0xdc] sm:$0xf0]  ;;  %v6335_v37 = vld [vmem:[#allocation2 + $0xc4] sm:$0xf] }
  0x2e   : > { %2932 = vmatpush.bf16.msra.mxu1 %v6256_v38  ;;  %v4936_v38 = vld [vmem:[#allocation2 + $0xe0] sm:$0xf0]  ;;  %v4935_v45 = vor.u32 %v6339_v36, %v4934_v35  ;;  %v734_v46 = vld [vmem:[%s7832_s2 + $0xc8] sm:$0xff]  ;;  %v731_v63 = vld [vmem:[%s7832_s2 + $0xb0] sm:$0xff] }
  0x2f   : > { %3101 = vmatpush.bf16.msra.mxu2 %v6264_v39  ;;  %v4942_v39 = vld [vmem:[#allocation2 + $0xc8] sm:$0xf]  ;;  %v4939_v47 = vor.u32 %v6335_v37, %v4936_v38  ;;  %v764_v1 = vld [vmem:[%s7832_s2 + $0x1b8] sm:$0xff]  ;;  %v5008_v17 = vld [vmem:[#allocation2 + $0x168] sm:$0xf0] }
  0x30   : > { %3270 = vmatpush.bf16.msra.mxu3 %v6272_v40  ;;  %v6340_v40 = vld [vmem:[#allocation2 + $0xe4] sm:$0xf0]  ;;  %v732_v6 = vld [vmem:[%s7832_s2 + $0xb8] sm:$0xff]  ;;  %v761_v18 = vld [vmem:[%s7832_s2 + $0x1a0] sm:$0xff] }
  0x31   : > { %2764 = vmatpush.bf16.msra.mxu0 %v6247_v41  ;;  %915 = vperm.xlu2 %6639, %v737_v54   ;;  %v6336_v41 = vld [vmem:[#allocation2 + $0xcc] sm:$0xf]  ;;  %v4943_v48 = vor.u32 %v6340_v40, %v4942_v39  ;;  %v4966_v54 = vld [vmem:[#allocation2 + $0x100] sm:$0xf]  ;;  %v6359_v35 = vld [vmem:[#allocation2 + $0x184] sm:$0xf] }
  0x32   : > { %2933 = vmatpush.bf16.msra.mxu1 %v6255_v42  ;;  %1075 = vperm.xlu0 %6637, %v769_v53   ;;  %v4944_v42 = vld [vmem:[#allocation2 + $0xe8] sm:$0xf0]  ;;  %v713_v19 = vld [vmem:[%s7832_s2 + $0x20] sm:$0xff]  ;;  %v5038_v38 = vld [vmem:[#allocation2 + $0x188] sm:$0xf] }
  0x33   : > { %3102 = vmatpush.bf16.msra.mxu2 %v6263_v43  ;;  %1080 = vperm.xlu1 %6638, %v770_v56   ;;  %v733_v43 = vld [vmem:[%s7832_s2 + $0xc0] sm:$0xff]  ;;  %v4947_v49 = vor.u32 %v6336_v41, %v4944_v42  ;;  %v714_v21 = vld [vmem:[%s7832_s2 + $0x28] sm:$0xff]  ;;  %v743_v42 = vld [vmem:[%s7832_s2 + $0x110] sm:$0xff] }
  0x34   : > { %3271 = vmatpush.bf16.msra.mxu3 %v6271_v44  ;;  %2765 = vmatmul.bf16.vlgmr.msra.gmra.mxu0 %v4839_v55  ;;  %v747_v44 = vld [vmem:[%s7832_s2 + $0x130] sm:$0xff]  ;;  %v6347_v55 = vld [vmem:[#allocation2 + $0x11c] sm:$0xf0]  ;;  %v6343_v56 = vld [vmem:[#allocation2 + $0x104] sm:$0xf] }
  0x35   : > { %2934 = vmatmul.bf16.vlgmr.msra.gmra.mxu1 %v4843_v57  ;;  %v4968_v57 = vld [vmem:[#allocation2 + $0x120] sm:$0xf0]  ;;  %v4967_v0 = vor.u32 %v6347_v55, %v4966_v54  ;;  %v6364_v39 = vld [vmem:[#allocation2 + $0x1a4] sm:$0xf0]  ;;  %v6360_v40 = vld [vmem:[#allocation2 + $0x18c] sm:$0xf] }
  0x36   : > { %3103 = vmatmul.bf16.vlgmr.msra.gmra.mxu2 %v4847_v58  ;;  %v4974_v58 = vld [vmem:[#allocation2 + $0x108] sm:$0xf]  ;;  %v4971_v2 = vor.u32 %v6343_v56, %v4968_v57  ;;  %v5032_v37 = vld [vmem:[#allocation2 + $0x1a0] sm:$0xf0]  ;;  %v5040_v41 = vld [vmem:[#allocation2 + $0x1a8] sm:$0xf0] }
  0x37   : > { %3272 = vmatmul.bf16.vlgmr.msra.gmra.mxu3 %v4851_v59  ;;  %v6348_v59 = vld [vmem:[#allocation2 + $0x124] sm:$0xf0]  ;;  %v760_v54 = vld [vmem:[%s7832_s2 + $0x198] sm:$0xff]  ;;  %v759_v55 = vld [vmem:[%s7832_s2 + $0x190] sm:$0xff] }
  0x38   : > { %v4975_v3 = vor.u32 %v6348_v59, %v4974_v58  ;;  %v5062_v58 = vld [vmem:[#allocation2 + $0x1c0] sm:$0xf] }
  0x39   : > { %990 = vperm.xlu2 %6639, %v752_v61   ;;  %v4976_v61 = vld [vmem:[#allocation2 + $0x128] sm:$0xf0]  ;;  %v6371_v59 = vld [vmem:[#allocation2 + $0x1dc] sm:$0xf0] }
  0x3a   : > { %920 = vperm.xlu0 %6637, %v738_v60   ;;  %v6344_v60 = vld [vmem:[#allocation2 + $0x10c] sm:$0xf] }
  0x3b   : > { %985 = vperm.xlu1 %6638, %v751_v62   ;;  %v763_v62 = vld [vmem:[%s7832_s2 + $0x1b0] sm:$0xff]  ;;  %v4979_v4 = vor.u32 %v6344_v60, %v4976_v61  ;;  %v6367_v60 = vld [vmem:[#allocation2 + $0x1c4] sm:$0xf] }
  0x41   : > { %1065 = vperm.xlu2 %6639, %v767_v7   ;;  %v746_v7 = vld [vmem:[%s7832_s2 + $0x128] sm:$0xff] }
  0x42   : > { %825 = vperm.xlu0 %6637, %v719_v8   ;;  %v745_v8 = vld [vmem:[%s7832_s2 + $0x120] sm:$0xff] }
  0x43   : > { %830 = vperm.xlu1 %6638, %v720_v10   ;;  %v4998_v10 = vld [vmem:[#allocation2 + $0x140] sm:$0xf] }
  0x44   : > { %2770 = vmatmul.bf16.gmra.mxu0 %v4871_v9 }
  0x45   : > { %2939 = vmatmul.bf16.gmra.mxu1 %v4875_v11  ;;  %v6355_v11 = vld [vmem:[#allocation2 + $0x15c] sm:$0xf0] }
  0x46   : > { %3108 = vmatmul.bf16.gmra.mxu2 %v4879_v12  ;;  %v6351_v12 = vld [vmem:[#allocation2 + $0x144] sm:$0xf]  ;;  %v4999_v20 = vor.u32 %v6355_v11, %v4998_v10 }
  0x47   : > { %3277 = vmatmul.bf16.gmra.mxu3 %v4883_v13  ;;  %v5000_v13 = vld [vmem:[#allocation2 + $0x160] sm:$0xf0] }
  0x48   : > { %v5003_v22 = vor.u32 %v6351_v12, %v5000_v13 }
  0x49   : > { %910 = vperm.xlu2 %6639, %v736_v14   ;;  %v5006_v14 = vld [vmem:[#allocation2 + $0x148] sm:$0xf] }
  0x4a   : > { %1070 = vperm.xlu0 %6637, %v768_v15   ;;  %v6356_v15 = vld [vmem:[#allocation2 + $0x164] sm:$0xf0] }
  0x4b   : > { %905 = vperm.xlu1 %6638, %v735_v16   ;;  %v6352_v16 = vld [vmem:[#allocation2 + $0x14c] sm:$0xf]  ;;  %v5007_v23 = vor.u32 %v6356_v15, %v5006_v14 }
  0x4c   : > { %v5011_v24 = vor.u32 %v6352_v16, %v5008_v17  ;;  %v710_v15 = vld [vmem:[%s7832_s2 + $0x8] sm:$0xff]  ;;  %v709_v17 = vld [vmem:[%s7832_s2] sm:$0xff] }
  0x4d   : > { %v742_v16 = vld [vmem:[%s7832_s2 + $0x108] sm:$0xff] }
  0x51   : > { %815 = vperm.xlu2 %6639, %v717_v26  }
  0x52   : > { %975 = vperm.xlu0 %6637, %v749_v25  }
  0x53   : > { %980 = vperm.xlu1 %6638, %v750_v28   ;;  %v730_v28 = vld [vmem:[%s7832_s2 + $0xa8] sm:$0xff] }
  0x54   : > { %2775 = vmatmul.bf16.gmra.mxu0 %v4903_v27 }
  0x55   : > { %2944 = vmatmul.bf16.gmra.mxu1 %v4907_v29  ;;  %v762_v29 = vld [vmem:[%s7832_s2 + $0x1a8] sm:$0xff] }
  0x56   : > { %3113 = vmatmul.bf16.gmra.mxu2 %v4911_v30  ;;  %v729_v30 = vld [vmem:[%s7832_s2 + $0xa0] sm:$0xff] }
  0x57   : > { %3282 = vmatmul.bf16.gmra.mxu3 %v4915_v31 }
  0x59   : > { %1060 = vperm.xlu2 %6639, %v766_v33   ;;  %v5030_v33 = vld [vmem:[#allocation2 + $0x180] sm:$0xf] }
  0x5a   : > { %820 = vperm.xlu0 %6637, %v718_v32  }
  0x5b   : > { %1055 = vperm.xlu1 %6638, %v765_v34   ;;  %v6363_v34 = vld [vmem:[#allocation2 + $0x19c] sm:$0xf0] }
  0x61   : > { %965 = vperm.xlu2 %6639, %v747_v44   ;;  %v5031_v44 = vor.u32 %v6363_v34, %v5030_v33  ;;  %v5104_v33 = vld [vmem:[#allocation2 + $0x228] sm:$0xf0] }
  0x62   : > { %895 = vperm.xlu0 %6637, %v733_v43   ;;  %v711_v43 = vld [vmem:[%s7832_s2 + $0x10] sm:$0xff] }
  0x63   : > { %900 = vperm.xlu1 %6638, %v734_v46   ;;  %v5035_v46 = vor.u32 %v6359_v35, %v5032_v37  ;;  %v757_v35 = vld [vmem:[%s7832_s2 + $0x180] sm:$0xff] }
  0x64   : > { %2780 = vmatmul.bf16.gmra.mxu0 %v4935_v45  ;;  %v744_v45 = vld [vmem:[%s7832_s2 + $0x118] sm:$0xff] }
  0x65   : > { %2949 = vmatmul.bf16.gmra.mxu1 %v4939_v47  ;;  %v5039_v47 = vor.u32 %v6364_v39, %v5038_v38 }
  0x66   : > { %3118 = vmatmul.bf16.gmra.mxu2 %v4943_v48  ;;  %v5043_v48 = vor.u32 %v6360_v40, %v5040_v41 }
  0x67   : > { %3287 = vmatmul.bf16.gmra.mxu3 %v4947_v49 }
  0x69   : > { %810 = vperm.xlu2 %6639, %v716_v51  }
  0x6a   : > { %970 = vperm.xlu0 %6637, %v748_v50  }
  0x6b   : > { %805 = vperm.xlu1 %6638, %v715_v52   ;;  %v6912_v53 = vpop.permute.xlu2 %1085  ;;  %v712_v52 = vld [vmem:[%s7832_s2 + $0x18] sm:$0xff] }
  0x6c   : > { %7838 = vst [vmem:[#allocation5_spill] sm:$0xff] %v6912_v53 }
  0x71   : > { %885 = vperm.xlu2 %6639, %v731_v63   ;;  %v5070_v63 = vld [vmem:[#allocation2 + $0x1c8] sm:$0xf] }
  0x72   : > { %1045 = vperm.xlu0 %6637, %v763_v62   ;;  %v5064_v62 = vld [vmem:[#allocation2 + $0x1e0] sm:$0xf0] }
  0x73   : > { %1050 = vperm.xlu1 %6638, %v764_v1   ;;  %v6923_v5 = vpop.permute.xlu2 %1090  ;;  %v6368_v1 = vld [vmem:[#allocation2 + $0x1cc] sm:$0xf] }
  0x74   : > { %2785 = vmatmul.bf16.gmra.mxu0 %v4967_v0  ;;  %7839 = vst [vmem:[#allocation6_spill] sm:$0xff] %v6923_v5  ;;  %v6372_v0 = vld [vmem:[#allocation2 + $0x1e4] sm:$0xf0] }
  0x75   : > { %2954 = vmatmul.bf16.gmra.mxu1 %v4971_v2  ;;  %v5072_v2 = vld [vmem:[#allocation2 + $0x1e8] sm:$0xf0]  ;;  %v5071_v10 = vor.u32 %v6372_v0, %v5070_v63  ;;  %v5128_v0 = vld [vmem:[#allocation2 + $0x260] sm:$0xf0] }
  0x76   : > { %3123 = vmatmul.bf16.gmra.mxu2 %v4975_v3  ;;  %v741_v3 = vld [vmem:[%s7832_s2 + $0x100] sm:$0xff]  ;;  %v5075_v11 = vor.u32 %v6368_v1, %v5072_v2  ;;  %v5134_v1 = vld [vmem:[#allocation2 + $0x248] sm:$0xf] }
  0x77   : > { %3292 = vmatmul.bf16.gmra.mxu3 %v4979_v4  ;;  %v5063_v4 = vor.u32 %v6371_v59, %v5062_v58  ;;  %v5126_v59 = vld [vmem:[#allocation2 + $0x240] sm:$0xf]  ;;  %v6388_v2 = vld [vmem:[#allocation2 + $0x264] sm:$0xf0] }
  0x79   : > { %960 = vperm.xlu2 %6639, %v746_v7   ;;  %v728_v7 = vld [vmem:[%s7832_s2 + $0x98] sm:$0xff] }
  0x7a   : > { %890 = vperm.xlu0 %6637, %v732_v6   ;;  %v727_v6 = vld [vmem:[%s7832_s2 + $0x90] sm:$0xff] }
  0x7b   : > { %955 = vperm.xlu1 %6638, %v745_v8   ;;  %v6934_v9 = vpop.permute.xlu2 %995  ;;  %v5067_v8 = vor.u32 %v6367_v60, %v5064_v62  ;;  %v6387_v60 = vld [vmem:[#allocation2 + $0x25c] sm:$0xf0]  ;;  %v6383_v62 = vld [vmem:[#allocation2 + $0x244] sm:$0xf] }
  0x7c   : > { %7840 = vst [vmem:[#allocation7_spill] sm:$0xff] %v6934_v9 }
  0x81   : > { %1035 = vperm.xlu2 %6639, %v761_v18  }
  0x82   : > { %795 = vperm.xlu0 %6637, %v713_v19  }
  0x83   : > { %800 = vperm.xlu1 %6638, %v714_v21   ;;  %v6947_v26 = vpop.permute.xlu2 %840  ;;  %v6379_v21 = vld [vmem:[#allocation2 + $0x21c] sm:$0xf0] }
  0x84   : > { %2790 = vmatmul.bf16.gmra.mxu0 %v4999_v20  ;;  %v6945_v25 = vpop.permute.xlu0 %1005  ;;  %v6949_v27 = vpop.permute.xlu1 %845  ;;  %v5094_v20 = vld [vmem:[#allocation2 + $0x200] sm:$0xf] }
  0x85   : > { %2959 = vmatmul.bf16.gmra.mxu1 %v5003_v22  ;;  %7841 = vst [vmem:[#allocation8_spill] sm:$0xff] %v6945_v25  ;;  %v6375_v22 = vld [vmem:[#allocation2 + $0x204] sm:$0xf]  ;;  %v5095_v34 = vor.u32 %v6379_v21, %v5094_v20 }
  0x86   : > { %3128 = vmatmul.bf16.gmra.mxu2 %v5007_v23 }
  0x87   : > { %3297 = vmatmul.bf16.gmra.mxu3 %v5011_v24  ;;  %v5096_v24 = vld [vmem:[#allocation2 + $0x220] sm:$0xf0] }
  0x88   : > { %v5099_v38 = vor.u32 %v6375_v22, %v5096_v24 }
  0x89   : > { %880 = vperm.xlu2 %6639, %v730_v28   ;;  %v5102_v28 = vld [vmem:[#allocation2 + $0x208] sm:$0xf] }
  0x8a   : > { %1040 = vperm.xlu0 %6637, %v762_v29   ;;  %v6380_v29 = vld [vmem:[#allocation2 + $0x224] sm:$0xf0] }
  0x8b   : > { %875 = vperm.xlu1 %6638, %v729_v30   ;;  %v6962_v32 = vpop.permute.xlu2 %915  ;;  %v6376_v30 = vld [vmem:[#allocation2 + $0x20c] sm:$0xf]  ;;  %v5103_v39 = vor.u32 %v6380_v29, %v5102_v28 }
  0x8c   : > { %v6960_v31 = vpop.permute.xlu0 %1010  ;;  %v5107_v41 = vor.u32 %v6376_v30, %v5104_v33 }
  0x8d   : > { %7842 = vst [vmem:[#allocation9_spill] sm:$0xff] %v6960_v31  ;;  %v6964_v36 = vpop.permute.xlu1 %850 }
  0x91   : > { %785 = vperm.xlu2 %6639, %v711_v43  }
  0x92   : > { %945 = vperm.xlu0 %6637, %v743_v42  }
  0x93   : > { %950 = vperm.xlu1 %6638, %v744_v45   ;;  %v6977_v50 = vpop.permute.xlu2 %990 }
  0x94   : > { %2795 = vmatmul.bf16.gmra.mxu0 %v5031_v44  ;;  %v6975_v49 = vpop.permute.xlu0 %925  ;;  %7843 = vst [vmem:[#allocation10_spill] sm:$0xff] %v6977_v50 }
  0x95   : > { %2964 = vmatmul.bf16.gmra.mxu1 %v5035_v46  ;;  %v6979_v51 = vpop.permute.xlu1 %930  ;;  %v726_v46 = vld [vmem:[%s7832_s2 + $0x88] sm:$0xff] }
  0x96   : > { %3133 = vmatmul.bf16.gmra.mxu2 %v5039_v47 }
  0x97   : > { %3302 = vmatmul.bf16.gmra.mxu3 %v5043_v48 }
  0x99   : > { %1030 = vperm.xlu2 %6639, %v760_v54  }
  0x9a   : > { %790 = vperm.xlu0 %6637, %v712_v52   ;;  %v725_v52 = vld [vmem:[%s7832_s2 + $0x80] sm:$0xff] }
  0x9b   : > { %1025 = vperm.xlu1 %6638, %v759_v55   ;;  %v6992_v57 = vpop.permute.xlu2 %1065 }
  0x9c   : > { %v6990_v56 = vpop.permute.xlu0 %1000  ;;  %7845 = vst [vmem:[#allocation12_spill] sm:$0xff] %v6992_v57 }
  0x9d   : > { %7844 = vst [vmem:[#allocation11_spill] sm:$0xff] %v6990_v56  ;;  %v6994_v61 = vpop.permute.xlu1 %835 }
  0xa1   : > { %935 = vperm.xlu2 %6639, %v741_v3   ;;  %v6384_v3 = vld [vmem:[#allocation2 + $0x24c] sm:$0xf] }
  0xa2   : > { %865 = vperm.xlu0 %6637, %v727_v6  }
  0xa3   : > { %870 = vperm.xlu1 %6638, %v728_v7   ;;  %v7007_v13 = vpop.permute.xlu2 %910  ;;  %v5127_v7 = vor.u32 %v6387_v60, %v5126_v59  ;;  %v6396_v59 = vld [vmem:[#allocation2 + $0x2a4] sm:$0xf0]  ;;  %v6392_v60 = vld [vmem:[#allocation2 + $0x28c] sm:$0xf] }
  0xa4   : > { %2800 = vmatmul.bf16.gmra.mxu0 %v5063_v4  ;;  %v7005_v12 = vpop.permute.xlu0 %1075  ;;  %v5136_v4 = vld [vmem:[#allocation2 + $0x268] sm:$0xf0] }
  0xa5   : > { %2969 = vmatmul.bf16.gmra.mxu1 %v5067_v8  ;;  %7846 = vst [vmem:[#allocation13_spill] sm:$0xff] %v7005_v12  ;;  %v7009_v14 = vpop.permute.xlu1 %1080 }
  0xa6   : > { %3138 = vmatmul.bf16.gmra.mxu2 %v5071_v10  ;;  %7847 = vst [vmem:[#allocation14_spill] sm:$0xff] %v7009_v14 }
  0xa7   : > { %3307 = vmatmul.bf16.gmra.mxu3 %v5075_v11  ;;  %v5131_v11 = vor.u32 %v6383_v62, %v5128_v0  ;;  %v5168_v62 = vld [vmem:[#allocation2 + $0x2a8] sm:$0xf0] }
  0xa9   : > { %780 = vperm.xlu2 %6639, %v710_v15   ;;  %v5135_v15 = vor.u32 %v6388_v2, %v5134_v1 }
  0xaa   : > { %940 = vperm.xlu0 %6637, %v742_v16  }
  0xab   : > { %775 = vperm.xlu1 %6638, %v709_v17   ;;  %v7022_v19 = vpop.permute.xlu2 %815  ;;  %v5139_v17 = vor.u32 %v6384_v3, %v5136_v4 }
  0xac   : > { %v7020_v18 = vpop.permute.xlu0 %920 }
  0xad   : > { %v7024_v23 = vpop.permute.xlu1 %985 }
  0xae   : > { %7848 = vst [vmem:[#allocation15_spill] sm:$0xff] %v7024_v23 }
  0xb1   : > { %v7029_v37 = vpop.f32.mrf.mxu0  ;;  %855 = vperm.xlu2 %6639, %v725_v52   ;;  %v5166_v52 = vld [vmem:[#allocation2 + $0x288] sm:$0xf] }
  0xb2   : > { %7849 = vst [vmem:[#allocation16_spill] sm:$0xff] %v7029_v37  ;;  %v7031_v40 = vpop.f32.mrf.mxu1  ;;  %1015 = vperm.xlu0 %6637, %v757_v35   ;;  %v5158_v35 = vld [vmem:[#allocation2 + $0x280] sm:$0xf] }
  0xb3   : > { %7850 = vst [vmem:[#allocation17_spill] sm:$0xff] %v7031_v40  ;;  %v7035_v43 = vpop.permute.xlu2 %1060 }
  0xb4   : > { %2805 = vmatmul.bf16.gmra.mxu0 %v5095_v34  ;;  %v7033_v42 = vpop.permute.xlu0 %825  ;;  %7851 = vst [vmem:[#allocation18_spill] sm:$0xff] %v7035_v43 }
  0xb5   : > { %2974 = vmatmul.bf16.gmra.mxu1 %v5099_v38  ;;  %v7037_v44 = vpop.permute.xlu1 %830  ;;  %v6395_v38 = vld [vmem:[#allocation2 + $0x29c] sm:$0xf0] }
  0xb6   : > { %3143 = vmatmul.bf16.gmra.mxu2 %v5103_v39  ;;  %v6391_v39 = vld [vmem:[#allocation2 + $0x284] sm:$0xf]  ;;  %v5159_v1 = vor.u32 %v6395_v38, %v5158_v35 }
  0xb7   : > { %3312 = vmatmul.bf16.gmra.mxu3 %v5107_v41 }
  0xb9   : > { %v7039_v45 = vpop.f32.mrf.mxu2  ;;  %v7046_v48 = vpop.f32.mrf.mxu0 }
  0xba   : > { %7852 = vst [vmem:[#allocation19_spill] sm:$0xff] %v7039_v45  ;;  %v7044_v47 = vpop.f32.mrf.mxu3  ;;  %v7051_v54 = vpop.f32.mrf.mxu1  ;;  %860 = vperm.xlu0 %6637, %v726_v46   ;;  %v5160_v46 = vld [vmem:[#allocation2 + $0x2a0] sm:$0xf0]  ;;  %v5200_v45 = vld [vmem:[#allocation2 + $0x2e8] sm:$0xf0] }
  0xbb   : > { %7853 = vst [vmem:[#allocation20_spill] sm:$0xff] %v7044_v47  ;;  %v7055_v58 = vpop.permute.xlu2 %965  ;;  %v5163_v4 = vor.u32 %v6391_v39, %v5160_v46 }
  0xbc   : > { %7854 = vst [vmem:[#allocation21_spill] sm:$0xff] %v7046_v48  ;;  %v7053_v55 = vpop.permute.xlu0 %1070 }
  0xbd   : > { %7855 = vst [vmem:[#allocation22_spill] sm:$0xff] %v7051_v54  ;;  %v7057_v63 = vpop.permute.xlu1 %905  ;;  %v6400_v54 = vld [vmem:[#allocation2 + $0x2cc] sm:$0xf] }
  0xbe   : > { %7856 = vst [vmem:[#allocation23_spill] sm:$0xff] %v7053_v55  ;;  %v5203_v57 = vor.u32 %v6400_v54, %v5200_v45  ;;  %v6411_v45 = vld [vmem:[#allocation2 + $0x31c] sm:$0xf0]  ;;  %v6407_v54 = vld [vmem:[#allocation2 + $0x304] sm:$0xf] }
  0xc1   : > { %v7059_v6 = vpop.f32.mrf.mxu2  ;;  %v7063_v10 = vpop.f32.mrf.mxu0 }
  0xc2   : > { %7857 = vst [vmem:[#allocation24_spill] sm:$0xff] %v7059_v6  ;;  %v7061_v8 = vpop.f32.mrf.mxu3  ;;  %v7065_v16 = vpop.f32.mrf.mxu1 }
  0xc3   : > { %7858 = vst [vmem:[#allocation25_spill] sm:$0xff] %v7061_v8  ;;  %v7069_v21 = vpop.permute.xlu2 %810 }
  0xc4   : > { %2810 = vmatmul.bf16.gmra.mxu0 %v5127_v7  ;;  %v7067_v20 = vpop.permute.xlu0 %975  ;;  %v5167_v7 = vor.u32 %v6396_v59, %v5166_v52  ;;  %v5190_v59 = vld [vmem:[#allocation2 + $0x2c0] sm:$0xf] }
  0xc5   : > { %2979 = vmatmul.bf16.gmra.mxu1 %v5131_v11  ;;  %v7071_v22 = vpop.permute.xlu1 %980 }
  0xc6   : > { %3148 = vmatmul.bf16.gmra.mxu2 %v5135_v15  ;;  %7859 = vst [vmem:[#allocation26_spill] sm:$0xff] %v7071_v22  ;;  %v5171_v15 = vor.u32 %v6392_v60, %v5168_v62  ;;  %v6403_v60 = vld [vmem:[#allocation2 + $0x2dc] sm:$0xf0]  ;;  %v6399_v62 = vld [vmem:[#allocation2 + $0x2c4] sm:$0xf] }
  0xc7   : > { %3317 = vmatmul.bf16.gmra.mxu3 %v5139_v17  ;;  %v5191_v5 = vor.u32 %v6403_v60, %v5190_v59 }
  0xc9   : > { %v7073_v24 = vpop.f32.mrf.mxu2  ;;  %v7077_v29 = vpop.f32.mrf.mxu0 }
  0xca   : > { %v7075_v28 = vpop.f32.mrf.mxu3  ;;  %v7079_v30 = vpop.f32.mrf.mxu1 }
  0xcb   : > { %v7083_v34 = vpop.permute.xlu2 %885 }
  0xcc   : > { %v7081_v33 = vpop.permute.xlu0 %820 }
  0xcd   : > { %v7085_v41 = vpop.permute.xlu1 %1055 }
  0xce   : > { %7860 = vst [vmem:[#allocation27_spill] sm:$0xff] %v7085_v41 }
  0xd1   : > { %v7087_v0 = vpop.f32.mrf.mxu2  ;;  %v7091_v3 = vpop.f32.mrf.mxu0 }
  0xd2   : > { %v7089_v2 = vpop.f32.mrf.mxu3  ;;  %v7093_v11 = vpop.f32.mrf.mxu1 }
  0xd3   : > { %v7097_v8 = vpop.permute.xlu2 %960 }
  0xd4   : > { %2815 = vmatmul.bf16.gmra.mxu0 %v5159_v1  ;;  %v7095_v17 = vpop.permute.xlu0 %895 }
  0xd5   : > { %2984 = vmatmul.bf16.gmra.mxu1 %v5163_v4  ;;  %v7099_v6 = vpop.permute.xlu1 %900  ;;  %v5192_v4 = vld [vmem:[#allocation2 + $0x2e0] sm:$0xf0] }
  0xd6   : > { %3153 = vmatmul.bf16.gmra.mxu2 %v5167_v7  ;;  %v5198_v7 = vld [vmem:[#allocation2 + $0x2c8] sm:$0xf]  ;;  %v5195_v53 = vor.u32 %v6399_v62, %v5192_v4  ;;  %v5224_v4 = vld [vmem:[#allocation2 + $0x320] sm:$0xf0] }
  0xd7   : > { %3322 = vmatmul.bf16.gmra.mxu3 %v5171_v15  ;;  %v6404_v15 = vld [vmem:[#allocation2 + $0x2e4] sm:$0xf0] }
  0xd8   : > { %v5199_v14 = vor.u32 %v6404_v15, %v5198_v7  ;;  %v6412_v7 = vld [vmem:[#allocation2 + $0x324] sm:$0xf0]  ;;  %v6408_v15 = vld [vmem:[#allocation2 + $0x30c] sm:$0xf] }
  0xd9   : > { %v7101_v35 = vpop.f32.mrf.mxu2  ;;  %v7105_v47 = vpop.f32.mrf.mxu0 }
  0xda   : > { %v7103_v38 = vpop.f32.mrf.mxu3  ;;  %v7107_v39 = vpop.f32.mrf.mxu1 }
  0xdb   : > { %v7111_v52 = vpop.permute.xlu2 %1035 }
  0xdc   : > { %v7109_v46 = vpop.permute.xlu0 %970  ;;  %7861 = vst [vmem:[#allocation28_spill] sm:$0xff] %v7111_v52 }
  0xdd   : > { %v806_v1 = vpop.permute.xlu1 %805 }
  0xe1   : > { %v7113_v48 = vpop.f32.mrf.mxu2  ;;  %v2781_v37 = vpop.f32.mrf.mxu0 }
  0xe2   : > { %v7115_v40 = vpop.f32.mrf.mxu3  ;;  %v2782_v12 = vadd.f32 %v2781_v37, %v806_v1  ;;  %v2950_v55 = vpop.f32.mrf.mxu1 }
  0xe3   : > { %v7119_v52 = vpop.permute.xlu2 %880 }
  0xe4   : > { %v2951_v43 = vadd.f32 %v2950_v55, %v2782_v12  ;;  %2820 = vmatmul.bf16.gmra.mxu0 %v5191_v5  ;;  %v7117_v41 = vpop.permute.xlu0 %1045 }
  0xe5   : > { %2989 = vmatmul.bf16.gmra.mxu1 %v5195_v53  ;;  %7862 = vst [vmem:[#allocation29_spill] sm:$0xff] %v7117_v41  ;;  %v7121_v31 = vpop.permute.xlu1 %1050 }
  0xe6   : > { %3158 = vmatmul.bf16.gmra.mxu2 %v5199_v14  ;;  %7863 = vst [vmem:[#allocation30_spill] sm:$0xff] %v7121_v31  ;;  %v5222_v14 = vld [vmem:[#allocation2 + $0x300] sm:$0xf] }
  0xe7   : > { %3327 = vmatmul.bf16.gmra.mxu3 %v5203_v57 }
  0xe9   : > { %v3119_v59 = vpop.f32.mrf.mxu2  ;;  %v2783_v56 = vpop.f32.mrf.mxu0 }
  0xea   : > { %v3120_v60 = vadd.f32 %v3119_v59, %v2951_v43  ;;  %v3288_v25 = vpop.f32.mrf.mxu3  ;;  %v2784_v62 = vadd.f32 %v2783_v56, %v7069_v21  ;;  %v2952_v37 = vpop.f32.mrf.mxu1  ;;  %v5230_v43 = vld [vmem:[#allocation2 + $0x308] sm:$0xf]  ;;  %v5232_v59 = vld [vmem:[#allocation2 + $0x328] sm:$0xf0]  ;;  %v5223_v21 = vor.u32 %v6411_v45, %v5222_v14 }
  0xeb   : > { %v786_v53 = vpop.permute.xlu2 %785  ;;  %v5231_v31 = vor.u32 %v6412_v7, %v5230_v43  ;;  %v5235_v50 = vor.u32 %v6408_v15, %v5232_v59  ;;  %v5254_v43 = vld [vmem:[#allocation2 + $0x340] sm:$0xf]  ;;  %v5262_v15 = vld [vmem:[#allocation2 + $0x348] sm:$0xf] }
  0xec   : > { %v7124_v1 = vadd.f32 %v3288_v25, %v3120_v60  ;;  %v2953_v12 = vadd.f32 %v2952_v37, %v2784_v62  ;;  %v7126_v5 = vpop.permute.xlu0 %890  ;;  %v2772_v57 = vadd.f32 %v7063_v10, %v786_v53  ;;  %v6420_v59 = vld [vmem:[#allocation2 + $0x364] sm:$0xf0] }
  0xed   : > { %v7128_v55 = vpop.permute.xlu1 %955 }
  0xee   : > { %7864 = vst [vmem:[#allocation31_spill] sm:$0xff] %v7124_v1  ;;  %v2941_v56 = vadd.f32 %v7065_v16, %v2772_v57  ;;  %v5227_v1 = vor.u32 %v6407_v54, %v5224_v4 }
  0xf0   : > { %v3110_v10 = vadd.f32 %v7073_v24, %v2941_v56  ;;  %v5264_v56 = vld [vmem:[#allocation2 + $0x368] sm:$0xf0] }
  0xf1   : > { %v3121_v25 = vpop.f32.mrf.mxu2  ;;  %v2786_v37 = vpop.f32.mrf.mxu0 }
  0xf2   : > { %v3122_v60 = vadd.f32 %v3121_v25, %v2953_v12  ;;  %v3290_v62 = vpop.f32.mrf.mxu3  ;;  %v2787_v41 = vadd.f32 %v2786_v37, %v7022_v19  ;;  %v2955_v9 = vpop.f32.mrf.mxu1  ;;  %v7137_v22 = vadd.f32 %v7075_v28, %v3110_v10  ;;  %v5263_v37 = vor.u32 %v6420_v59, %v5262_v15  ;;  %v6424_v15 = vld [vmem:[#allocation2 + $0x38c] sm:$0xf] }
  0xf3   : > { %v5296_v59 = vld [vmem:[#allocation2 + $0x3a8] sm:$0xf0] }
  0xf4   : > { %v7134_v53 = vadd.f32 %v3290_v62, %v3122_v60  ;;  %v2956_v23 = vadd.f32 %v2955_v9, %v2787_v41  ;;  %2825 = vmatmul.bf16.gmra.mxu0 %v5223_v21  ;;  %v796_v16 = vpop.permute.xlu0 %795 }
  0xf5   : > { %2994 = vmatmul.bf16.gmra.mxu1 %v5227_v1  ;;  %v801_v12 = vpop.permute.xlu1 %800  ;;  %v2777_v14 = vadd.f32 %v7091_v3, %v796_v16 }
  0xf6   : > { %3163 = vmatmul.bf16.gmra.mxu2 %v5231_v31  ;;  %v2779_v19 = vadd.f32 %v7105_v47, %v801_v12 }
  0xf7   : > { %3332 = vmatmul.bf16.gmra.mxu3 %v5235_v50  ;;  %v2946_v45 = vadd.f32 %v7093_v11, %v2777_v14 }
  0xf8   : > { %v2948_v24 = vadd.f32 %v7107_v39, %v2779_v19  ;;  %v6419_v39 = vld [vmem:[#allocation2 + $0x35c] sm:$0xf0] }
  0xf9   : > { %v3124_v54 = vpop.f32.mrf.mxu2  ;;  %v2788_v41 = vpop.f32.mrf.mxu0  ;;  %v3115_v31 = vadd.f32 %v7101_v35, %v2946_v45  ;;  %v6416_v35 = vld [vmem:[#allocation2 + $0x34c] sm:$0xf]  ;;  %v5255_v25 = vor.u32 %v6419_v39, %v5254_v43  ;;  %v5288_v39 = vld [vmem:[#allocation2 + $0x3a0] sm:$0xf0] }
  0xfa   : > { %v3125_v57 = vadd.f32 %v3124_v54, %v2956_v23  ;;  %v3293_v9 = vpop.f32.mrf.mxu3  ;;  %v2789_v28 = vadd.f32 %v2788_v41, %v7081_v33  ;;  %v2957_v4 = vpop.f32.mrf.mxu1  ;;  %v3117_v50 = vadd.f32 %v7113_v48, %v2948_v24  ;;  %v6415_v23 = vld [vmem:[#allocation2 + $0x344] sm:$0xf]  ;;  %v5267_v12 = vor.u32 %v6416_v35, %v5264_v56 }
  0xfb   : > { %v7149_v47 = vadd.f32 %v7103_v38, %v3115_v31  ;;  %v5256_v33 = vld [vmem:[#allocation2 + $0x360] sm:$0xf0]  ;;  %v5286_v31 = vld [vmem:[#allocation2 + $0x380] sm:$0xf] }
  0xfc   : > { %v7146_v1 = vadd.f32 %v3293_v9, %v3125_v57  ;;  %v2958_v3 = vadd.f32 %v2957_v4, %v2789_v28  ;;  %v7151_v11 = vpop.permute.xlu0 %1040  ;;  %v7154_v7 = vadd.f32 %v7115_v40, %v3117_v50  ;;  %v5259_v38 = vor.u32 %v6415_v23, %v5256_v33  ;;  %v6427_v50 = vld [vmem:[#allocation2 + $0x39c] sm:$0xf0]  ;;  %v5294_v23 = vld [vmem:[#allocation2 + $0x388] sm:$0xf] }
  0xfd   : > { %v6428_v33 = vld [vmem:[#allocation2 + $0x3a4] sm:$0xf0] }
 0x101   : > { %v3126_v48 = vpop.f32.mrf.mxu2  ;;  %v2791_v62 = vpop.f32.mrf.mxu0 }
 0x102   : > { %v3127_v21 = vadd.f32 %v3126_v48, %v2958_v3  ;;  %v3295_v60 = vpop.f32.mrf.mxu3  ;;  %v2792_v10 = vadd.f32 %v2791_v62, %v7033_v42  ;;  %v2960_v16 = vpop.f32.mrf.mxu1  ;;  %v6423_v3 = vld [vmem:[#allocation2 + $0x384] sm:$0xf]  ;;  %v5287_v48 = vor.u32 %v6427_v50, %v5286_v31  ;;  %v5295_v62 = vor.u32 %v6428_v33, %v5294_v23  ;;  %v5318_v31 = vld [vmem:[#allocation2 + $0x3c0] sm:$0xf]  ;;  %v6432_v23 = vld [vmem:[#allocation2 + $0x3cc] sm:$0xf] }
 0x103   : > { %v6431_v50 = vld [vmem:[#allocation2 + $0x3c4] sm:$0xf]  ;;  %v5328_v33 = vld [vmem:[#allocation2 + $0x3e8] sm:$0xf0] }
 0x104   : > { %v7157_v14 = vadd.f32 %v3295_v60, %v3127_v21  ;;  %v2961_v40 = vadd.f32 %v2960_v16, %v2792_v10  ;;  %2830 = vmatmul.bf16.gmra.mxu0 %v5255_v25  ;;  %v7159_v19 = vpop.permute.xlu0 %945  ;;  %v5291_v60 = vor.u32 %v6423_v3, %v5288_v39  ;;  %v7168_v16 = vpop.permute.xlu2 %1030  ;;  %v5320_v3 = vld [vmem:[#allocation2 + $0x3e0] sm:$0xf0]  ;;  %v6436_v39 = vld [vmem:[#allocation2 + $0x3e4] sm:$0xf0] }
 0x105   : > { %2999 = vmatmul.bf16.gmra.mxu1 %v5259_v38 }
 0x106   : > { %3168 = vmatmul.bf16.gmra.mxu2 %v5263_v37 }
 0x107   : > { %3337 = vmatmul.bf16.gmra.mxu3 %v5267_v12 }
 0x109   : > { %v3129_v45 = vpop.f32.mrf.mxu2  ;;  %v2793_v57 = vpop.f32.mrf.mxu0 }
 0x10a   : > { %v3130_v54 = vadd.f32 %v3129_v45, %v2961_v40  ;;  %v3298_v24 = vpop.f32.mrf.mxu3  ;;  %v2794_v9 = vadd.f32 %v2793_v57, %v7037_v44  ;;  %v2962_v41 = vpop.f32.mrf.mxu1 }
 0x10c   : > { %v7162_v28 = vadd.f32 %v3298_v24, %v3130_v54  ;;  %v2963_v42 = vadd.f32 %v2962_v41, %v2794_v9  ;;  %v791_v4 = vpop.permute.xlu0 %790 }
 0x10d   : > { %v2774_v43 = vadd.f32 %v7077_v29, %v791_v4  ;;  %v5299_v29 = vor.u32 %v6424_v15, %v5296_v59  ;;  %v7180_v4 = vpop.permute.xlu2 %935 }
 0x10f   : > { %v2943_v35 = vadd.f32 %v7079_v30, %v2774_v43  ;;  %v5326_v43 = vld [vmem:[#allocation2 + $0x3c8] sm:$0xf] }
 0x111   : > { %v3131_v56 = vpop.f32.mrf.mxu2  ;;  %v2796_v21 = vpop.f32.mrf.mxu0  ;;  %v3112_v38 = vadd.f32 %v7087_v0, %v2943_v35 }
 0x112   : > { %v3132_v44 = vadd.f32 %v3131_v56, %v2963_v42  ;;  %v3300_v25 = vpop.f32.mrf.mxu3  ;;  %v2797_v37 = vadd.f32 %v2796_v21, %v6994_v61  ;;  %v2965_v10 = vpop.f32.mrf.mxu1 }
 0x113   : > { %v7173_v30 = vadd.f32 %v7089_v2, %v3112_v38  ;;  %v6435_v2 = vld [vmem:[#allocation2 + $0x3dc] sm:$0xf0] }
 0x114   : > { %v7170_v12 = vadd.f32 %v3300_v25, %v3132_v44  ;;  %v2966_v40 = vadd.f32 %v2965_v10, %v2797_v37  ;;  %2835 = vmatmul.bf16.gmra.mxu0 %v5287_v48  ;;  %v7175_v54 = vpop.permute.xlu0 %865  ;;  %v5319_v59 = vor.u32 %v6435_v2, %v5318_v31  ;;  %v5327_v44 = vor.u32 %v6436_v39, %v5326_v43  ;;  %v5350_v31 = vld [vmem:[#allocation2 + $0x400] sm:$0xf]  ;;  %v5358_v43 = vld [vmem:[#allocation2 + $0x408] sm:$0xf] }
 0x115   : > { %3004 = vmatmul.bf16.gmra.mxu1 %v5291_v60  ;;  %v5331_v60 = vor.u32 %v6432_v23, %v5328_v33  ;;  %v7187_v10 = vpop.permute.xlu2 %780  ;;  %v6443_v2 = vld [vmem:[#allocation2 + $0x41c] sm:$0xf0]  ;;  %v6444_v39 = vld [vmem:[#allocation2 + $0x424] sm:$0xf0]  ;;  %v6440_v33 = vld [vmem:[#allocation2 + $0x40c] sm:$0xf] }
 0x116   : > { %3173 = vmatmul.bf16.gmra.mxu2 %v5295_v62 }
 0x117   : > { %3342 = vmatmul.bf16.gmra.mxu3 %v5299_v29 }
 0x119   : > { %v3134_v45 = vpop.f32.mrf.mxu2  ;;  %v2798_v61 = vpop.f32.mrf.mxu0 }
 0x11a   : > { %v3135_v0 = vadd.f32 %v3134_v45, %v2966_v40  ;;  %v3303_v24 = vpop.f32.mrf.mxu3  ;;  %v2799_v57 = vadd.f32 %v2798_v61, %v6947_v26  ;;  %v2967_v9 = vpop.f32.mrf.mxu1  ;;  %v5323_v26 = vor.u32 %v6431_v50, %v5320_v3  ;;  %v6439_v50 = vld [vmem:[#allocation2 + $0x404] sm:$0xf] }
 0x11b   : > { %v5352_v3 = vld [vmem:[#allocation2 + $0x420] sm:$0xf0] }
 0x11c   : > { %v7178_v41 = vadd.f32 %v3303_v24, %v3135_v0  ;;  %v2968_v42 = vadd.f32 %v2967_v9, %v2799_v57  ;;  %v7185_v38 = vpop.permute.xlu0 %940  ;;  %v7189_v24 = vpop.permute.xlu1 %875 }
 0x11d   : > { %v856_v23 = vpop.permute.xlu2 %855 }
 0x121   : > { %v3136_v15 = vpop.f32.mrf.mxu2  ;;  %v2801_v48 = vpop.f32.mrf.mxu0 }
 0x122   : > { %v3137_v35 = vadd.f32 %v3136_v15, %v2968_v42  ;;  %v3305_v56 = vpop.f32.mrf.mxu3  ;;  %v2802_v25 = vadd.f32 %v2801_v48, %v6949_v27  ;;  %v2970_v21 = vpop.f32.mrf.mxu1  ;;  %v5360_v15 = vld [vmem:[#allocation2 + $0x428] sm:$0xf0] }
 0x124   : > { %v7183_v62 = vadd.f32 %v3305_v56, %v3137_v35  ;;  %v2971_v37 = vadd.f32 %v2970_v21, %v2802_v25  ;;  %2840 = vmatmul.bf16.gmra.mxu0 %v5319_v59  ;;  %v7194_v42 = vpop.permute.xlu0 %1015  ;;  %v5351_v35 = vor.u32 %v6443_v2, %v5350_v31 }
 0x125   : > { %3009 = vmatmul.bf16.gmra.mxu1 %v5323_v26  ;;  %v5355_v26 = vor.u32 %v6439_v50, %v5352_v3 }
 0x126   : > { %3178 = vmatmul.bf16.gmra.mxu2 %v5327_v44  ;;  %v5359_v44 = vor.u32 %v6444_v39, %v5358_v43  ;;  %v5382_v43 = vld [vmem:[#allocation2 + $0x440] sm:$0xf] }
 0x127   : > { %3347 = vmatmul.bf16.gmra.mxu3 %v5331_v60  ;;  %v5363_v60 = vor.u32 %v6440_v33, %v5360_v15  ;;  %v6451_v39 = vld [vmem:[#allocation2 + $0x45c] sm:$0xf0]  ;;  %v5384_v15 = vld [vmem:[#allocation2 + $0x460] sm:$0xf0] }
 0x129   : > { %v3139_v29 = vpop.f32.mrf.mxu2  ;;  %v2803_v0 = vpop.f32.mrf.mxu0 }
 0x12a   : > { %v3140_v40 = vadd.f32 %v3139_v29, %v2971_v37  ;;  %v3308_v45 = vpop.f32.mrf.mxu3  ;;  %v2804_v27 = vadd.f32 %v2803_v0, %v6964_v36  ;;  %v2972_v61 = vpop.f32.mrf.mxu1 }
 0x12b   : > { %v7198_v29 = vpop.permute.xlu1 %950 }
 0x12c   : > { %v7192_v57 = vadd.f32 %v3308_v45, %v3140_v40  ;;  %v2973_v9 = vadd.f32 %v2972_v61, %v2804_v27  ;;  %v861_v45 = vpop.permute.xlu0 %860 }
 0x131   : > { %v3141_v59 = vpop.f32.mrf.mxu2  ;;  %v2806_v36 = vpop.f32.mrf.mxu0 }
 0x132   : > { %v3142_v56 = vadd.f32 %v3141_v59, %v2973_v9  ;;  %v3310_v48 = vpop.f32.mrf.mxu3  ;;  %v2975_v25 = vpop.f32.mrf.mxu1  ;;  %v2807_v21 = vadd.f32 %v2806_v36, %v856_v23  ;;  %v6447_v23 = vld [vmem:[#allocation2 + $0x444] sm:$0xf]  ;;  %v5390_v59 = vld [vmem:[#allocation2 + $0x448] sm:$0xf] }
 0x133   : > { %v7202_v33 = vpop.permute.xlu1 %1025 }
 0x134   : > { %v7196_v37 = vadd.f32 %v3310_v48, %v3142_v56  ;;  %2845 = vmatmul.bf16.gmra.mxu0 %v5351_v35  ;;  %v2976_v40 = vadd.f32 %v2975_v25, %v2807_v21  ;;  %v6452_v35 = vld [vmem:[#allocation2 + $0x464] sm:$0xf0]  ;;  %v6448_v56 = vld [vmem:[#allocation2 + $0x44c] sm:$0xf] }
 0x135   : > { %3014 = vmatmul.bf16.gmra.mxu1 %v5355_v26  ;;  %v5392_v48 = vld [vmem:[#allocation2 + $0x468] sm:$0xf0]  ;;  %v5383_v26 = vor.u32 %v6451_v39, %v5382_v43 }
 0x136   : > { %3183 = vmatmul.bf16.gmra.mxu2 %v5359_v44 }
 0x137   : > { %3352 = vmatmul.bf16.gmra.mxu3 %v5363_v60  ;;  %v5387_v60 = vor.u32 %v6447_v23, %v5384_v15 }
 0x139   : > { %v3144_v0 = vpop.f32.mrf.mxu2  ;;  %v2808_v9 = vpop.f32.mrf.mxu0 }
 0x13a   : > { %v3145_v27 = vadd.f32 %v3144_v0, %v2976_v40  ;;  %v3313_v61 = vpop.f32.mrf.mxu3  ;;  %v2809_v31 = vadd.f32 %v2808_v9, %v861_v45  ;;  %v2977_v2 = vpop.f32.mrf.mxu1  ;;  %v5391_v40 = vor.u32 %v6452_v35, %v5390_v59  ;;  %v6459_v59 = vld [vmem:[#allocation2 + $0x49c] sm:$0xf0]  ;;  %v6455_v35 = vld [vmem:[#allocation2 + $0x484] sm:$0xf] }
 0x13c   : > { %v7200_v50 = vadd.f32 %v3313_v61, %v3145_v27  ;;  %v2978_v3 = vadd.f32 %v2977_v2, %v2809_v31  ;;  %v5395_v27 = vor.u32 %v6448_v56, %v5392_v48  ;;  %v871_v31 = vpop.permute.xlu1 %870  ;;  %v5416_v56 = vld [vmem:[#allocation2 + $0x4a0] sm:$0xf0]  ;;  %v5422_v48 = vld [vmem:[#allocation2 + $0x488] sm:$0xf] }
 0x13e   : > { %7865 = vst [vmem:[#allocation32_spill] sm:$0xff] %v7200_v50 }
 0x141   : > { %v3146_v36 = vpop.f32.mrf.mxu2  ;;  %v2811_v21 = vpop.f32.mrf.mxu0 }
 0x142   : > { %v3147_v44 = vadd.f32 %v3146_v36, %v2978_v3  ;;  %v3315_v25 = vpop.f32.mrf.mxu3  ;;  %v2812_v45 = vadd.f32 %v2811_v21, %v7175_v54  ;;  %v2980_v0 = vpop.f32.mrf.mxu1  ;;  %v5414_v54 = vld [vmem:[#allocation2 + $0x480] sm:$0xf] }
 0x144   : > { %v7205_v61 = vadd.f32 %v3315_v25, %v3147_v44  ;;  %v2981_v9 = vadd.f32 %v2980_v0, %v2812_v45  ;;  %2850 = vmatmul.bf16.gmra.mxu0 %v5383_v26  ;;  %v6460_v44 = vld [vmem:[#allocation2 + $0x4a4] sm:$0xf0]  ;;  %v6456_v26 = vld [vmem:[#allocation2 + $0x48c] sm:$0xf] }
 0x145   : > { %3019 = vmatmul.bf16.gmra.mxu1 %v5387_v60  ;;  %v5424_v25 = vld [vmem:[#allocation2 + $0x4a8] sm:$0xf0]  ;;  %v5415_v60 = vor.u32 %v6459_v59, %v5414_v54 }
 0x146   : > { %3188 = vmatmul.bf16.gmra.mxu2 %v5391_v40 }
 0x147   : > { %3357 = vmatmul.bf16.gmra.mxu3 %v5395_v27  ;;  %v5419_v27 = vor.u32 %v6455_v35, %v5416_v56 }
 0x149   : > { %v3149_v2 = vpop.f32.mrf.mxu2  ;;  %v2813_v3 = vpop.f32.mrf.mxu0 }
 0x14a   : > { %v3150_v50 = vadd.f32 %v3149_v2, %v2981_v9  ;;  %v3318_v43 = vpop.f32.mrf.mxu3  ;;  %v2814_v39 = vadd.f32 %v2813_v3, %v871_v31  ;;  %v2982_v36 = vpop.f32.mrf.mxu1  ;;  %v5423_v9 = vor.u32 %v6460_v44, %v5422_v48  ;;  %v5427_v2 = vor.u32 %v6456_v26, %v5424_v25  ;;  %v6467_v48 = vld [vmem:[#allocation2 + $0x4dc] sm:$0xf0]  ;;  %v6463_v44 = vld [vmem:[#allocation2 + $0x4c4] sm:$0xf]  ;;  %v5454_v25 = vld [vmem:[#allocation2 + $0x4c8] sm:$0xf] }
 0x14b   : > { %v5448_v26 = vld [vmem:[#allocation2 + $0x4e0] sm:$0xf0] }
 0x14c   : > { %v7207_v23 = vadd.f32 %v3318_v43, %v3150_v50  ;;  %v2983_v15 = vadd.f32 %v2982_v36, %v2814_v39 }
 0x14e   : > { %7866 = vst [vmem:[#allocation33_spill] sm:$0xff] %v7207_v23 }
 0x151   : > { %v3151_v21 = vpop.f32.mrf.mxu2  ;;  %v2816_v0 = vpop.f32.mrf.mxu0 }
 0x152   : > { %v3152_v40 = vadd.f32 %v3151_v21, %v2983_v15  ;;  %v3320_v45 = vpop.f32.mrf.mxu3  ;;  %v2817_v31 = vadd.f32 %v2816_v0, %v7189_v24  ;;  %v2985_v50 = vpop.f32.mrf.mxu1  ;;  %v5446_v24 = vld [vmem:[#allocation2 + $0x4c0] sm:$0xf]  ;;  %v6468_v21 = vld [vmem:[#allocation2 + $0x4e4] sm:$0xf0] }
 0x153   : > { %v5447_v0 = vor.u32 %v6467_v48, %v5446_v24 }
 0x154   : > { %v7210_v43 = vadd.f32 %v3320_v45, %v3152_v40  ;;  %v2986_v3 = vadd.f32 %v2985_v50, %v2817_v31  ;;  %2855 = vmatmul.bf16.gmra.mxu0 %v5415_v60  ;;  %v6464_v60 = vld [vmem:[#allocation2 + $0x4cc] sm:$0xf]  ;;  %v5451_v50 = vor.u32 %v6463_v44, %v5448_v26 }
 0x155   : > { %3024 = vmatmul.bf16.gmra.mxu1 %v5419_v27  ;;  %v5456_v40 = vld [vmem:[#allocation2 + $0x4e8] sm:$0xf0] }
 0x156   : > { %3193 = vmatmul.bf16.gmra.mxu2 %v5423_v9 }
 0x157   : > { %3362 = vmatmul.bf16.gmra.mxu3 %v5427_v2  ;;  %v5455_v2 = vor.u32 %v6468_v21, %v5454_v25  ;;  %v6475_v25 = vld [vmem:[#allocation2 + $0x51c] sm:$0xf0]  ;;  %v6471_v21 = vld [vmem:[#allocation2 + $0x504] sm:$0xf] }
 0x159   : > { %v3154_v39 = vpop.f32.mrf.mxu2  ;;  %v2818_v54 = vpop.f32.mrf.mxu0 }
 0x15a   : > { %v3155_v36 = vadd.f32 %v3154_v39, %v2986_v3  ;;  %v3323_v23 = vpop.f32.mrf.mxu3  ;;  %v2819_v15 = vadd.f32 %v2818_v54, %v7119_v52  ;;  %v2987_v59 = vpop.f32.mrf.mxu1  ;;  %v5459_v3 = vor.u32 %v6464_v60, %v5456_v40  ;;  %v5480_v60 = vld [vmem:[#allocation2 + $0x520] sm:$0xf0]  ;;  %v5486_v40 = vld [vmem:[#allocation2 + $0x508] sm:$0xf] }
 0x15c   : > { %v7213_v35 = vadd.f32 %v3323_v23, %v3155_v36  ;;  %v2988_v56 = vadd.f32 %v2987_v59, %v2819_v15 }
 0x161   : > { %v3156_v45 = vpop.f32.mrf.mxu2  ;;  %v2821_v31 = vpop.f32.mrf.mxu0 }
 0x162   : > { %v3157_v27 = vadd.f32 %v3156_v45, %v2988_v56  ;;  %v3325_v9 = vpop.f32.mrf.mxu3  ;;  %v2822_v52 = vadd.f32 %v2821_v31, %v7083_v34  ;;  %v2990_v23 = vpop.f32.mrf.mxu1  ;;  %v5478_v34 = vld [vmem:[#allocation2 + $0x500] sm:$0xf]  ;;  %v6476_v45 = vld [vmem:[#allocation2 + $0x524] sm:$0xf0] }
 0x163   : > { %v5479_v31 = vor.u32 %v6475_v25, %v5478_v34 }
 0x164   : > { %v7216_v39 = vadd.f32 %v3325_v9, %v3157_v27  ;;  %v2991_v36 = vadd.f32 %v2990_v23, %v2822_v52  ;;  %2860 = vmatmul.bf16.gmra.mxu0 %v5447_v0  ;;  %v6472_v0 = vld [vmem:[#allocation2 + $0x50c] sm:$0xf]  ;;  %v5483_v23 = vor.u32 %v6471_v21, %v5480_v60 }
 0x165   : > { %3029 = vmatmul.bf16.gmra.mxu1 %v5451_v50  ;;  %v5488_v27 = vld [vmem:[#allocation2 + $0x528] sm:$0xf0] }
 0x166   : > { %3198 = vmatmul.bf16.gmra.mxu2 %v5455_v2 }
 0x167   : > { %3367 = vmatmul.bf16.gmra.mxu3 %v5459_v3  ;;  %v5487_v3 = vor.u32 %v6476_v45, %v5486_v40  ;;  %v6483_v40 = vld [vmem:[#allocation2 + $0x55c] sm:$0xf0]  ;;  %v6479_v45 = vld [vmem:[#allocation2 + $0x544] sm:$0xf] }
 0x169   : > { %v3159_v54 = vpop.f32.mrf.mxu2  ;;  %v2823_v24 = vpop.f32.mrf.mxu0 }
 0x16a   : > { %v3160_v15 = vadd.f32 %v3159_v54, %v2991_v36  ;;  %v3328_v59 = vpop.f32.mrf.mxu3  ;;  %v2824_v56 = vadd.f32 %v2823_v24, %v7126_v5  ;;  %v2992_v48 = vpop.f32.mrf.mxu1  ;;  %v5491_v54 = vor.u32 %v6472_v0, %v5488_v27  ;;  %v5512_v0 = vld [vmem:[#allocation2 + $0x560] sm:$0xf0]  ;;  %v5518_v27 = vld [vmem:[#allocation2 + $0x548] sm:$0xf] }
 0x16c   : > { %v7219_v44 = vadd.f32 %v3328_v59, %v3160_v15  ;;  %v2993_v26 = vadd.f32 %v2992_v48, %v2824_v56 }
 0x171   : > { %v3161_v9 = vpop.f32.mrf.mxu2  ;;  %v2826_v52 = vpop.f32.mrf.mxu0 }
 0x172   : > { %v3162_v50 = vadd.f32 %v3161_v9, %v2993_v26  ;;  %v3330_v2 = vpop.f32.mrf.mxu3  ;;  %v2827_v5 = vadd.f32 %v2826_v52, %v7095_v17  ;;  %v2995_v36 = vpop.f32.mrf.mxu1  ;;  %v5510_v17 = vld [vmem:[#allocation2 + $0x540] sm:$0xf]  ;;  %v6484_v9 = vld [vmem:[#allocation2 + $0x564] sm:$0xf0] }
 0x173   : > { %v5511_v52 = vor.u32 %v6483_v40, %v5510_v17 }
 0x174   : > { %v7222_v15 = vadd.f32 %v3330_v2, %v3162_v50  ;;  %v2996_v59 = vadd.f32 %v2995_v36, %v2827_v5  ;;  %2865 = vmatmul.bf16.gmra.mxu0 %v5479_v31  ;;  %v6480_v31 = vld [vmem:[#allocation2 + $0x54c] sm:$0xf]  ;;  %v5515_v36 = vor.u32 %v6479_v45, %v5512_v0 }
 0x175   : > { %3034 = vmatmul.bf16.gmra.mxu1 %v5483_v23  ;;  %v5520_v50 = vld [vmem:[#allocation2 + $0x568] sm:$0xf0] }
 0x176   : > { %3203 = vmatmul.bf16.gmra.mxu2 %v5487_v3 }
 0x177   : > { %3372 = vmatmul.bf16.gmra.mxu3 %v5491_v54  ;;  %v5519_v54 = vor.u32 %v6484_v9, %v5518_v27  ;;  %v6491_v27 = vld [vmem:[#allocation2 + $0x59c] sm:$0xf0]  ;;  %v6487_v9 = vld [vmem:[#allocation2 + $0x584] sm:$0xf] }
 0x179   : > { %v3164_v24 = vpop.f32.mrf.mxu2  ;;  %v2828_v34 = vpop.f32.mrf.mxu0 }
 0x17a   : > { %v3165_v56 = vadd.f32 %v3164_v24, %v2996_v59  ;;  %v3333_v48 = vpop.f32.mrf.mxu3  ;;  %v2829_v26 = vadd.f32 %v2828_v34, %v7099_v6  ;;  %v2997_v25 = vpop.f32.mrf.mxu1  ;;  %v5523_v24 = vor.u32 %v6480_v31, %v5520_v50  ;;  %v5544_v31 = vld [vmem:[#allocation2 + $0x5a0] sm:$0xf0]  ;;  %v5550_v50 = vld [vmem:[#allocation2 + $0x588] sm:$0xf] }
 0x17c   : > { %v7225_v21 = vadd.f32 %v3333_v48, %v3165_v56  ;;  %v2998_v60 = vadd.f32 %v2997_v25, %v2829_v26 }
 0x181   : > { %v3166_v2 = vpop.f32.mrf.mxu2  ;;  %v2831_v5 = vpop.f32.mrf.mxu0 }
 0x182   : > { %v3167_v23 = vadd.f32 %v3166_v2, %v2998_v60  ;;  %v3335_v3 = vpop.f32.mrf.mxu3  ;;  %v2832_v6 = vadd.f32 %v2831_v5, %v7057_v63  ;;  %v3000_v59 = vpop.f32.mrf.mxu1  ;;  %v5542_v63 = vld [vmem:[#allocation2 + $0x580] sm:$0xf]  ;;  %v6492_v2 = vld [vmem:[#allocation2 + $0x5a4] sm:$0xf0] }
 0x183   : > { %v5543_v5 = vor.u32 %v6491_v27, %v5542_v63 }
 0x184   : > { %v7228_v56 = vadd.f32 %v3335_v3, %v3167_v23  ;;  %v3001_v48 = vadd.f32 %v3000_v59, %v2832_v6  ;;  %2870 = vmatmul.bf16.gmra.mxu0 %v5511_v52  ;;  %v6488_v52 = vld [vmem:[#allocation2 + $0x58c] sm:$0xf]  ;;  %v5547_v59 = vor.u32 %v6487_v9, %v5544_v31 }
 0x185   : > { %3039 = vmatmul.bf16.gmra.mxu1 %v5515_v36  ;;  %v5552_v23 = vld [vmem:[#allocation2 + $0x5a8] sm:$0xf0] }
 0x186   : > { %3208 = vmatmul.bf16.gmra.mxu2 %v5519_v54 }
 0x187   : > { %3377 = vmatmul.bf16.gmra.mxu3 %v5523_v24  ;;  %v5551_v24 = vor.u32 %v6492_v2, %v5550_v50  ;;  %v6499_v50 = vld [vmem:[#allocation2 + $0x5dc] sm:$0xf0]  ;;  %v6495_v2 = vld [vmem:[#allocation2 + $0x5c4] sm:$0xf] }
 0x189   : > { %v3169_v34 = vpop.f32.mrf.mxu2  ;;  %v2833_v17 = vpop.f32.mrf.mxu0 }
 0x18a   : > { %v3170_v26 = vadd.f32 %v3169_v34, %v3001_v48  ;;  %v3338_v25 = vpop.f32.mrf.mxu3  ;;  %v2834_v60 = vadd.f32 %v2833_v17, %v7007_v13  ;;  %v3002_v40 = vpop.f32.mrf.mxu1  ;;  %v5555_v34 = vor.u32 %v6488_v52, %v5552_v23  ;;  %v5576_v52 = vld [vmem:[#allocation2 + $0x5e0] sm:$0xf0]  ;;  %v5582_v23 = vld [vmem:[#allocation2 + $0x5c8] sm:$0xf] }
 0x18c   : > { %v7231_v45 = vadd.f32 %v3338_v25, %v3170_v26  ;;  %v3003_v0 = vadd.f32 %v3002_v40, %v2834_v60 }
 0x191   : > { %v3171_v3 = vpop.f32.mrf.mxu2  ;;  %v2836_v6 = vpop.f32.mrf.mxu0 }
 0x192   : > { %v3172_v36 = vadd.f32 %v3171_v3, %v3003_v0  ;;  %v3340_v54 = vpop.f32.mrf.mxu3  ;;  %v2837_v13 = vadd.f32 %v2836_v6, %v6962_v32  ;;  %v3005_v48 = vpop.f32.mrf.mxu1  ;;  %v5574_v32 = vld [vmem:[#allocation2 + $0x5c0] sm:$0xf]  ;;  %v6500_v3 = vld [vmem:[#allocation2 + $0x5e4] sm:$0xf0] }
 0x193   : > { %v5575_v6 = vor.u32 %v6499_v50, %v5574_v32 }
 0x194   : > { %v7234_v26 = vadd.f32 %v3340_v54, %v3172_v36  ;;  %v3006_v25 = vadd.f32 %v3005_v48, %v2837_v13  ;;  %2875 = vmatmul.bf16.gmra.mxu0 %v5543_v5  ;;  %v6496_v5 = vld [vmem:[#allocation2 + $0x5cc] sm:$0xf]  ;;  %v5579_v48 = vor.u32 %v6495_v2, %v5576_v52 }
 0x195   : > { %3044 = vmatmul.bf16.gmra.mxu1 %v5547_v59  ;;  %v5584_v36 = vld [vmem:[#allocation2 + $0x5e8] sm:$0xf0] }
 0x196   : > { %3213 = vmatmul.bf16.gmra.mxu2 %v5551_v24 }
 0x197   : > { %3382 = vmatmul.bf16.gmra.mxu3 %v5555_v34  ;;  %v5583_v34 = vor.u32 %v6500_v3, %v5582_v23  ;;  %v5606_v23 = vld [vmem:[#allocation2 + $0x600] sm:$0xf] }
 0x198   : > { %v6507_v3 = vld [vmem:[#allocation2 + $0x61c] sm:$0xf0] }
 0x199   : > { %v3174_v17 = vpop.f32.mrf.mxu2  ;;  %v2838_v63 = vpop.f32.mrf.mxu0 }
 0x19a   : > { %v3175_v60 = vadd.f32 %v3174_v17, %v3006_v25  ;;  %v3343_v40 = vpop.f32.mrf.mxu3  ;;  %v2839_v0 = vadd.f32 %v2838_v63, %v7020_v18  ;;  %v3007_v27 = vpop.f32.mrf.mxu1  ;;  %v5587_v17 = vor.u32 %v6496_v5, %v5584_v36  ;;  %v758_v63 = vld [vmem:[%s7832_s2 + $0x188] sm:$0xff]  ;;  %v6503_v5 = vld [vmem:[#allocation2 + $0x604] sm:$0xf] }
 0x19b   : > { %1020 = vperm.xlu1 %6638, %v758_v63   ;;  %v5608_v36 = vld [vmem:[#allocation2 + $0x620] sm:$0xf0] }
 0x19c   : > { %v7237_v9 = vadd.f32 %v3343_v40, %v3175_v60  ;;  %v3008_v31 = vadd.f32 %v3007_v27, %v2839_v0 }
 0x1a1   : > { %v3176_v54 = vpop.f32.mrf.mxu2  ;;  %v2841_v13 = vpop.f32.mrf.mxu0 }
 0x1a2   : > { %v3177_v59 = vadd.f32 %v3176_v54, %v3008_v31  ;;  %v3345_v24 = vpop.f32.mrf.mxu3  ;;  %v2842_v18 = vadd.f32 %v2841_v13, %v6975_v49  ;;  %v3010_v25 = vpop.f32.mrf.mxu1  ;;  %v5614_v54 = vld [vmem:[#allocation2 + $0x608] sm:$0xf] }
 0x1a4   : > { %v7240_v60 = vadd.f32 %v3345_v24, %v3177_v59  ;;  %v3011_v40 = vadd.f32 %v3010_v25, %v2842_v18  ;;  %2880 = vmatmul.bf16.gmra.mxu0 %v5575_v6  ;;  %v6508_v6 = vld [vmem:[#allocation2 + $0x624] sm:$0xf0]  ;;  %v6504_v59 = vld [vmem:[#allocation2 + $0x60c] sm:$0xf] }
 0x1a5   : > { %3049 = vmatmul.bf16.gmra.mxu1 %v5579_v48  ;;  %v5616_v24 = vld [vmem:[#allocation2 + $0x628] sm:$0xf0]  ;;  %v5607_v48 = vor.u32 %v6507_v3, %v5606_v23 }
 0x1a6   : > { %3218 = vmatmul.bf16.gmra.mxu2 %v5583_v34 }
 0x1a7   : > { %3387 = vmatmul.bf16.gmra.mxu3 %v5587_v17  ;;  %v5611_v17 = vor.u32 %v6503_v5, %v5608_v36 }
 0x1a9   : > { %v3179_v0 = vpop.f32.mrf.mxu2  ;;  %v2843_v32 = vpop.f32.mrf.mxu0 }
 0x1aa   : > { %v3180_v27 = vadd.f32 %v3179_v0, %v3011_v40  ;;  %v3348_v31 = vpop.f32.mrf.mxu3  ;;  %v2844_v49 = vadd.f32 %v2843_v32, %v6979_v51  ;;  %v3012_v50 = vpop.f32.mrf.mxu1  ;;  %v5615_v40 = vor.u32 %v6508_v6, %v5614_v54  ;;  %v5619_v0 = vor.u32 %v6504_v59, %v5616_v24  ;;  %v6515_v54 = vld [vmem:[#allocation2 + $0x65c] sm:$0xf0]  ;;  %v6511_v6 = vld [vmem:[#allocation2 + $0x644] sm:$0xf]  ;;  %v5646_v24 = vld [vmem:[#allocation2 + $0x648] sm:$0xf] }
 0x1ab   : > { %v5640_v59 = vld [vmem:[#allocation2 + $0x660] sm:$0xf0] }
 0x1ac   : > { %v7246_v2 = vadd.f32 %v3348_v31, %v3180_v27  ;;  %v3013_v52 = vadd.f32 %v3012_v50, %v2844_v49 }
 0x1b1   : > { %v3181_v13 = vpop.f32.mrf.mxu2  ;;  %v2846_v25 = vpop.f32.mrf.mxu0 }
 0x1b2   : > { %v3182_v34 = vadd.f32 %v3181_v13, %v3013_v52  ;;  %v3350_v18 = vpop.f32.mrf.mxu3  ;;  %v2847_v51 = vadd.f32 %v2846_v25, %v7180_v4  ;;  %v3015_v63 = vpop.f32.mrf.mxu1  ;;  %v5638_v4 = vld [vmem:[#allocation2 + $0x640] sm:$0xf]  ;;  %v6516_v13 = vld [vmem:[#allocation2 + $0x664] sm:$0xf0] }
 0x1b3   : > { %v5639_v25 = vor.u32 %v6515_v54, %v5638_v4 }
 0x1b4   : > { %v7249_v27 = vadd.f32 %v3350_v18, %v3182_v34  ;;  %v3016_v31 = vadd.f32 %v3015_v63, %v2847_v51  ;;  %2885 = vmatmul.bf16.gmra.mxu0 %v5607_v48  ;;  %v6512_v48 = vld [vmem:[#allocation2 + $0x64c] sm:$0xf]  ;;  %v5643_v63 = vor.u32 %v6511_v6, %v5640_v59 }
 0x1b5   : > { %3054 = vmatmul.bf16.gmra.mxu1 %v5611_v17  ;;  %v5648_v34 = vld [vmem:[#allocation2 + $0x668] sm:$0xf0] }
 0x1b6   : > { %3223 = vmatmul.bf16.gmra.mxu2 %v5615_v40 }
 0x1b7   : > { %3392 = vmatmul.bf16.gmra.mxu3 %v5619_v0  ;;  %v5647_v0 = vor.u32 %v6516_v13, %v5646_v24  ;;  %v6523_v24 = vld [vmem:[#allocation2 + $0x69c] sm:$0xf0]  ;;  %v6519_v13 = vld [vmem:[#allocation2 + $0x684] sm:$0xf] }
 0x1b9   : > { %v3184_v32 = vpop.f32.mrf.mxu2  ;;  %v2848_v23 = vpop.f32.mrf.mxu0 }
 0x1ba   : > { %v3185_v49 = vadd.f32 %v3184_v32, %v3016_v31  ;;  %v3353_v50 = vpop.f32.mrf.mxu3  ;;  %v2849_v52 = vadd.f32 %v2848_v23, %v7185_v38  ;;  %v3017_v3 = vpop.f32.mrf.mxu1  ;;  %v5651_v32 = vor.u32 %v6512_v48, %v5648_v34  ;;  %v5672_v48 = vld [vmem:[#allocation2 + $0x6a0] sm:$0xf0]  ;;  %v5678_v34 = vld [vmem:[#allocation2 + $0x688] sm:$0xf] }
 0x1bc   : > { %v7252_v5 = vadd.f32 %v3353_v50, %v3185_v49  ;;  %v3018_v36 = vadd.f32 %v3017_v3, %v2849_v52 }
 0x1c1   : > { %v3186_v18 = vpop.f32.mrf.mxu2  ;;  %v2851_v51 = vpop.f32.mrf.mxu0 }
 0x1c2   : > { %v3187_v17 = vadd.f32 %v3186_v18, %v3018_v36  ;;  %v3355_v40 = vpop.f32.mrf.mxu3  ;;  %v2852_v38 = vadd.f32 %v2851_v51, %v7159_v19  ;;  %v3020_v31 = vpop.f32.mrf.mxu1  ;;  %v5670_v19 = vld [vmem:[#allocation2 + $0x680] sm:$0xf]  ;;  %v6524_v18 = vld [vmem:[#allocation2 + $0x6a4] sm:$0xf0] }
 0x1c3   : > { %v5671_v51 = vor.u32 %v6523_v24, %v5670_v19 }
 0x1c4   : > { %v7255_v49 = vadd.f32 %v3355_v40, %v3187_v17  ;;  %v3021_v50 = vadd.f32 %v3020_v31, %v2852_v38  ;;  %2890 = vmatmul.bf16.gmra.mxu0 %v5639_v25  ;;  %v6520_v25 = vld [vmem:[#allocation2 + $0x68c] sm:$0xf]  ;;  %v5675_v31 = vor.u32 %v6519_v13, %v5672_v48 }
 0x1c5   : > { %3059 = vmatmul.bf16.gmra.mxu1 %v5643_v63  ;;  %v5680_v17 = vld [vmem:[#allocation2 + $0x6a8] sm:$0xf0] }
 0x1c6   : > { %3228 = vmatmul.bf16.gmra.mxu2 %v5647_v0 }
 0x1c7   : > { %3397 = vmatmul.bf16.gmra.mxu3 %v5651_v32  ;;  %v5679_v32 = vor.u32 %v6524_v18, %v5678_v34  ;;  %v6531_v34 = vld [vmem:[#allocation2 + $0x6dc] sm:$0xf0]  ;;  %v6527_v18 = vld [vmem:[#allocation2 + $0x6c4] sm:$0xf] }
 0x1c9   : > { %v3189_v23 = vpop.f32.mrf.mxu2  ;;  %v2853_v4 = vpop.f32.mrf.mxu0 }
 0x1ca   : > { %v3190_v52 = vadd.f32 %v3189_v23, %v3021_v50  ;;  %v3358_v3 = vpop.f32.mrf.mxu3  ;;  %v2854_v36 = vadd.f32 %v2853_v4, %v7198_v29  ;;  %v3022_v54 = vpop.f32.mrf.mxu1  ;;  %v5683_v23 = vor.u32 %v6520_v25, %v5680_v17  ;;  %v5704_v25 = vld [vmem:[#allocation2 + $0x6e0] sm:$0xf0]  ;;  %v5710_v17 = vld [vmem:[#allocation2 + $0x6c8] sm:$0xf] }
 0x1cc   : > { %v7258_v6 = vadd.f32 %v3358_v3, %v3190_v52  ;;  %v3023_v59 = vadd.f32 %v3022_v54, %v2854_v36 }
 0x1d1   : > { %v3191_v40 = vpop.f32.mrf.mxu2  ;;  %v2856_v38 = vpop.f32.mrf.mxu0 }
 0x1d2   : > { %v3192_v63 = vadd.f32 %v3191_v40, %v3023_v59  ;;  %v3360_v0 = vpop.f32.mrf.mxu3  ;;  %v2857_v29 = vadd.f32 %v2856_v38, %v7128_v55  ;;  %v3025_v50 = vpop.f32.mrf.mxu1  ;;  %v5702_v55 = vld [vmem:[#allocation2 + $0x6c0] sm:$0xf]  ;;  %v6532_v40 = vld [vmem:[#allocation2 + $0x6e4] sm:$0xf0] }
 0x1d3   : > { %v5703_v38 = vor.u32 %v6531_v34, %v5702_v55 }
 0x1d4   : > { %v7261_v52 = vadd.f32 %v3360_v0, %v3192_v63  ;;  %v3026_v3 = vadd.f32 %v3025_v50, %v2857_v29  ;;  %2895 = vmatmul.bf16.gmra.mxu0 %v5671_v51  ;;  %v6528_v51 = vld [vmem:[#allocation2 + $0x6cc] sm:$0xf]  ;;  %v5707_v50 = vor.u32 %v6527_v18, %v5704_v25 }
 0x1d5   : > { %3064 = vmatmul.bf16.gmra.mxu1 %v5675_v31  ;;  %v5712_v63 = vld [vmem:[#allocation2 + $0x6e8] sm:$0xf0] }
 0x1d6   : > { %3233 = vmatmul.bf16.gmra.mxu2 %v5679_v32 }
 0x1d7   : > { %3402 = vmatmul.bf16.gmra.mxu3 %v5683_v23  ;;  %v5711_v23 = vor.u32 %v6532_v40, %v5710_v17  ;;  %v6539_v17 = vld [vmem:[#allocation2 + $0x71c] sm:$0xf0]  ;;  %v6535_v40 = vld [vmem:[#allocation2 + $0x704] sm:$0xf] }
 0x1d9   : > { %v3194_v4 = vpop.f32.mrf.mxu2  ;;  %v2858_v19 = vpop.f32.mrf.mxu0 }
 0x1da   : > { %v3195_v36 = vadd.f32 %v3194_v4, %v3026_v3  ;;  %v3363_v54 = vpop.f32.mrf.mxu3  ;;  %v2859_v59 = vadd.f32 %v2858_v19, %v7097_v8  ;;  %v3027_v24 = vpop.f32.mrf.mxu1  ;;  %v5715_v4 = vor.u32 %v6528_v51, %v5712_v63  ;;  %v5736_v51 = vld [vmem:[#allocation2 + $0x720] sm:$0xf0]  ;;  %v5742_v63 = vld [vmem:[#allocation2 + $0x708] sm:$0xf] }
 0x1dc   : > { %v7264_v13 = vadd.f32 %v3363_v54, %v3195_v36  ;;  %v3028_v48 = vadd.f32 %v3027_v24, %v2859_v59 }
 0x1e1   : > { %v3196_v0 = vpop.f32.mrf.mxu2  ;;  %v2861_v29 = vpop.f32.mrf.mxu0 }
 0x1e2   : > { %v3197_v31 = vadd.f32 %v3196_v0, %v3028_v48  ;;  %v3365_v32 = vpop.f32.mrf.mxu3  ;;  %v2862_v8 = vadd.f32 %v2861_v29, %v7055_v58  ;;  %v3030_v3 = vpop.f32.mrf.mxu1  ;;  %v5734_v58 = vld [vmem:[#allocation2 + $0x700] sm:$0xf]  ;;  %v6540_v0 = vld [vmem:[#allocation2 + $0x724] sm:$0xf0] }
 0x1e3   : > { %v5735_v29 = vor.u32 %v6539_v17, %v5734_v58 }
 0x1e4   : > { %v7267_v36 = vadd.f32 %v3365_v32, %v3197_v31  ;;  %v3031_v54 = vadd.f32 %v3030_v3, %v2862_v8  ;;  %2900 = vmatmul.bf16.gmra.mxu0 %v5703_v38  ;;  %v6536_v38 = vld [vmem:[#allocation2 + $0x70c] sm:$0xf]  ;;  %v5739_v8 = vor.u32 %v6535_v40, %v5736_v51  ;;  %v5743_v3 = vor.u32 %v6540_v0, %v5742_v63  ;;  %v6285_v51 = vld [vmem:[%s6770_s16 + $0x130] sm:$0xff] }
 0x1e5   : > { %3069 = vmatmul.bf16.gmra.mxu1 %v5707_v50  ;;  %v5744_v31 = vld [vmem:[#allocation2 + $0x728] sm:$0xf0]  ;;  %v6293_v63 = vld [vmem:[%s6770_s16 + $0x170] sm:$0xff] }
 0x1e6   : > { %7867 = vst [vmem:[#allocation34_spill] sm:$0xff] %v7267_v36  ;;  %3238 = vmatmul.bf16.gmra.mxu2 %v5711_v23  ;;  %v6301_v0 = vld [vmem:[%s6770_s16 + $0x1b0] sm:$0xff] }
 0x1e7   : > { %3407 = vmatmul.bf16.gmra.mxu3 %v5715_v4 }
 0x1e9   : > { %v3199_v19 = vpop.f32.mrf.mxu2  ;;  %v2863_v55 = vpop.f32.mrf.mxu0 }
 0x1ea   : > { %v3200_v59 = vadd.f32 %v3199_v19, %v3031_v54  ;;  %v3368_v24 = vpop.f32.mrf.mxu3  ;;  %v2864_v48 = vadd.f32 %v2863_v55, %v7109_v46  ;;  %v3032_v34 = vpop.f32.mrf.mxu1  ;;  %v5747_v19 = vor.u32 %v6536_v38, %v5744_v31  ;;  %v6286_v55 = vld [vmem:[%s6770_s16 + $0x138] sm:$0xff]  ;;  %v7870_v38 = vld [vmem:[#allocation26_spill] sm:$0xff] }
 0x1eb   : > { %3433 = vmatpush.bf16.msrb.mxu0 %v6286_v55  ;;  %v5768_v55 = vld [vmem:[#allocation2 + $0x760] sm:$0xf0] }
 0x1ec   : > { %v7270_v18 = vadd.f32 %v3368_v24, %v3200_v59  ;;  %v3033_v25 = vadd.f32 %v3032_v34, %v2864_v48  ;;  %v6294_v48 = vld [vmem:[%s6770_s16 + $0x178] sm:$0xff] }
 0x1ed   : > { %v6302_v34 = vld [vmem:[%s6770_s16 + $0x1b8] sm:$0xff]  ;;  %3602 = vmatpush.bf16.msrb.mxu1 %v6294_v48  ;;  %v5774_v48 = vld [vmem:[#allocation2 + $0x748] sm:$0xf] }
 0x1ee   : > { %7868 = vst [vmem:[#allocation35_spill] sm:$0xff] %v7270_v18  ;;  %3771 = vmatpush.bf16.msrb.mxu2 %v6302_v34  ;;  %v6548_v34 = vld [vmem:[#allocation2 + $0x764] sm:$0xf0]  ;;  %v6299_v18 = vld [vmem:[%s6770_s16 + $0x1a0] sm:$0xff] }
 0x1ef   : > { %3434 = vmatpush.bf16.msrb.mxu0 %v6285_v51 }
 0x1f1   : > { %v3201_v32 = vpop.f32.mrf.mxu2  ;;  %v2866_v46 = vpop.f32.mrf.mxu0  ;;  %3603 = vmatpush.bf16.msrb.mxu1 %v6293_v63 }
 0x1f2   : > { %v3202_v50 = vadd.f32 %v3201_v32, %v3033_v25  ;;  %v3370_v23 = vpop.f32.mrf.mxu3  ;;  %v2867_v4 = vadd.f32 %v2866_v46, %v7067_v20  ;;  %v3035_v54 = vpop.f32.mrf.mxu1  ;;  %v6310_v25 = vld [vmem:[%s6770_s16 + $0x1f8] sm:$0xff]  ;;  %3772 = vmatpush.bf16.msrb.mxu2 %v6301_v0 }
 0x1f3   : > { %3940 = vmatpush.bf16.msrb.mxu3 %v6310_v25  ;;  %v6544_v25 = vld [vmem:[#allocation2 + $0x74c] sm:$0xf] }
 0x1f4   : > { %v7273_v59 = vadd.f32 %v3370_v23, %v3202_v50  ;;  %v3036_v24 = vadd.f32 %v3035_v54, %v2867_v4  ;;  %2905 = vmatmul.bf16.gmra.mxu0 %v5735_v29  ;;  %v6309_v29 = vld [vmem:[%s6770_s16 + $0x1f0] sm:$0xff]  ;;  %v5766_v23 = vld [vmem:[#allocation2 + $0x740] sm:$0xf]  ;;  %v6300_v4 = vld [vmem:[%s6770_s16 + $0x1a8] sm:$0xff] }
 0x1f5   : > { %3074 = vmatmul.bf16.gmra.mxu1 %v5739_v8  ;;  %v6284_v8 = vld [vmem:[%s6770_s16 + $0x128] sm:$0xff]  ;;  %v6547_v54 = vld [vmem:[#allocation2 + $0x75c] sm:$0xf0] }
 0x1f6   : > { %7869 = vst [vmem:[#allocation36_spill] sm:$0xff] %v7273_v59  ;;  %3243 = vmatmul.bf16.gmra.mxu2 %v5743_v3  ;;  %v6292_v3 = vld [vmem:[%s6770_s16 + $0x168] sm:$0xff]  ;;  %3435 = vmatpush.bf16.msrb.mxu0 %v6284_v8 }
 0x1f7   : > { %3412 = vmatmul.bf16.gmra.mxu3 %v5747_v19  ;;  %v6543_v19 = vld [vmem:[#allocation2 + $0x744] sm:$0xf]  ;;  %3604 = vmatpush.bf16.msrb.mxu1 %v6292_v3 }
 0x1f8   : > { %3941 = vmatpush.bf16.msrb.mxu3 %v6309_v29  ;;  %3773 = vmatpush.bf16.msrb.mxu2 %v6300_v4  ;;  %v5771_v0 = vor.u32 %v6543_v19, %v5768_v55  ;;  %v7872_v29 = vld [vmem:[#allocation15_spill] sm:$0xff]  ;;  %v6282_v4 = vld [vmem:[%s6770_s16 + $0x118] sm:$0xff] }
 0x1f9   : > { %v3204_v58 = vpop.f32.mrf.mxu2  ;;  %v2868_v40 = vpop.f32.mrf.mxu0  ;;  %v6298_v19 = vld [vmem:[%s6770_s16 + $0x198] sm:$0xff] }
 0x1fa   : > { %v3205_v20 = vadd.f32 %v3204_v58, %v3036_v24  ;;  %v3373_v17 = vpop.f32.mrf.mxu3  ;;  %v2869_v31 = vadd.f32 %v2868_v40, %v7870_v38  ;;  %v3037_v32 = vpop.f32.mrf.mxu1  ;;  %v6308_v24 = vld [vmem:[%s6770_s16 + $0x1e8] sm:$0xff]  ;;  %v5775_v38 = vor.u32 %v6548_v34, %v5774_v48 }
 0x1fb   : > { %v5776_v58 = vld [vmem:[#allocation2 + $0x768] sm:$0xf0] }
 0x1fc   : > { %v7284_v50 = vadd.f32 %v3373_v17, %v3205_v20  ;;  %v3038_v46 = vadd.f32 %v3037_v32, %v2869_v31  ;;  %v5767_v17 = vor.u32 %v6547_v54, %v5766_v23  ;;  %3942 = vmatpush.bf16.msrb.mxu3 %v6308_v24  ;;  %v6283_v31 = vld [vmem:[%s6770_s16 + $0x120] sm:$0xff]  ;;  %v5779_v59 = vor.u32 %v6544_v25, %v5776_v58  ;;  %v6290_v54 = vld [vmem:[%s6770_s16 + $0x158] sm:$0xff]  ;;  %v6281_v25 = vld [vmem:[%s6770_s16 + $0x110] sm:$0xff] }
 0x1fd   : > { %v6291_v32 = vld [vmem:[%s6770_s16 + $0x160] sm:$0xff]  ;;  %3436 = vmatpush.bf16.msrb.mxu0 %v6283_v31  ;;  %3774 = vmatpush.bf16.msrb.mxu2 %v6299_v18  ;;  %v6306_v24 = vld [vmem:[%s6770_s16 + $0x1d8] sm:$0xff]  ;;  %v6289_v58 = vld [vmem:[%s6770_s16 + $0x150] sm:$0xff] }
 0x1fe   : > { %7871 = vst [vmem:[#allocation26_spill] sm:$0xff] %v7284_v50  ;;  %3605 = vmatpush.bf16.msrb.mxu1 %v6291_v32  ;;  %v6297_v18 = vld [vmem:[%s6770_s16 + $0x190] sm:$0xff]  ;;  %v6288_v31 = vld [vmem:[%s6770_s16 + $0x148] sm:$0xff]  ;;  %v6555_v32 = vld [vmem:[#allocation2 + $0x79c] sm:$0xf0] }
 0x201   : > { %v3206_v20 = vpop.f32.mrf.mxu2  ;;  %v2871_v63 = vpop.f32.mrf.mxu0  ;;  %3437 = vmatpush.bf16.msrb.mxu0 %v6282_v4  ;;  %3775 = vmatpush.bf16.msrb.mxu2 %v6298_v19  ;;  %v6296_v4 = vld [vmem:[%s6770_s16 + $0x188] sm:$0xff] }
 0x202   : > { %v3207_v40 = vadd.f32 %v3206_v20, %v3038_v46  ;;  %v3375_v51 = vpop.f32.mrf.mxu3  ;;  %v2872_v50 = vadd.f32 %v2871_v63, %v7872_v29  ;;  %v3040_v8 = vpop.f32.mrf.mxu1  ;;  %v6307_v46 = vld [vmem:[%s6770_s16 + $0x1e0] sm:$0xff]  ;;  %3606 = vmatpush.bf16.msrb.mxu1 %v6290_v54  ;;  %v7874_v20 = vld [vmem:[#allocation10_spill] sm:$0xff] }
 0x203   : > { %3943 = vmatpush.bf16.msrb.mxu3 %v6307_v46  ;;  %v6551_v29 = vld [vmem:[#allocation2 + $0x784] sm:$0xf]  ;;  %v5806_v46 = vld [vmem:[#allocation2 + $0x788] sm:$0xf]  ;;  %v6552_v54 = vld [vmem:[#allocation2 + $0x78c] sm:$0xf] }
 0x204   : > { %v7294_v23 = vadd.f32 %v3375_v51, %v3207_v40  ;;  %v3041_v3 = vadd.f32 %v3040_v8, %v2872_v50  ;;  %2910 = vmatmul.bf16.gmra.mxu0 %v5767_v17  ;;  %v6305_v51 = vld [vmem:[%s6770_s16 + $0x1d0] sm:$0xff]  ;;  %v5800_v8 = vld [vmem:[#allocation2 + $0x7a0] sm:$0xf0]  ;;  %v5808_v19 = vld [vmem:[#allocation2 + $0x7a8] sm:$0xf0] }
 0x205   : > { %3079 = vmatmul.bf16.gmra.mxu1 %v5771_v0  ;;  %3438 = vmatpush.bf16.msrb.mxu0 %v6281_v25  ;;  %v5798_v0 = vld [vmem:[#allocation2 + $0x780] sm:$0xf]  ;;  %v5811_v36 = vor.u32 %v6552_v54, %v5808_v19 }
 0x206   : > { %7873 = vst [vmem:[#allocation15_spill] sm:$0xff] %v7294_v23  ;;  %3248 = vmatmul.bf16.gmra.mxu2 %v5775_v38  ;;  %3607 = vmatpush.bf16.msrb.mxu1 %v6289_v58  ;;  %v6280_v38 = vld [vmem:[%s6770_s16 + $0x108] sm:$0xff]  ;;  %v5803_v58 = vor.u32 %v6551_v29, %v5800_v8 }
 0x207   : > { %3417 = vmatmul.bf16.gmra.mxu3 %v5779_v59  ;;  %3776 = vmatpush.bf16.msrb.mxu2 %v6297_v18  ;;  %v7876_v18 = vld [vmem:[#allocation7_spill] sm:$0xff] }
 0x208   : > { %3944 = vmatpush.bf16.msrb.mxu3 %v6306_v24  ;;  %v6304_v24 = vld [vmem:[%s6770_s16 + $0x1c8] sm:$0xff] }
 0x209   : > { %v3209_v55 = vpop.f32.mrf.mxu2  ;;  %v2873_v34 = vpop.f32.mrf.mxu0  ;;  %3439 = vmatpush.bf16.msrb.mxu0 %v6280_v38 }
 0x20a   : > { %v3210_v48 = vadd.f32 %v3209_v55, %v3041_v3  ;;  %v3378_v50 = vpop.f32.mrf.mxu3  ;;  %v2874_v17 = vadd.f32 %v2873_v34, %v7874_v20  ;;  %v3042_v59 = vpop.f32.mrf.mxu1  ;;  %v6556_v3 = vld [vmem:[#allocation2 + $0x7a4] sm:$0xf0]  ;;  %3608 = vmatpush.bf16.msrb.mxu1 %v6288_v31 }
 0x20b   : > { %v5807_v20 = vor.u32 %v6556_v3, %v5806_v46  ;;  %3777 = vmatpush.bf16.msrb.mxu2 %v6296_v4  ;;  %v7877_v46 = vld [vmem:[#allocation11_spill] sm:$0xff] }
 0x20c   : > { %v7305_v40 = vadd.f32 %v3378_v50, %v3210_v48  ;;  %v3043_v63 = vadd.f32 %v3042_v59, %v2874_v17  ;;  %3945 = vmatpush.bf16.msrb.mxu3 %v6305_v51  ;;  %v5799_v48 = vor.u32 %v6555_v32, %v5798_v0  ;;  %v6279_v17 = vld [vmem:[%s6770_s16 + $0x100] sm:$0xff] }
 0x20d   : > { %v6287_v59 = vld [vmem:[%s6770_s16 + $0x140] sm:$0xff]  ;;  %3440 = vmatpush.bf16.msrb.mxu0 %v6279_v17 }
 0x20e   : > { %7875 = vst [vmem:[#allocation10_spill] sm:$0xff] %v7305_v40  ;;  %v6295_v51 = vld [vmem:[%s6770_s16 + $0x180] sm:$0xff]  ;;  %3609 = vmatpush.bf16.msrb.mxu1 %v6287_v59 }
 0x20f   : > { %v6303_v0 = vld [vmem:[%s6770_s16 + $0x1c0] sm:$0xff]  ;;  %3778 = vmatpush.bf16.msrb.mxu2 %v6295_v51 }
 0x210   : > { %3946 = vmatpush.bf16.msrb.mxu3 %v6304_v24  ;;  %v5830_v24 = vld [vmem:[#allocation2 + $0x7c0] sm:$0xf] }
 0x211   : > { %v3211_v55 = vpop.f32.mrf.mxu2  ;;  %v2876_v25 = vpop.f32.mrf.mxu0 }
 0x212   : > { %v3212_v50 = vadd.f32 %v3211_v55, %v3043_v63  ;;  %v3380_v34 = vpop.f32.mrf.mxu3  ;;  %v2877_v40 = vadd.f32 %v2876_v25, %v7876_v18  ;;  %v3045_v23 = vpop.f32.mrf.mxu1  ;;  %v6563_v55 = vld [vmem:[#allocation2 + $0x7dc] sm:$0xf0] }
 0x214   : > { %v7316_v38 = vadd.f32 %v3380_v34, %v3212_v50  ;;  %v3046_v31 = vadd.f32 %v3045_v23, %v2877_v40  ;;  %2915 = vmatmul.bf16.gmra.mxu0 %v5799_v48  ;;  %3947 = vmatpush.bf16.msrb.mxu3 %v6303_v0  ;;  %v6559_v23 = vld [vmem:[#allocation2 + $0x7c4] sm:$0xf]  ;;  %v5838_v48 = vld [vmem:[#allocation2 + $0x7c8] sm:$0xf]  ;;  %v6560_v34 = vld [vmem:[#allocation2 + $0x7cc] sm:$0xf] }
 0x215   : > { %3084 = vmatmul.bf16.gmra.mxu1 %v5803_v58  ;;  %v5832_v40 = vld [vmem:[#allocation2 + $0x7e0] sm:$0xf0]  ;;  %v6564_v50 = vld [vmem:[#allocation2 + $0x7e4] sm:$0xf0]  ;;  %v5831_v58 = vor.u32 %v6563_v55, %v5830_v24  ;;  %v7878_v0 = vld [vmem:[#allocation8_spill] sm:$0xff] }
 0x216   : > { %3253 = vmatmul.bf16.gmra.mxu2 %v5807_v20  ;;  %v5835_v18 = vor.u32 %v6559_v23, %v5832_v40  ;;  %v5839_v51 = vor.u32 %v6564_v50, %v5838_v48  ;;  %v4854_v48 = vld [vmem:[#allocation2 + $0x10] sm:$0xf] }
 0x217   : > { %3422 = vmatmul.bf16.gmra.mxu3 %v5811_v36  ;;  %v5840_v36 = vld [vmem:[#allocation2 + $0x7e8] sm:$0xf0]  ;;  %v6317_v50 = vld [vmem:[#allocation2 + $0x2c] sm:$0xf0] }
 0x219   : > { %v3214_v63 = vpop.f32.mrf.mxu2  ;;  %v2878_v8 = vpop.f32.mrf.mxu0 }
 0x21a   : > { %v3215_v32 = vadd.f32 %v3214_v63, %v3046_v31  ;;  %v3383_v29 = vpop.f32.mrf.mxu3  ;;  %v2879_v3 = vadd.f32 %v2878_v8, %v7877_v46  ;;  %v3047_v4 = vpop.f32.mrf.mxu1 }
 0x21c   : > { %v7320_v54 = vadd.f32 %v3383_v29, %v3215_v32  ;;  %v3048_v19 = vadd.f32 %v3047_v4, %v2879_v3  ;;  %v5843_v32 = vor.u32 %v6560_v34, %v5840_v36  ;;  %v6313_v34 = vld [vmem:[#allocation2 + $0x14] sm:$0xf] }
 0x21d   : > { %v4856_v36 = vld [vmem:[#allocation2 + $0x30] sm:$0xf0] }
 0x221   : > { %v3216_v25 = vpop.f32.mrf.mxu2  ;;  %v2881_v59 = vpop.f32.mrf.mxu0 }
 0x222   : > { %v3217_v20 = vadd.f32 %v3216_v25, %v3048_v19  ;;  %v3385_v17 = vpop.f32.mrf.mxu3  ;;  %v2882_v31 = vadd.f32 %v2881_v59, %v7878_v0  ;;  %v3050_v63 = vpop.f32.mrf.mxu1  ;;  %v7880_v19 = vld [vmem:[#allocation9_spill] sm:$0xff]  ;;  %v6314_v59 = vld [vmem:[#allocation2 + $0x1c] sm:$0xf]  ;;  %v4855_v0 = vor.u32 %v6317_v50, %v4854_v48 }
 0x224   : > { %v7323_v29 = vadd.f32 %v3385_v17, %v3217_v20  ;;  %v3051_v8 = vadd.f32 %v3050_v63, %v2882_v31  ;;  %2920 = vmatmul.bf16.gmra.mxu0 %v5831_v58  ;;  %v4862_v20 = vld [vmem:[#allocation2 + $0x18] sm:$0xf]  ;;  %v7328_v58 = vpop.permute.xlu1 %775 }
 0x225   : > { %3089 = vmatmul.bf16.gmra.mxu1 %v5835_v18  ;;  %v6318_v17 = vld [vmem:[#allocation2 + $0x34] sm:$0xf0]  ;;  %v4864_v18 = vld [vmem:[#allocation2 + $0x38] sm:$0xf0] }
 0x226   : > { %7879 = vst [vmem:[#allocation7_spill] sm:$0xff] %v7323_v29  ;;  %3258 = vmatmul.bf16.gmra.mxu2 %v5839_v51 }
 0x227   : > { %3427 = vmatmul.bf16.gmra.mxu3 %v5843_v32 }
 0x229   : > { %v3219_v46 = vpop.f32.mrf.mxu2  ;;  %v2883_v24 = vpop.f32.mrf.mxu0 }
 0x22a   : > { %v3220_v3 = vadd.f32 %v3219_v46, %v3051_v8  ;;  %v3388_v4 = vpop.f32.mrf.mxu3  ;;  %v2884_v55 = vadd.f32 %v2883_v24, %v7880_v19  ;;  %v3052_v25 = vpop.f32.mrf.mxu1  ;;  %v4859_v8 = vor.u32 %v6313_v34, %v4856_v36  ;;  %v4863_v46 = vor.u32 %v6318_v17, %v4862_v20  ;;  %v6325_v20 = vld [vmem:[#allocation2 + $0x6c] sm:$0xf0]  ;;  %v6321_v17 = vld [vmem:[#allocation2 + $0x54] sm:$0xf] }
 0x22b   : > { %v4867_v24 = vor.u32 %v6314_v59, %v4864_v18  ;;  %v4888_v59 = vld [vmem:[#allocation2 + $0x70] sm:$0xf0]  ;;  %v4894_v18 = vld [vmem:[#allocation2 + $0x58] sm:$0xf] }
 0x22c   : > { %v7326_v23 = vadd.f32 %v3388_v4, %v3220_v3  ;;  %v3053_v40 = vadd.f32 %v3052_v25, %v2884_v55  ;;  %v1021_v25 = vpop.permute.xlu1 %1020 }
 0x22e   : > { %7881 = vst [vmem:[#allocation11_spill] sm:$0xff] %v7326_v23 }
 0x231   : > { %v3221_v51 = vpop.f32.mrf.mxu2  ;;  %v2886_v32 = vpop.f32.mrf.mxu0 }
 0x232   : > { %v3222_v31 = vadd.f32 %v3221_v51, %v3053_v40  ;;  %v3390_v63 = vpop.f32.mrf.mxu3  ;;  %v2887_v3 = vadd.f32 %v2886_v32, %v7194_v42  ;;  %v3055_v4 = vpop.f32.mrf.mxu1  ;;  %v4886_v42 = vld [vmem:[#allocation2 + $0x50] sm:$0xf] }
 0x234   : > { %v7331_v19 = vadd.f32 %v3390_v63, %v3222_v31  ;;  %v3056_v55 = vadd.f32 %v3055_v4, %v2887_v3  ;;  %3441 = vmatmul.bf16.vlgmr.msrb.gmra.mxu0 %v4855_v0  ;;  %v6326_v31 = vld [vmem:[#allocation2 + $0x74] sm:$0xf0]  ;;  %v6322_v0 = vld [vmem:[#allocation2 + $0x5c] sm:$0xf]  ;;  %v4891_v4 = vor.u32 %v6321_v17, %v4888_v59 }
 0x235   : > { %3610 = vmatmul.bf16.vlgmr.msrb.gmra.mxu1 %v4859_v8  ;;  %v4896_v63 = vld [vmem:[#allocation2 + $0x78] sm:$0xf0]  ;;  %v4887_v8 = vor.u32 %v6325_v20, %v4886_v42 }
 0x236   : > { %3779 = vmatmul.bf16.vlgmr.msrb.gmra.mxu2 %v4863_v46 }
 0x237   : > { %3948 = vmatmul.bf16.vlgmr.msrb.gmra.mxu3 %v4867_v24  ;;  %v4895_v24 = vor.u32 %v6326_v31, %v4894_v18  ;;  %v6333_v18 = vld [vmem:[#allocation2 + $0xac] sm:$0xf0]  ;;  %v6329_v31 = vld [vmem:[#allocation2 + $0x94] sm:$0xf] }
 0x239   : > { %v3224_v23 = vpop.f32.mrf.mxu2  ;;  %v2888_v40 = vpop.f32.mrf.mxu0 }
 0x23a   : > { %v3225_v29 = vadd.f32 %v3224_v23, %v3056_v55  ;;  %v3393_v48 = vpop.f32.mrf.mxu3  ;;  %v2889_v50 = vadd.f32 %v2888_v40, %v1021_v25  ;;  %v3057_v51 = vpop.f32.mrf.mxu1  ;;  %v4899_v25 = vor.u32 %v6322_v0, %v4896_v63  ;;  %v4920_v0 = vld [vmem:[#allocation2 + $0xb0] sm:$0xf0]  ;;  %v4926_v63 = vld [vmem:[#allocation2 + $0x98] sm:$0xf] }
 0x23c   : > { %v7333_v34 = vadd.f32 %v3393_v48, %v3225_v29  ;;  %v3058_v36 = vadd.f32 %v3057_v51, %v2889_v50 }
 0x23e   : > { %7882 = vst [vmem:[#allocation8_spill] sm:$0xff] %v7333_v34 }
 0x241   : > { %v3226_v32 = vpop.f32.mrf.mxu2  ;;  %v2891_v23 = vpop.f32.mrf.mxu0 }
 0x242   : > { %v3227_v46 = vadd.f32 %v3226_v32, %v3058_v36  ;;  %v3395_v3 = vpop.f32.mrf.mxu3  ;;  %v2892_v55 = vadd.f32 %v2891_v23, %v7202_v33  ;;  %v3060_v29 = vpop.f32.mrf.mxu1  ;;  %v4918_v33 = vld [vmem:[#allocation2 + $0x90] sm:$0xf]  ;;  %v6334_v32 = vld [vmem:[#allocation2 + $0xb4] sm:$0xf0] }
 0x243   : > { %v4919_v23 = vor.u32 %v6333_v18, %v4918_v33 }
 0x244   : > { %v7336_v48 = vadd.f32 %v3395_v3, %v3227_v46  ;;  %v3061_v40 = vadd.f32 %v3060_v29, %v2892_v55  ;;  %3446 = vmatmul.bf16.gmra.mxu0 %v4887_v8  ;;  %v6330_v8 = vld [vmem:[#allocation2 + $0x9c] sm:$0xf]  ;;  %v4923_v29 = vor.u32 %v6329_v31, %v4920_v0 }
 0x245   : > { %3615 = vmatmul.bf16.gmra.mxu1 %v4891_v4  ;;  %v4928_v46 = vld [vmem:[#allocation2 + $0xb8] sm:$0xf0] }
 0x246   : > { %7883 = vst [vmem:[#allocation9_spill] sm:$0xff] %v7336_v48  ;;  %3784 = vmatmul.bf16.gmra.mxu2 %v4895_v24 }
 0x247   : > { %3953 = vmatmul.bf16.gmra.mxu3 %v4899_v25  ;;  %v4927_v25 = vor.u32 %v6334_v32, %v4926_v63  ;;  %v4950_v63 = vld [vmem:[#allocation2 + $0xd0] sm:$0xf] }
 0x248   : > { %v6341_v32 = vld [vmem:[#allocation2 + $0xec] sm:$0xf0] }
 0x249   : > { %v3229_v50 = vpop.f32.mrf.mxu2  ;;  %v2893_v42 = vpop.f32.mrf.mxu0 }
 0x24a   : > { %v3230_v51 = vadd.f32 %v3229_v50, %v3061_v40  ;;  %v3398_v34 = vpop.f32.mrf.mxu3  ;;  %v2894_v36 = vadd.f32 %v2893_v42, %v7168_v16  ;;  %v3062_v20 = vpop.f32.mrf.mxu1  ;;  %v7885_v16 = vld [vmem:[#allocation28_spill] sm:$0xff]  ;;  %v4931_v50 = vor.u32 %v6330_v8, %v4928_v46  ;;  %v6337_v8 = vld [vmem:[#allocation2 + $0xd4] sm:$0xf] }
 0x24b   : > { %v4952_v46 = vld [vmem:[#allocation2 + $0xf0] sm:$0xf0] }
 0x24c   : > { %v7339_v17 = vadd.f32 %v3398_v34, %v3230_v51  ;;  %v3063_v59 = vadd.f32 %v3062_v20, %v2894_v36 }
 0x24e   : > { %7884 = vst [vmem:[#allocation37_spill] sm:$0xff] %v7339_v17 }
 0x251   : > { %v3231_v3 = vpop.f32.mrf.mxu2  ;;  %v2896_v55 = vpop.f32.mrf.mxu0 }
 0x252   : > { %v3232_v4 = vadd.f32 %v3231_v3, %v3063_v59  ;;  %v3400_v24 = vpop.f32.mrf.mxu3  ;;  %v2897_v40 = vadd.f32 %v2896_v55, %v7885_v16  ;;  %v3065_v34 = vpop.f32.mrf.mxu1  ;;  %v4958_v3 = vld [vmem:[#allocation2 + $0xd8] sm:$0xf] }
 0x254   : > { %v7342_v51 = vadd.f32 %v3400_v24, %v3232_v4  ;;  %v3066_v42 = vadd.f32 %v3065_v34, %v2897_v40  ;;  %3451 = vmatmul.bf16.gmra.mxu0 %v4919_v23  ;;  %v6342_v4 = vld [vmem:[#allocation2 + $0xf4] sm:$0xf0]  ;;  %v6338_v23 = vld [vmem:[#allocation2 + $0xdc] sm:$0xf]  ;;  %v4955_v34 = vor.u32 %v6337_v8, %v4952_v46 }
 0x255   : > { %3620 = vmatmul.bf16.gmra.mxu1 %v4923_v29  ;;  %v4960_v24 = vld [vmem:[#allocation2 + $0xf8] sm:$0xf0]  ;;  %v4951_v29 = vor.u32 %v6341_v32, %v4950_v63 }
 0x256   : > { %7886 = vst [vmem:[#allocation28_spill] sm:$0xff] %v7342_v51  ;;  %3789 = vmatmul.bf16.gmra.mxu2 %v4927_v25 }
 0x257   : > { %3958 = vmatmul.bf16.gmra.mxu3 %v4931_v50  ;;  %v4959_v50 = vor.u32 %v6342_v4, %v4958_v3  ;;  %v4982_v3 = vld [vmem:[#allocation2 + $0x110] sm:$0xf] }
 0x258   : > { %v6349_v4 = vld [vmem:[#allocation2 + $0x12c] sm:$0xf0] }
 0x259   : > { %v3234_v36 = vpop.f32.mrf.mxu2  ;;  %v2898_v33 = vpop.f32.mrf.mxu0 }
 0x25a   : > { %v3235_v20 = vadd.f32 %v3234_v36, %v3066_v42  ;;  %v3403_v17 = vpop.f32.mrf.mxu3  ;;  %v2899_v59 = vadd.f32 %v2898_v33, %v7151_v11  ;;  %v3067_v18 = vpop.f32.mrf.mxu1  ;;  %v7888_v11 = vld [vmem:[#allocation29_spill] sm:$0xff]  ;;  %v4963_v36 = vor.u32 %v6338_v23, %v4960_v24  ;;  %v6345_v23 = vld [vmem:[#allocation2 + $0x114] sm:$0xf] }
 0x25b   : > { %v4984_v24 = vld [vmem:[#allocation2 + $0x130] sm:$0xf0] }
 0x25c   : > { %v7345_v31 = vadd.f32 %v3403_v17, %v3235_v20  ;;  %v3068_v0 = vadd.f32 %v3067_v18, %v2899_v59 }
 0x25e   : > { %7887 = vst [vmem:[#allocation38_spill] sm:$0xff] %v7345_v31 }
 0x261   : > { %v3236_v55 = vpop.f32.mrf.mxu2  ;;  %v2901_v40 = vpop.f32.mrf.mxu0 }
 0x262   : > { %v3237_v25 = vadd.f32 %v3236_v55, %v3068_v0  ;;  %v3405_v16 = vpop.f32.mrf.mxu3  ;;  %v2902_v42 = vadd.f32 %v2901_v40, %v7888_v11  ;;  %v3070_v17 = vpop.f32.mrf.mxu1  ;;  %v7890_v0 = vld [vmem:[#allocation30_spill] sm:$0xff]  ;;  %v4992_v40 = vld [vmem:[#allocation2 + $0x138] sm:$0xf0] }
 0x264   : > { %v7348_v20 = vadd.f32 %v3405_v16, %v3237_v25  ;;  %v3071_v33 = vadd.f32 %v3070_v17, %v2902_v42  ;;  %3456 = vmatmul.bf16.gmra.mxu0 %v4951_v29  ;;  %v4990_v25 = vld [vmem:[#allocation2 + $0x118] sm:$0xf]  ;;  %v6346_v29 = vld [vmem:[#allocation2 + $0x11c] sm:$0xf] }
 0x265   : > { %3625 = vmatmul.bf16.gmra.mxu1 %v4955_v34  ;;  %v6350_v16 = vld [vmem:[#allocation2 + $0x134] sm:$0xf0] }
 0x266   : > { %7889 = vst [vmem:[#allocation29_spill] sm:$0xff] %v7348_v20  ;;  %3794 = vmatmul.bf16.gmra.mxu2 %v4959_v50  ;;  %v4983_v50 = vor.u32 %v6349_v4, %v4982_v3 }
 0x267   : > { %3963 = vmatmul.bf16.gmra.mxu3 %v4963_v36  ;;  %v4987_v36 = vor.u32 %v6345_v23, %v4984_v24 }
 0x269   : > { %v3239_v59 = vpop.f32.mrf.mxu2  ;;  %v2903_v63 = vpop.f32.mrf.mxu0 }
 0x26a   : > { %v3240_v18 = vadd.f32 %v3239_v59, %v3071_v33  ;;  %v3408_v31 = vpop.f32.mrf.mxu3  ;;  %v2904_v32 = vadd.f32 %v2903_v63, %v7890_v0  ;;  %v3072_v55 = vpop.f32.mrf.mxu1  ;;  %v4991_v33 = vor.u32 %v6350_v16, %v4990_v25  ;;  %v7892_v59 = vld [vmem:[#allocation27_spill] sm:$0xff] }
 0x26b   : > { %v5014_v25 = vld [vmem:[#allocation2 + $0x150] sm:$0xf] }
 0x26c   : > { %v7351_v8 = vadd.f32 %v3408_v31, %v3240_v18  ;;  %v3073_v46 = vadd.f32 %v3072_v55, %v2904_v32  ;;  %v4995_v18 = vor.u32 %v6346_v29, %v4992_v40  ;;  %v6357_v16 = vld [vmem:[#allocation2 + $0x16c] sm:$0xf0]  ;;  %v6353_v29 = vld [vmem:[#allocation2 + $0x154] sm:$0xf] }
 0x26d   : > { %v5016_v40 = vld [vmem:[#allocation2 + $0x170] sm:$0xf0] }
 0x26e   : > { %7891 = vst [vmem:[#allocation30_spill] sm:$0xff] %v7351_v8 }
 0x271   : > { %v3241_v34 = vpop.f32.mrf.mxu2  ;;  %v2906_v17 = vpop.f32.mrf.mxu0 }
 0x272   : > { %v3242_v11 = vadd.f32 %v3241_v34, %v3073_v46  ;;  %v3410_v42 = vpop.f32.mrf.mxu3  ;;  %v2907_v63 = vadd.f32 %v2906_v17, %v7892_v59  ;;  %v3075_v31 = vpop.f32.mrf.mxu1  ;;  %v7894_v46 = vld [vmem:[#allocation18_spill] sm:$0xff]  ;;  %v5024_v17 = vld [vmem:[#allocation2 + $0x178] sm:$0xf0] }
 0x274   : > { %v7354_v0 = vadd.f32 %v3410_v42, %v3242_v11  ;;  %v3076_v32 = vadd.f32 %v3075_v31, %v2907_v63  ;;  %3461 = vmatmul.bf16.gmra.mxu0 %v4983_v50  ;;  %v5022_v11 = vld [vmem:[#allocation2 + $0x158] sm:$0xf]  ;;  %v6354_v50 = vld [vmem:[#allocation2 + $0x15c] sm:$0xf] }
 0x275   : > { %3630 = vmatmul.bf16.gmra.mxu1 %v4987_v36  ;;  %v6358_v42 = vld [vmem:[#allocation2 + $0x174] sm:$0xf0] }
 0x276   : > { %7893 = vst [vmem:[#allocation27_spill] sm:$0xff] %v7354_v0  ;;  %3799 = vmatmul.bf16.gmra.mxu2 %v4991_v33  ;;  %v5015_v33 = vor.u32 %v6357_v16, %v5014_v25 }
 0x277   : > { %3968 = vmatmul.bf16.gmra.mxu3 %v4995_v18  ;;  %v5019_v18 = vor.u32 %v6353_v29, %v5016_v40 }
 0x279   : > { %v3244_v55 = vpop.f32.mrf.mxu2  ;;  %v2908_v3 = vpop.f32.mrf.mxu0 }
 0x27a   : > { %v3245_v8 = vadd.f32 %v3244_v55, %v3076_v32  ;;  %v3413_v20 = vpop.f32.mrf.mxu3  ;;  %v2909_v4 = vadd.f32 %v2908_v3, %v7894_v46  ;;  %v3077_v34 = vpop.f32.mrf.mxu1  ;;  %v5023_v32 = vor.u32 %v6358_v42, %v5022_v11  ;;  %v7896_v55 = vld [vmem:[#allocation12_spill] sm:$0xff]  ;;  %v5046_v11 = vld [vmem:[#allocation2 + $0x190] sm:$0xf] }
 0x27b   : > { %v6365_v42 = vld [vmem:[#allocation2 + $0x1ac] sm:$0xf0] }
 0x27c   : > { %v7357_v23 = vadd.f32 %v3413_v20, %v3245_v8  ;;  %v3078_v24 = vadd.f32 %v3077_v34, %v2909_v4  ;;  %v5027_v8 = vor.u32 %v6354_v50, %v5024_v17  ;;  %v6361_v50 = vld [vmem:[#allocation2 + $0x194] sm:$0xf] }
 0x27d   : > { %v5048_v17 = vld [vmem:[#allocation2 + $0x1b0] sm:$0xf0] }
 0x27e   : > { %7895 = vst [vmem:[#allocation18_spill] sm:$0xff] %v7357_v23 }
 0x281   : > { %v3246_v36 = vpop.f32.mrf.mxu2  ;;  %v2911_v31 = vpop.f32.mrf.mxu0 }
 0x282   : > { %v3247_v59 = vadd.f32 %v3246_v36, %v3078_v24  ;;  %v3415_v63 = vpop.f32.mrf.mxu3  ;;  %v2912_v3 = vadd.f32 %v2911_v31, %v7896_v55  ;;  %v3080_v20 = vpop.f32.mrf.mxu1  ;;  %v7898_v24 = vld [vmem:[#allocation23_spill] sm:$0xff]  ;;  %v5056_v31 = vld [vmem:[#allocation2 + $0x1b8] sm:$0xf0] }
 0x284   : > { %v7360_v46 = vadd.f32 %v3415_v63, %v3247_v59  ;;  %v3081_v4 = vadd.f32 %v3080_v20, %v2912_v3  ;;  %3466 = vmatmul.bf16.gmra.mxu0 %v5015_v33  ;;  %v5054_v59 = vld [vmem:[#allocation2 + $0x198] sm:$0xf]  ;;  %v6362_v33 = vld [vmem:[#allocation2 + $0x19c] sm:$0xf] }
 0x285   : > { %3635 = vmatmul.bf16.gmra.mxu1 %v5019_v18  ;;  %v6366_v63 = vld [vmem:[#allocation2 + $0x1b4] sm:$0xf0] }
 0x286   : > { %7897 = vst [vmem:[#allocation12_spill] sm:$0xff] %v7360_v46  ;;  %3804 = vmatmul.bf16.gmra.mxu2 %v5023_v32  ;;  %v5047_v32 = vor.u32 %v6365_v42, %v5046_v11 }
 0x287   : > { %3973 = vmatmul.bf16.gmra.mxu3 %v5027_v8  ;;  %v5051_v8 = vor.u32 %v6361_v50, %v5048_v17 }
 0x289   : > { %v3249_v34 = vpop.f32.mrf.mxu2  ;;  %v2913_v25 = vpop.f32.mrf.mxu0 }
 0x28a   : > { %v3250_v23 = vadd.f32 %v3249_v34, %v3081_v4  ;;  %v3418_v0 = vpop.f32.mrf.mxu3  ;;  %v2914_v16 = vadd.f32 %v2913_v25, %v7898_v24  ;;  %v3082_v36 = vpop.f32.mrf.mxu1  ;;  %v5055_v4 = vor.u32 %v6366_v63, %v5054_v59  ;;  %v7900_v34 = vld [vmem:[#allocation13_spill] sm:$0xff]  ;;  %v5078_v59 = vld [vmem:[#allocation2 + $0x1d0] sm:$0xf] }
 0x28b   : > { %v6373_v63 = vld [vmem:[#allocation2 + $0x1ec] sm:$0xf0] }
 0x28c   : > { %v7363_v29 = vadd.f32 %v3418_v0, %v3250_v23  ;;  %v3083_v40 = vadd.f32 %v3082_v36, %v2914_v16  ;;  %v5059_v23 = vor.u32 %v6362_v33, %v5056_v31  ;;  %v6369_v33 = vld [vmem:[#allocation2 + $0x1d4] sm:$0xf] }
 0x28d   : > { %v5080_v31 = vld [vmem:[#allocation2 + $0x1f0] sm:$0xf0] }
 0x28e   : > { %7899 = vst [vmem:[#allocation23_spill] sm:$0xff] %v7363_v29 }
 0x291   : > { %v3251_v18 = vpop.f32.mrf.mxu2  ;;  %v2916_v20 = vpop.f32.mrf.mxu0 }
 0x292   : > { %v3252_v55 = vadd.f32 %v3251_v18, %v3083_v40  ;;  %v3420_v3 = vpop.f32.mrf.mxu3  ;;  %v2917_v25 = vadd.f32 %v2916_v20, %v7900_v34  ;;  %v3085_v0 = vpop.f32.mrf.mxu1  ;;  %v7902_v40 = vld [vmem:[#allocation14_spill] sm:$0xff]  ;;  %v5088_v20 = vld [vmem:[#allocation2 + $0x1f8] sm:$0xf0] }
 0x294   : > { %v7366_v24 = vadd.f32 %v3420_v3, %v3252_v55  ;;  %v3086_v16 = vadd.f32 %v3085_v0, %v2917_v25  ;;  %3471 = vmatmul.bf16.gmra.mxu0 %v5047_v32  ;;  %v5086_v55 = vld [vmem:[#allocation2 + $0x1d8] sm:$0xf]  ;;  %v6370_v32 = vld [vmem:[#allocation2 + $0x1dc] sm:$0xf] }
 0x295   : > { %3640 = vmatmul.bf16.gmra.mxu1 %v5051_v8  ;;  %v6374_v3 = vld [vmem:[#allocation2 + $0x1f4] sm:$0xf0] }
 0x296   : > { %7901 = vst [vmem:[#allocation13_spill] sm:$0xff] %v7366_v24  ;;  %3809 = vmatmul.bf16.gmra.mxu2 %v5055_v4  ;;  %v5079_v4 = vor.u32 %v6373_v63, %v5078_v59  ;;  %v7907_v59 = vld [vmem:[#allocation17_spill] sm:$0xff]  ;;  %v7914_v24 = vld [vmem:[#allocation24_spill] sm:$0xff] }
 0x297   : > { %3978 = vmatmul.bf16.gmra.mxu3 %v5059_v23  ;;  %v5083_v23 = vor.u32 %v6369_v33, %v5080_v31 }
 0x299   : > { %v3254_v36 = vpop.f32.mrf.mxu2  ;;  %v2918_v11 = vpop.f32.mrf.mxu0 }
 0x29a   : > { %v3255_v29 = vadd.f32 %v3254_v36, %v3086_v16  ;;  %v3423_v46 = vpop.f32.mrf.mxu3  ;;  %v2919_v42 = vadd.f32 %v2918_v11, %v7902_v40  ;;  %v3087_v18 = vpop.f32.mrf.mxu1  ;;  %v5087_v16 = vor.u32 %v6374_v3, %v5086_v55  ;;  %v7904_v36 = vld [vmem:[#allocation5_spill] sm:$0xff]  ;;  %v7908_v55 = vld [vmem:[#allocation6_spill] sm:$0xff] }
 0x29c   : > { %v7369_v50 = vadd.f32 %v3423_v46, %v3255_v29  ;;  %v3088_v17 = vadd.f32 %v3087_v18, %v2919_v42  ;;  %v5091_v29 = vor.u32 %v6370_v32, %v5088_v20  ;;  %v7906_v42 = vld [vmem:[#allocation16_spill] sm:$0xff]  ;;  %v7910_v20 = vld [vmem:[#allocation21_spill] sm:$0xff] }
 0x29d   : > { %v2767_v18 = vadd.f32 %v7906_v42, %v7328_v58  ;;  %v5120_v42 = vld [vmem:[#allocation2 + $0x238] sm:$0xf0] }
 0x29e   : > { %7903 = vst [vmem:[#allocation14_spill] sm:$0xff] %v7369_v50 }
 0x2a1   : > { %v3256_v8 = vpop.f32.mrf.mxu2  ;;  %v2921_v0 = vpop.f32.mrf.mxu0 }
 0x2a2   : > { %v3257_v34 = vadd.f32 %v3256_v8, %v3088_v17  ;;  %v3425_v25 = vpop.f32.mrf.mxu3  ;;  %v2922_v11 = vadd.f32 %v2921_v0, %v7904_v36  ;;  %v3090_v46 = vpop.f32.mrf.mxu1  ;;  %v2936_v17 = vadd.f32 %v7907_v59, %v2767_v18  ;;  %v6377_v36 = vld [vmem:[#allocation2 + $0x214] sm:$0xf]  ;;  %v7912_v18 = vld [vmem:[#allocation22_spill] sm:$0xff] }
 0x2a4   : > { %v7372_v40 = vadd.f32 %v3425_v25, %v3257_v34  ;;  %v3091_v50 = vadd.f32 %v3090_v46, %v2922_v11  ;;  %3476 = vmatmul.bf16.gmra.mxu0 %v5079_v4  ;;  %v2769_v34 = vadd.f32 %v7910_v20, %v7187_v10  ;;  %v7911_v25 = vld [vmem:[#allocation19_spill] sm:$0xff]  ;;  %v5118_v46 = vld [vmem:[#allocation2 + $0x218] sm:$0xf] }
 0x2a5   : > { %3645 = vmatmul.bf16.gmra.mxu1 %v5083_v23  ;;  %v3105_v4 = vadd.f32 %v7911_v25, %v2936_v17  ;;  %v5110_v23 = vld [vmem:[#allocation2 + $0x210] sm:$0xf]  ;;  %v5112_v11 = vld [vmem:[#allocation2 + $0x230] sm:$0xf0] }
 0x2a6   : > { %7905 = vst [vmem:[#allocation5_spill] sm:$0xff] %v7372_v40  ;;  %3814 = vmatmul.bf16.gmra.mxu2 %v5087_v16  ;;  %v6381_v16 = vld [vmem:[#allocation2 + $0x22c] sm:$0xf0]  ;;  %v2938_v59 = vadd.f32 %v7912_v18, %v2769_v34 }
 0x2a7   : > { %3983 = vmatmul.bf16.gmra.mxu3 %v5091_v29  ;;  %v6382_v29 = vld [vmem:[#allocation2 + $0x234] sm:$0xf0] }
 0x2a8   : > { %v3107_v51 = vadd.f32 %v7914_v24, %v2938_v59  ;;  %v5150_v24 = vld [vmem:[#allocation2 + $0x258] sm:$0xf] }
 0x2a9   : > { %v3259_v63 = vpop.f32.mrf.mxu2  ;;  %v2923_v31 = vpop.f32.mrf.mxu0  ;;  %v6390_v59 = vld [vmem:[#allocation2 + $0x274] sm:$0xf0] }
 0x2aa   : > { %v3260_v8 = vadd.f32 %v3259_v63, %v3091_v50  ;;  %v3428_v33 = vpop.f32.mrf.mxu3  ;;  %v2924_v3 = vadd.f32 %v2923_v31, %v7908_v55  ;;  %v3092_v0 = vpop.f32.mrf.mxu1  ;;  %v6378_v50 = vld [vmem:[#allocation2 + $0x21c] sm:$0xf] }
 0x2ab   : > { %v7913_v31 = vld [vmem:[#allocation20_spill] sm:$0xff]  ;;  %v5123_v25 = vor.u32 %v6378_v50, %v5120_v42  ;;  %v5142_v50 = vld [vmem:[#allocation2 + $0x250] sm:$0xf]  ;;  %v6385_v42 = vld [vmem:[#allocation2 + $0x254] sm:$0xf] }
 0x2ac   : > { %v7378_v32 = vadd.f32 %v3428_v33, %v3260_v8  ;;  %v3093_v58 = vadd.f32 %v3092_v0, %v2924_v3  ;;  %v3274_v8 = vadd.f32 %v7913_v31, %v3105_v4  ;;  %v5111_v33 = vor.u32 %v6381_v16, %v5110_v23  ;;  %v7915_v4 = vld [vmem:[#allocation25_spill] sm:$0xff]  ;;  %v6386_v31 = vld [vmem:[#allocation2 + $0x25c] sm:$0xf] }
 0x2ad   : > { %v5115_v3 = vor.u32 %v6377_v36, %v5112_v11  ;;  %v5119_v0 = vor.u32 %v6382_v29, %v5118_v46  ;;  %v3276_v23 = vadd.f32 %v7915_v4, %v3107_v51 }
 0x2ae   : > { %7909 = vst [vmem:[#allocation16_spill] sm:$0xff] %v7378_v32 }
 0x2b1   : > { %v3261_v63 = vpop.f32.mrf.mxu2  ;;  %v3442_v10 = vpop.f32.mrf.mxu0 }
 0x2b2   : > { %v3262_v55 = vadd.f32 %v3261_v63, %v3093_v58  ;;  %v3430_v32 = vpop.f32.mrf.mxu3  ;;  %v3443_v17 = vadd.f32 %v3442_v10, %v3274_v8  ;;  %v3611_v20 = vpop.f32.mrf.mxu1  ;;  %v5144_v63 = vld [vmem:[#allocation2 + $0x270] sm:$0xf0]  ;;  %v5152_v8 = vld [vmem:[#allocation2 + $0x278] sm:$0xf0] }
 0x2b4   : > { %v7385_v40 = vadd.f32 %v3430_v32, %v3262_v55  ;;  %v3612_v48 = vadd.f32 %v3611_v20, %v3443_v17  ;;  %3481 = vmatmul.bf16.gmra.mxu0 %v5111_v33  ;;  %v6389_v32 = vld [vmem:[#allocation2 + $0x26c] sm:$0xf0] }
 0x2b5   : > { %3650 = vmatmul.bf16.gmra.mxu1 %v5115_v3  ;;  %v5143_v55 = vor.u32 %v6389_v32, %v5142_v50 }
 0x2b6   : > { %3819 = vmatmul.bf16.gmra.mxu2 %v5119_v0  ;;  %v5151_v0 = vor.u32 %v6390_v59, %v5150_v24  ;;  %v6397_v24 = vld [vmem:[#allocation2 + $0x2ac] sm:$0xf0]  ;;  %v6393_v59 = vld [vmem:[#allocation2 + $0x294] sm:$0xf] }
 0x2b7   : > { %3988 = vmatmul.bf16.gmra.mxu3 %v5123_v25  ;;  %v5155_v25 = vor.u32 %v6386_v31, %v5152_v8  ;;  %v5176_v31 = vld [vmem:[#allocation2 + $0x2b0] sm:$0xf0]  ;;  %v6398_v8 = vld [vmem:[#allocation2 + $0x2b4] sm:$0xf0] }
 0x2b9   : > { %v3780_v34 = vpop.f32.mrf.mxu2  ;;  %v3444_v18 = vpop.f32.mrf.mxu0 }
 0x2ba   : > { %v3781_v58 = vadd.f32 %v3780_v34, %v3612_v48  ;;  %v3949_v16 = vpop.f32.mrf.mxu3  ;;  %v3445_v36 = vadd.f32 %v3444_v18, %v3276_v23  ;;  %v3613_v11 = vpop.f32.mrf.mxu1  ;;  %v5147_v48 = vor.u32 %v6385_v42, %v5144_v63  ;;  %v5174_v63 = vld [vmem:[#allocation2 + $0x290] sm:$0xf] }
 0x2bc   : > { %v3950_v46 = vadd.f32 %v3949_v16, %v3781_v58  ;;  %v3614_v29 = vadd.f32 %v3613_v11, %v3445_v36 }
 0x2be   : > { %v4109_v23 = vmax.f32 %v3950_v46, 0.0  ;;  %v5182_v46 = vld [vmem:[#allocation2 + $0x298] sm:$0xf] }
 0x2c1   : > { %v3782_v33 = vpop.f32.mrf.mxu2  ;;  %v3447_v51 = vpop.f32.mrf.mxu0 }
 0x2c2   : > { %v3783_v10 = vadd.f32 %v3782_v33, %v3614_v29  ;;  %v3951_v3 = vpop.f32.mrf.mxu3  ;;  %v3448_v17 = vadd.f32 %v3447_v51, %v7137_v22  ;;  %v3616_v20 = vpop.f32.mrf.mxu1  ;;  %v6394_v33 = vld [vmem:[#allocation2 + $0x29c] sm:$0xf] }
 0x2c4   : > { %v3952_v34 = vadd.f32 %v3951_v3, %v3783_v10  ;;  %v3617_v4 = vadd.f32 %v3616_v20, %v3448_v17  ;;  %3486 = vmatmul.bf16.gmra.mxu0 %v5143_v55  ;;  %v5184_v55 = vld [vmem:[#allocation2 + $0x2b8] sm:$0xf0]  ;;  %v5175_v3 = vor.u32 %v6397_v24, %v5174_v63  ;;  %v5179_v17 = vor.u32 %v6393_v59, %v5176_v31  ;;  %v5206_v59 = vld [vmem:[#allocation2 + $0x2d0] sm:$0xf] }
 0x2c5   : > { %3655 = vmatmul.bf16.gmra.mxu1 %v5147_v48  ;;  %v5183_v20 = vor.u32 %v6398_v8, %v5182_v46  ;;  %v6405_v31 = vld [vmem:[#allocation2 + $0x2ec] sm:$0xf0]  ;;  %v6401_v46 = vld [vmem:[#allocation2 + $0x2d4] sm:$0xf] }
 0x2c6   : > { %v4110_v58 = vmax.f32 %v3952_v34, 0.0  ;;  %3824 = vmatmul.bf16.gmra.mxu2 %v5151_v0  ;;  %v5187_v34 = vor.u32 %v6394_v33, %v5184_v55  ;;  %v5208_v8 = vld [vmem:[#allocation2 + $0x2f0] sm:$0xf0]  ;;  %v6406_v33 = vld [vmem:[#allocation2 + $0x2f4] sm:$0xf0] }
 0x2c7   : > { %3993 = vmatmul.bf16.gmra.mxu3 %v5155_v25  ;;  %v6402_v55 = vld [vmem:[#allocation2 + $0x2dc] sm:$0xf] }
 0x2c8   : > { %v7390_v16 = vpack.c.bf16 %v4110_v58, %v4109_v23 }
 0x2c9   : > { %v3785_v18 = vpop.f32.mrf.mxu2  ;;  %v3449_v29 = vpop.f32.mrf.mxu0 }
 0x2ca   : > { %v3786_v36 = vadd.f32 %v3785_v18, %v3617_v4  ;;  %v3954_v11 = vpop.f32.mrf.mxu3  ;;  %v3450_v50 = vadd.f32 %v3449_v29, %v7173_v30  ;;  %v3618_v32 = vpop.f32.mrf.mxu1 }
 0x2cc   : > { %v3955_v22 = vadd.f32 %v3954_v11, %v3786_v36  ;;  %v3619_v42 = vadd.f32 %v3618_v32, %v3450_v50 }
 0x2ce   : > { %v4111_v58 = vmax.f32 %v3955_v22, 0.0  ;;  %v5214_v22 = vld [vmem:[#allocation2 + $0x2d8] sm:$0xf] }
 0x2d1   : > { %v3787_v10 = vpop.f32.mrf.mxu2  ;;  %v3452_v0 = vpop.f32.mrf.mxu0 }
 0x2d2   : > { %v3788_v51 = vadd.f32 %v3787_v10, %v3619_v42  ;;  %v3956_v48 = vpop.f32.mrf.mxu3  ;;  %v3453_v30 = vadd.f32 %v3452_v0, %v7149_v47  ;;  %v3621_v25 = vpop.f32.mrf.mxu1  ;;  %v5216_v10 = vld [vmem:[#allocation2 + $0x2f8] sm:$0xf0] }
 0x2d4   : > { %v3957_v4 = vadd.f32 %v3956_v48, %v3788_v51  ;;  %v3622_v23 = vadd.f32 %v3621_v25, %v3453_v30  ;;  %3491 = vmatmul.bf16.gmra.mxu0 %v5175_v3  ;;  %v5207_v51 = vor.u32 %v6405_v31, %v5206_v59  ;;  %v5215_v30 = vor.u32 %v6406_v33, %v5214_v22  ;;  %v7916_v25 = vld [vmem:[#allocation31_spill] sm:$0xff] }
 0x2d5   : > { %3660 = vmatmul.bf16.gmra.mxu1 %v5179_v17  ;;  %v6413_v22 = vld [vmem:[#allocation2 + $0x32c] sm:$0xf0]  ;;  %v6409_v33 = vld [vmem:[#allocation2 + $0x314] sm:$0xf] }
 0x2d6   : > { %v4112_v18 = vmax.f32 %v3957_v4, 0.0  ;;  %3829 = vmatmul.bf16.gmra.mxu2 %v5183_v20  ;;  %v5211_v20 = vor.u32 %v6401_v46, %v5208_v8  ;;  %v5219_v4 = vor.u32 %v6402_v55, %v5216_v10  ;;  %v5238_v8 = vld [vmem:[#allocation2 + $0x310] sm:$0xf]  ;;  %v5240_v55 = vld [vmem:[#allocation2 + $0x330] sm:$0xf0] }
 0x2d7   : > { %3998 = vmatmul.bf16.gmra.mxu3 %v5187_v34  ;;  %v6414_v10 = vld [vmem:[#allocation2 + $0x334] sm:$0xf0] }
 0x2d8   : > { %v7394_v36 = vpack.c.bf16 %v4112_v18, %v4111_v58 }
 0x2d9   : > { %v3790_v11 = vpop.f32.mrf.mxu2  ;;  %v3454_v32 = vpop.f32.mrf.mxu0 }
 0x2da   : > { %v3791_v29 = vadd.f32 %v3790_v11, %v3622_v23  ;;  %v3959_v50 = vpop.f32.mrf.mxu3  ;;  %v3455_v42 = vadd.f32 %v3454_v32, %v7154_v7  ;;  %v3623_v63 = vpop.f32.mrf.mxu1 }
 0x2dc   : > { %v3960_v47 = vadd.f32 %v3959_v50, %v3791_v29  ;;  %v3624_v24 = vadd.f32 %v3623_v63, %v3455_v42 }
 0x2de   : > { %v4113_v18 = vmax.f32 %v3960_v47, 0.0  ;;  %v5246_v47 = vld [vmem:[#allocation2 + $0x318] sm:$0xf] }
 0x2e1   : > { %v3792_v3 = vpop.f32.mrf.mxu2  ;;  %v3457_v17 = vpop.f32.mrf.mxu0 }
 0x2e2   : > { %v3793_v48 = vadd.f32 %v3792_v3, %v3624_v24  ;;  %v3961_v0 = vpop.f32.mrf.mxu3  ;;  %v3458_v7 = vadd.f32 %v3457_v17, %v7916_v25  ;;  %v3626_v34 = vpop.f32.mrf.mxu1  ;;  %v6410_v3 = vld [vmem:[#allocation2 + $0x31c] sm:$0xf]  ;;  %v5243_v25 = vor.u32 %v6409_v33, %v5240_v55  ;;  %v6417_v33 = vld [vmem:[#allocation2 + $0x354] sm:$0xf] }
 0x2e3   : > { %v5272_v55 = vld [vmem:[#allocation2 + $0x370] sm:$0xf0] }
 0x2e4   : > { %v3962_v23 = vadd.f32 %v3961_v0, %v3793_v48  ;;  %v3627_v58 = vadd.f32 %v3626_v34, %v3458_v7  ;;  %3496 = vmatmul.bf16.gmra.mxu0 %v5207_v51  ;;  %v5248_v51 = vld [vmem:[#allocation2 + $0x338] sm:$0xf0]  ;;  %v5239_v0 = vor.u32 %v6413_v22, %v5238_v8  ;;  %v5247_v7 = vor.u32 %v6414_v10, %v5246_v47  ;;  %v5270_v8 = vld [vmem:[#allocation2 + $0x350] sm:$0xf]  ;;  %v5278_v47 = vld [vmem:[#allocation2 + $0x358] sm:$0xf] }
 0x2e5   : > { %3665 = vmatmul.bf16.gmra.mxu1 %v5211_v20  ;;  %v6421_v22 = vld [vmem:[#allocation2 + $0x36c] sm:$0xf0] }
 0x2e6   : > { %v4114_v11 = vmax.f32 %v3962_v23, 0.0  ;;  %3834 = vmatmul.bf16.gmra.mxu2 %v5215_v30 }
 0x2e7   : > { %4003 = vmatmul.bf16.gmra.mxu3 %v5219_v4  ;;  %v5251_v4 = vor.u32 %v6410_v3, %v5248_v51  ;;  %v6418_v3 = vld [vmem:[#allocation2 + $0x35c] sm:$0xf] }
 0x2e8   : > { %v7398_v29 = vpack.c.bf16 %v4114_v11, %v4113_v18  ;;  %v5280_v51 = vld [vmem:[#allocation2 + $0x378] sm:$0xf0] }
 0x2e9   : > { %v3795_v50 = vpop.f32.mrf.mxu2  ;;  %v3459_v63 = vpop.f32.mrf.mxu0 }
 0x2ea   : > { %v3796_v32 = vadd.f32 %v3795_v50, %v3627_v58  ;;  %v3964_v42 = vpop.f32.mrf.mxu3  ;;  %v3460_v24 = vadd.f32 %v3459_v63, %v7134_v53  ;;  %v3628_v59 = vpop.f32.mrf.mxu1 }
 0x2ec   : > { %v3965_v31 = vadd.f32 %v3964_v42, %v3796_v32  ;;  %v3629_v46 = vadd.f32 %v3628_v59, %v3460_v24 }
 0x2ee   : > { %v4115_v18 = vmax.f32 %v3965_v31, 0.0  ;;  %v6422_v31 = vld [vmem:[#allocation2 + $0x374] sm:$0xf0] }
 0x2f1   : > { %v3797_v48 = vpop.f32.mrf.mxu2  ;;  %v3462_v30 = vpop.f32.mrf.mxu0 }
 0x2f2   : > { %v3798_v17 = vadd.f32 %v3797_v48, %v3629_v46  ;;  %v3966_v20 = vpop.f32.mrf.mxu3  ;;  %v3463_v53 = vadd.f32 %v3462_v30, %v7146_v1  ;;  %v3631_v34 = vpop.f32.mrf.mxu1 }
 0x2f4   : > { %v3967_v23 = vadd.f32 %v3966_v20, %v3798_v17  ;;  %v3632_v58 = vadd.f32 %v3631_v34, %v3463_v53  ;;  %3501 = vmatmul.bf16.gmra.mxu0 %v5239_v0  ;;  %v5271_v0 = vor.u32 %v6421_v22, %v5270_v8  ;;  %v5283_v34 = vor.u32 %v6418_v3, %v5280_v51  ;;  %v5302_v8 = vld [vmem:[#allocation2 + $0x390] sm:$0xf]  ;;  %v5312_v3 = vld [vmem:[#allocation2 + $0x3b8] sm:$0xf0] }
 0x2f5   : > { %3670 = vmatmul.bf16.gmra.mxu1 %v5243_v25  ;;  %v5275_v25 = vor.u32 %v6417_v33, %v5272_v55  ;;  %v6429_v22 = vld [vmem:[#allocation2 + $0x3ac] sm:$0xf0]  ;;  %v6425_v33 = vld [vmem:[#allocation2 + $0x394] sm:$0xf]  ;;  %v5310_v55 = vld [vmem:[#allocation2 + $0x398] sm:$0xf] }
 0x2f6   : > { %v4116_v11 = vmax.f32 %v3967_v23, 0.0  ;;  %3839 = vmatmul.bf16.gmra.mxu2 %v5247_v7  ;;  %v5279_v7 = vor.u32 %v6422_v31, %v5278_v47  ;;  %v6430_v47 = vld [vmem:[#allocation2 + $0x3b4] sm:$0xf0]  ;;  %v5303_v51 = vor.u32 %v6429_v22, %v5302_v8  ;;  %v6437_v8 = vld [vmem:[#allocation2 + $0x3ec] sm:$0xf0] }
 0x2f7   : > { %4008 = vmatmul.bf16.gmra.mxu3 %v5251_v4  ;;  %v6433_v22 = vld [vmem:[#allocation2 + $0x3d4] sm:$0xf] }
 0x2f8   : > { %v7402_v50 = vpack.c.bf16 %v4116_v11, %v4115_v18 }
 0x2f9   : > { %v3800_v32 = vpop.f32.mrf.mxu2  ;;  %v3464_v24 = vpop.f32.mrf.mxu0 }
 0x2fa   : > { %v3801_v42 = vadd.f32 %v3800_v32, %v3632_v58  ;;  %v3969_v63 = vpop.f32.mrf.mxu3  ;;  %v3633_v59 = vpop.f32.mrf.mxu1  ;;  %v3465_v1 = vadd.f32 %v3464_v24, %v7157_v14 }
 0x2fc   : > { %v3970_v46 = vadd.f32 %v3969_v63, %v3801_v42  ;;  %v3634_v10 = vadd.f32 %v3633_v59, %v3465_v1 }
 0x2fe   : > { %v4117_v14 = vmax.f32 %v3970_v46, 0.0  ;;  %v5304_v46 = vld [vmem:[#allocation2 + $0x3b0] sm:$0xf0] }
 0x301   : > { %v3802_v48 = vpop.f32.mrf.mxu2  ;;  %v3467_v30 = vpop.f32.mrf.mxu0 }
 0x302   : > { %v3803_v17 = vadd.f32 %v3802_v48, %v3634_v10  ;;  %v3971_v20 = vpop.f32.mrf.mxu3  ;;  %v3636_v53 = vpop.f32.mrf.mxu1  ;;  %v3468_v58 = vadd.f32 %v3467_v30, %v7162_v28  ;;  %v6426_v10 = vld [vmem:[#allocation2 + $0x39c] sm:$0xf]  ;;  %v5307_v30 = vor.u32 %v6425_v33, %v5304_v46  ;;  %v5336_v33 = vld [vmem:[#allocation2 + $0x3f0] sm:$0xf0]  ;;  %v5342_v46 = vld [vmem:[#allocation2 + $0x3d8] sm:$0xf] }
 0x304   : > { %v3972_v4 = vadd.f32 %v3971_v20, %v3803_v17  ;;  %3506 = vmatmul.bf16.gmra.mxu0 %v5271_v0  ;;  %v3637_v24 = vadd.f32 %v3636_v53, %v3468_v58 }
 0x305   : > { %3675 = vmatmul.bf16.gmra.mxu1 %v5275_v25  ;;  %v5311_v25 = vor.u32 %v6430_v47, %v5310_v55  ;;  %v6438_v55 = vld [vmem:[#allocation2 + $0x3f4] sm:$0xf0] }
 0x306   : > { %v4118_v23 = vmax.f32 %v3972_v4, 0.0  ;;  %3844 = vmatmul.bf16.gmra.mxu2 %v5279_v7 }
 0x307   : > { %4013 = vmatmul.bf16.gmra.mxu3 %v5283_v34 }
 0x308   : > { %v7406_v18 = vpack.c.bf16 %v4118_v23, %v4117_v14 }
 0x309   : > { %v3805_v11 = vpop.f32.mrf.mxu2  ;;  %v3469_v42 = vpop.f32.mrf.mxu0 }
 0x30a   : > { %v3974_v32 = vpop.f32.mrf.mxu3  ;;  %v3638_v63 = vpop.f32.mrf.mxu1  ;;  %v3470_v59 = vadd.f32 %v3469_v42, %v7170_v12  ;;  %v3806_v1 = vadd.f32 %v3805_v11, %v3637_v24  ;;  %v5315_v12 = vor.u32 %v6426_v10, %v5312_v3  ;;  %v5344_v10 = vld [vmem:[#allocation2 + $0x3f8] sm:$0xf0] }
 0x30c   : > { %v3639_v31 = vadd.f32 %v3638_v63, %v3470_v59  ;;  %v3975_v48 = vadd.f32 %v3974_v32, %v3806_v1  ;;  %v5334_v1 = vld [vmem:[#allocation2 + $0x3d0] sm:$0xf] }
 0x30d   : > { %v5335_v3 = vor.u32 %v6437_v8, %v5334_v1  ;;  %v6441_v1 = vld [vmem:[#allocation2 + $0x414] sm:$0xf] }
 0x30e   : > { %v4119_v34 = vmax.f32 %v3975_v48, 0.0  ;;  %v5368_v8 = vld [vmem:[#allocation2 + $0x430] sm:$0xf0] }
 0x311   : > { %v3807_v28 = vpop.f32.mrf.mxu2  ;;  %v3472_v20 = vpop.f32.mrf.mxu0 }
 0x312   : > { %v3808_v0 = vadd.f32 %v3807_v28, %v3639_v31  ;;  %v3976_v17 = vpop.f32.mrf.mxu3  ;;  %v3641_v7 = vpop.f32.mrf.mxu1  ;;  %v3473_v14 = vadd.f32 %v3472_v20, %v7178_v41  ;;  %v6434_v31 = vld [vmem:[#allocation2 + $0x3dc] sm:$0xf]  ;;  %v5343_v20 = vor.u32 %v6438_v55, %v5342_v46 }
 0x313   : > { %v6442_v55 = vld [vmem:[#allocation2 + $0x41c] sm:$0xf] }
 0x314   : > { %v3977_v53 = vadd.f32 %v3976_v17, %v3808_v0  ;;  %3511 = vmatmul.bf16.gmra.mxu0 %v5303_v51  ;;  %v3642_v63 = vadd.f32 %v3641_v7, %v3473_v14  ;;  %v5339_v17 = vor.u32 %v6433_v22, %v5336_v33  ;;  %v5374_v22 = vld [vmem:[#allocation2 + $0x418] sm:$0xf] }
 0x315   : > { %3680 = vmatmul.bf16.gmra.mxu1 %v5307_v30  ;;  %v6446_v33 = vld [vmem:[#allocation2 + $0x434] sm:$0xf0] }
 0x316   : > { %v4120_v4 = vmax.f32 %v3977_v53, 0.0  ;;  %3849 = vmatmul.bf16.gmra.mxu2 %v5311_v25 }
 0x317   : > { %4018 = vmatmul.bf16.gmra.mxu3 %v5315_v12 }
 0x318   : > { %v7410_v23 = vpack.c.bf16 %v4120_v4, %v4119_v34 }
 0x319   : > { %v3810_v58 = vpop.f32.mrf.mxu2  ;;  %v3474_v32 = vpop.f32.mrf.mxu0 }
 0x31a   : > { %v3979_v11 = vpop.f32.mrf.mxu3  ;;  %v3643_v42 = vpop.f32.mrf.mxu1  ;;  %v3475_v24 = vadd.f32 %v3474_v32, %v7183_v62  ;;  %v3811_v59 = vadd.f32 %v3810_v58, %v3642_v63  ;;  %v5347_v62 = vor.u32 %v6434_v31, %v5344_v10 }
 0x31c   : > { %v3644_v47 = vadd.f32 %v3643_v42, %v3475_v24  ;;  %v3980_v28 = vadd.f32 %v3979_v11, %v3811_v59  ;;  %v5366_v24 = vld [vmem:[#allocation2 + $0x410] sm:$0xf] }
 0x31d   : > { %v6445_v59 = vld [vmem:[#allocation2 + $0x42c] sm:$0xf0] }
 0x31e   : > { %v4121_v7 = vmax.f32 %v3980_v28, 0.0 }
 0x321   : > { %v3812_v41 = vpop.f32.mrf.mxu2  ;;  %v3477_v0 = vpop.f32.mrf.mxu0 }
 0x322   : > { %v3813_v51 = vadd.f32 %v3812_v41, %v3644_v47  ;;  %v3981_v48 = vpop.f32.mrf.mxu3  ;;  %v3646_v30 = vpop.f32.mrf.mxu1  ;;  %v3478_v53 = vadd.f32 %v3477_v0, %v7192_v57  ;;  %v5376_v47 = vld [vmem:[#allocation2 + $0x438] sm:$0xf0]  ;;  %v5367_v57 = vor.u32 %v6445_v59, %v5366_v24  ;;  %v5398_v24 = vld [vmem:[#allocation2 + $0x450] sm:$0xf] }
 0x323   : > { %v7917_v0 = vld [vmem:[#allocation32_spill] sm:$0xff]  ;;  %v6453_v59 = vld [vmem:[#allocation2 + $0x46c] sm:$0xf0] }
 0x324   : > { %v3982_v25 = vadd.f32 %v3981_v48, %v3813_v51  ;;  %3516 = vmatmul.bf16.gmra.mxu0 %v5335_v3  ;;  %v3647_v32 = vadd.f32 %v3646_v30, %v3478_v53  ;;  %v5371_v51 = vor.u32 %v6441_v1, %v5368_v8  ;;  %v5375_v48 = vor.u32 %v6446_v33, %v5374_v22  ;;  %v6449_v1 = vld [vmem:[#allocation2 + $0x454] sm:$0xf]  ;;  %v5406_v22 = vld [vmem:[#allocation2 + $0x458] sm:$0xf] }
 0x325   : > { %3685 = vmatmul.bf16.gmra.mxu1 %v5339_v17  ;;  %v5400_v8 = vld [vmem:[#allocation2 + $0x470] sm:$0xf0]  ;;  %v6454_v33 = vld [vmem:[#allocation2 + $0x474] sm:$0xf0] }
 0x326   : > { %v4122_v12 = vmax.f32 %v3982_v25, 0.0  ;;  %3854 = vmatmul.bf16.gmra.mxu2 %v5343_v20  ;;  %v5379_v20 = vor.u32 %v6442_v55, %v5376_v47  ;;  %v5408_v55 = vld [vmem:[#allocation2 + $0x478] sm:$0xf0] }
 0x327   : > { %4023 = vmatmul.bf16.gmra.mxu3 %v5347_v62 }
 0x328   : > { %v4179_v34 = vpack.c.bf16 %v4122_v12, %v4121_v7 }
 0x329   : > { %v3815_v4 = vpop.f32.mrf.mxu2  ;;  %v3479_v58 = vpop.f32.mrf.mxu0 }
 0x32a   : > { %v3984_v14 = vpop.f32.mrf.mxu3  ;;  %v3648_v11 = vpop.f32.mrf.mxu1  ;;  %v3480_v42 = vadd.f32 %v3479_v58, %v7196_v37  ;;  %v3816_v63 = vadd.f32 %v3815_v4, %v3647_v32 }
 0x32c   : > { %v3649_v46 = vadd.f32 %v3648_v11, %v3480_v42  ;;  %v3985_v10 = vadd.f32 %v3984_v14, %v3816_v63 }
 0x32e   : > { %v4123_v25 = vmax.f32 %v3985_v10, 0.0 }
 0x331   : > { %v3817_v31 = vpop.f32.mrf.mxu2  ;;  %v3482_v28 = vpop.f32.mrf.mxu0 }
 0x332   : > { %v3818_v41 = vadd.f32 %v3817_v31, %v3649_v46  ;;  %v3986_v3 = vpop.f32.mrf.mxu3  ;;  %v3483_v37 = vadd.f32 %v3482_v28, %v7917_v0  ;;  %v3651_v17 = vpop.f32.mrf.mxu1  ;;  %v6450_v46 = vld [vmem:[#allocation2 + $0x45c] sm:$0xf]  ;;  %v5399_v31 = vor.u32 %v6453_v59, %v5398_v24  ;;  %v7918_v28 = vld [vmem:[#allocation33_spill] sm:$0xff] }
 0x333   : > { %v6458_v24 = vld [vmem:[#allocation2 + $0x49c] sm:$0xf] }
 0x334   : > { %v3987_v30 = vadd.f32 %v3986_v3, %v3818_v41  ;;  %v3652_v62 = vadd.f32 %v3651_v17, %v3483_v37  ;;  %3521 = vmatmul.bf16.gmra.mxu0 %v5367_v57  ;;  %v5407_v3 = vor.u32 %v6454_v33, %v5406_v22  ;;  %v5440_v59 = vld [vmem:[#allocation2 + $0x4b8] sm:$0xf0] }
 0x335   : > { %3690 = vmatmul.bf16.gmra.mxu1 %v5371_v51 }
 0x336   : > { %v4124_v7 = vmax.f32 %v3987_v30, 0.0  ;;  %3859 = vmatmul.bf16.gmra.mxu2 %v5375_v48  ;;  %v5411_v48 = vor.u32 %v6450_v46, %v5408_v55 }
 0x337   : > { %4028 = vmatmul.bf16.gmra.mxu3 %v5379_v20 }
 0x338   : > { %v4180_v12 = vpack.c.bf16 %v4124_v7, %v4123_v25 }
 0x339   : > { %v3820_v53 = vpop.f32.mrf.mxu2  ;;  %v3484_v58 = vpop.f32.mrf.mxu0 }
 0x33a   : > { %v3821_v4 = vadd.f32 %v3820_v53, %v3652_v62  ;;  %v3989_v14 = vpop.f32.mrf.mxu3  ;;  %4493 = vmatpush.bf16.msra.mxu0 %v4180_v12  ;;  %v3485_v11 = vadd.f32 %v3484_v58, %v7205_v61  ;;  %v3653_v32 = vpop.f32.mrf.mxu1  ;;  %v5403_v61 = vor.u32 %v6449_v1, %v5400_v8  ;;  %v5430_v58 = vld [vmem:[#allocation2 + $0x490] sm:$0xf] }
 0x33c   : > { %v3990_v42 = vadd.f32 %v3989_v14, %v3821_v4  ;;  %v3654_v63 = vadd.f32 %v3653_v32, %v3485_v11  ;;  %v6461_v11 = vld [vmem:[#allocation2 + $0x4ac] sm:$0xf0]  ;;  %v6457_v32 = vld [vmem:[#allocation2 + $0x494] sm:$0xf] }
 0x33d   : > { %v5431_v8 = vor.u32 %v6461_v11, %v5430_v58 }
 0x33e   : > { %4494 = vmatpush.bf16.msra.mxu0 %v4179_v34  ;;  %v4125_v17 = vmax.f32 %v3990_v42, 0.0  ;;  %v5432_v42 = vld [vmem:[#allocation2 + $0x4b0] sm:$0xf0] }
 0x33f   : > { %v5435_v46 = vor.u32 %v6457_v32, %v5432_v42 }
 0x341   : > { %v3822_v47 = vpop.f32.mrf.mxu2  ;;  %v3487_v41 = vpop.f32.mrf.mxu0 }
 0x342   : > { %v3823_v57 = vadd.f32 %v3822_v47, %v3654_v63  ;;  %v3991_v10 = vpop.f32.mrf.mxu3  ;;  %4495 = vmatpush.bf16.msra.mxu0 %v7410_v23  ;;  %v3488_v51 = vadd.f32 %v3487_v41, %v7918_v28  ;;  %v3656_v34 = vpop.f32.mrf.mxu1  ;;  %v6462_v63 = vld [vmem:[#allocation2 + $0x4b4] sm:$0xf0] }
 0x344   : > { %v3992_v0 = vadd.f32 %v3991_v10, %v3823_v57  ;;  %v3657_v37 = vadd.f32 %v3656_v34, %v3488_v51  ;;  %3526 = vmatmul.bf16.gmra.mxu0 %v5399_v31  ;;  %v5443_v31 = vor.u32 %v6458_v24, %v5440_v59 }
 0x345   : > { %3695 = vmatmul.bf16.gmra.mxu1 %v5403_v61 }
 0x346   : > { %v4126_v20 = vmax.f32 %v3992_v0, 0.0  ;;  %3864 = vmatmul.bf16.gmra.mxu2 %v5407_v3  ;;  %4496 = vmatpush.bf16.msra.mxu0 %v7406_v18  ;;  %v5438_v18 = vld [vmem:[#allocation2 + $0x498] sm:$0xf] }
 0x347   : > { %4033 = vmatmul.bf16.gmra.mxu3 %v5411_v48 }
 0x348   : > { %v7420_v30 = vpack.c.bf16 %v4126_v20, %v4125_v17  ;;  %v6469_v17 = vld [vmem:[#allocation2 + $0x4ec] sm:$0xf0]  ;;  %v6465_v20 = vld [vmem:[#allocation2 + $0x4d4] sm:$0xf] }
 0x349   : > { %v3825_v23 = vpop.f32.mrf.mxu2  ;;  %v3489_v7 = vpop.f32.mrf.mxu0 }
 0x34a   : > { %v3826_v62 = vadd.f32 %v3825_v23, %v3657_v37  ;;  %v3994_v25 = vpop.f32.mrf.mxu3  ;;  %4497 = vmatpush.bf16.msra.mxu0 %v7402_v50  ;;  %v3490_v12 = vadd.f32 %v3489_v7, %v7210_v43  ;;  %v3658_v53 = vpop.f32.mrf.mxu1  ;;  %v5439_v43 = vor.u32 %v6462_v63, %v5438_v18  ;;  %v5462_v37 = vld [vmem:[#allocation2 + $0x4d0] sm:$0xf]  ;;  %v5464_v23 = vld [vmem:[#allocation2 + $0x4f0] sm:$0xf0]  ;;  %v6466_v7 = vld [vmem:[#allocation2 + $0x4dc] sm:$0xf] }
 0x34b   : > { %v5467_v11 = vor.u32 %v6465_v20, %v5464_v23 }
 0x34c   : > { %v3995_v4 = vadd.f32 %v3994_v25, %v3826_v62  ;;  %v3659_v14 = vadd.f32 %v3658_v53, %v3490_v12  ;;  %v5470_v62 = vld [vmem:[#allocation2 + $0x4d8] sm:$0xf]  ;;  %v5472_v12 = vld [vmem:[#allocation2 + $0x4f8] sm:$0xf0]  ;;  %v5463_v53 = vor.u32 %v6469_v17, %v5462_v37 }
 0x34d   : > { %v6470_v25 = vld [vmem:[#allocation2 + $0x4f4] sm:$0xf0]  ;;  %v5475_v18 = vor.u32 %v6466_v7, %v5472_v12 }
 0x34e   : > { %4498 = vmatpush.bf16.msra.mxu0 %v7398_v29  ;;  %v4127_v10 = vmax.f32 %v3995_v4, 0.0  ;;  %v5471_v32 = vor.u32 %v6470_v25, %v5470_v62 }
 0x351   : > { %v3827_v1 = vpop.f32.mrf.mxu2  ;;  %v3492_v50 = vpop.f32.mrf.mxu0 }
 0x352   : > { %v3828_v22 = vadd.f32 %v3827_v1, %v3659_v14  ;;  %v3996_v33 = vpop.f32.mrf.mxu3  ;;  %4499 = vmatpush.bf16.msra.mxu0 %v7394_v36  ;;  %v3493_v55 = vadd.f32 %v3492_v50, %v7213_v35  ;;  %v3661_v47 = vpop.f32.mrf.mxu1 }
 0x354   : > { %v3997_v57 = vadd.f32 %v3996_v33, %v3828_v22  ;;  %v3662_v29 = vadd.f32 %v3661_v47, %v3493_v55  ;;  %3531 = vmatmul.bf16.gmra.mxu0 %v5431_v8  ;;  %v4251_v8 = vld [vmem:[%s7834_s4 + $0x70] sm:$0xff] }
 0x355   : > { %3700 = vmatmul.bf16.gmra.mxu1 %v5435_v46  ;;  %4325 = vperm.xlu1 %6638, %v4251_v8   ;;  %v6485_v8 = vld [vmem:[#allocation2 + $0x56c] sm:$0xf0] }
 0x356   : > { %v4128_v41 = vmax.f32 %v3997_v57, 0.0  ;;  %3869 = vmatmul.bf16.gmra.mxu2 %v5439_v43  ;;  %4500 = vmatpush.bf16.msra.mxu0 %v7390_v16 }
 0x357   : > { %4038 = vmatmul.bf16.gmra.mxu3 %v5443_v31 }
 0x358   : > { %v7428_v61 = vpack.c.bf16 %v4128_v41, %v4127_v10  ;;  %v6477_v10 = vld [vmem:[#allocation2 + $0x52c] sm:$0xf0]  ;;  %v6473_v41 = vld [vmem:[#allocation2 + $0x514] sm:$0xf] }
 0x359   : > { %v3830_v3 = vpop.f32.mrf.mxu2  ;;  %v3494_v36 = vpop.f32.mrf.mxu0 }
 0x35a   : > { %v3831_v28 = vadd.f32 %v3830_v3, %v3662_v29  ;;  %v3999_v51 = vpop.f32.mrf.mxu3  ;;  %v3495_v35 = vadd.f32 %v3494_v36, %v7216_v39  ;;  %v3663_v34 = vpop.f32.mrf.mxu1  ;;  %v5494_v29 = vld [vmem:[#allocation2 + $0x510] sm:$0xf]  ;;  %v5496_v3 = vld [vmem:[#allocation2 + $0x530] sm:$0xf0]  ;;  %v4250_v36 = vld [vmem:[%s7834_s4 + $0x68] sm:$0xff] }
 0x35b   : > { %v5499_v23 = vor.u32 %v6473_v41, %v5496_v3 }
 0x35c   : > { %v4000_v48 = vadd.f32 %v3999_v51, %v3831_v28  ;;  %v3664_v0 = vadd.f32 %v3663_v34, %v3495_v35  ;;  %v5502_v28 = vld [vmem:[#allocation2 + $0x518] sm:$0xf]  ;;  %v6474_v35 = vld [vmem:[#allocation2 + $0x51c] sm:$0xf] }
 0x35d   : > { %v6478_v51 = vld [vmem:[#allocation2 + $0x534] sm:$0xf0]  ;;  %v5504_v34 = vld [vmem:[#allocation2 + $0x538] sm:$0xf0]  ;;  %4320 = vperm.xlu1 %6638, %v4250_v36  }
 0x35e   : > { %v4129_v59 = vmax.f32 %v4000_v48, 0.0  ;;  %v5503_v62 = vor.u32 %v6478_v51, %v5502_v28  ;;  %v5507_v12 = vor.u32 %v6474_v35, %v5504_v34 }
 0x361   : > { %v3832_v16 = vpop.f32.mrf.mxu2  ;;  %v3497_v58 = vpop.f32.mrf.mxu0 }
 0x362   : > { %v3833_v4 = vadd.f32 %v3832_v16, %v3664_v0  ;;  %v4001_v14 = vpop.f32.mrf.mxu3  ;;  %v3498_v39 = vadd.f32 %v3497_v58, %v7219_v44  ;;  %v3666_v42 = vpop.f32.mrf.mxu1  ;;  %v4249_v44 = vld [vmem:[%s7834_s4 + $0x60] sm:$0xff]  ;;  %v5495_v0 = vor.u32 %v6477_v10, %v5494_v29  ;;  %v4242_v10 = vld [vmem:[%s7834_s4 + $0x28] sm:$0xff] }
 0x363   : > { %4315 = vperm.xlu0 %6637, %v4249_v44   ;;  %v4245_v58 = vld [vmem:[%s7834_s4 + $0x40] sm:$0xff]  ;;  %v5528_v44 = vld [vmem:[#allocation2 + $0x570] sm:$0xf0] }
 0x364   : > { %v4002_v63 = vadd.f32 %v4001_v14, %v3833_v4  ;;  %v3667_v24 = vadd.f32 %v3666_v42, %v3498_v39  ;;  %3536 = vmatmul.bf16.gmra.mxu0 %v5463_v53 }
 0x365   : > { %3705 = vmatmul.bf16.gmra.mxu1 %v5467_v11  ;;  %4295 = vperm.xlu1 %6638, %v4245_v58   ;;  %v6493_v58 = vld [vmem:[#allocation2 + $0x5ac] sm:$0xf0] }
 0x366   : > { %v4130_v1 = vmax.f32 %v4002_v63, 0.0  ;;  %3874 = vmatmul.bf16.gmra.mxu2 %v5471_v32 }
 0x367   : > { %4043 = vmatmul.bf16.gmra.mxu3 %v5475_v18 }
 0x368   : > { %v7435_v22 = vpack.c.bf16 %v4130_v1, %v4129_v59  ;;  %v5526_v1 = vld [vmem:[#allocation2 + $0x550] sm:$0xf] }
 0x369   : > { %v3835_v33 = vpop.f32.mrf.mxu2  ;;  %v3499_v43 = vpop.f32.mrf.mxu0  ;;  %v5527_v29 = vor.u32 %v6485_v8, %v5526_v1 }
 0x36a   : > { %v3836_v50 = vadd.f32 %v3835_v33, %v3667_v24  ;;  %v4004_v46 = vpop.f32.mrf.mxu3  ;;  %v3500_v55 = vadd.f32 %v3499_v43, %v7222_v15  ;;  %v3668_v47 = vpop.f32.mrf.mxu1  ;;  %v4248_v15 = vld [vmem:[%s7834_s4 + $0x58] sm:$0xff]  ;;  %v6481_v33 = vld [vmem:[#allocation2 + $0x554] sm:$0xf] }
 0x36b   : > { %4310 = vperm.xlu0 %6637, %v4248_v15   ;;  %v4244_v43 = vld [vmem:[%s7834_s4 + $0x38] sm:$0xff]  ;;  %v5531_v51 = vor.u32 %v6481_v33, %v5528_v44 }
 0x36c   : > { %v4005_v31 = vadd.f32 %v4004_v46, %v3836_v50  ;;  %v3669_v57 = vadd.f32 %v3668_v47, %v3500_v55  ;;  %v5534_v50 = vld [vmem:[#allocation2 + $0x558] sm:$0xf]  ;;  %v6482_v47 = vld [vmem:[#allocation2 + $0x55c] sm:$0xf] }
 0x36d   : > { %v6486_v46 = vld [vmem:[#allocation2 + $0x574] sm:$0xf0]  ;;  %4290 = vperm.xlu1 %6638, %v4244_v43  }
 0x36e   : > { %v4131_v4 = vmax.f32 %v4005_v31, 0.0  ;;  %v5536_v31 = vld [vmem:[#allocation2 + $0x578] sm:$0xf0]  ;;  %v5535_v36 = vor.u32 %v6486_v46, %v5534_v50 }
 0x36f   : > { %v5539_v34 = vor.u32 %v6482_v47, %v5536_v31 }
 0x371   : > { %v3837_v48 = vpop.f32.mrf.mxu2  ;;  %v3502_v20 = vpop.f32.mrf.mxu0 }
 0x372   : > { %v3838_v37 = vadd.f32 %v3837_v48, %v3669_v57  ;;  %v4006_v17 = vpop.f32.mrf.mxu3  ;;  %v3503_v25 = vadd.f32 %v3502_v20, %v7225_v21  ;;  %v3671_v7 = vpop.f32.mrf.mxu1  ;;  %v4243_v21 = vld [vmem:[%s7834_s4 + $0x30] sm:$0xff] }
 0x373   : > { %4285 = vperm.xlu0 %6637, %v4243_v21   ;;  %v5560_v21 = vld [vmem:[#allocation2 + $0x5b0] sm:$0xf0] }
 0x374   : > { %v4007_v16 = vadd.f32 %v4006_v17, %v3838_v37  ;;  %v3672_v53 = vadd.f32 %v3671_v7, %v3503_v25  ;;  %3541 = vmatmul.bf16.gmra.mxu0 %v5495_v0  ;;  %v4239_v37 = vld [vmem:[%s7834_s4 + $0x10] sm:$0xff]  ;;  %v4237_v25 = vld [vmem:[%s7834_s4] sm:$0xff] }
 0x375   : > { %3710 = vmatmul.bf16.gmra.mxu1 %v5499_v23  ;;  %4265 = vperm.xlu1 %6638, %v4239_v37   ;;  %v6501_v37 = vld [vmem:[#allocation2 + $0x5ec] sm:$0xf0] }
 0x376   : > { %v4132_v14 = vmax.f32 %v4007_v16, 0.0  ;;  %3879 = vmatmul.bf16.gmra.mxu2 %v5503_v62  ;;  %v4247_v62 = vld [vmem:[%s7834_s4 + $0x50] sm:$0xff] }
 0x377   : > { %4048 = vmatmul.bf16.gmra.mxu3 %v5507_v12 }
 0x378   : > { %v7451_v11 = vpack.c.bf16 %v4132_v14, %v4131_v4  ;;  %v5558_v4 = vld [vmem:[#allocation2 + $0x590] sm:$0xf] }
 0x379   : > { %v3840_v32 = vpop.f32.mrf.mxu2  ;;  %v3504_v18 = vpop.f32.mrf.mxu0  ;;  %v5559_v8 = vor.u32 %v6493_v58, %v5558_v4 }
 0x37a   : > { %v3841_v39 = vadd.f32 %v3840_v32, %v3672_v53  ;;  %v4009_v42 = vpop.f32.mrf.mxu3  ;;  %v3673_v63 = vpop.f32.mrf.mxu1  ;;  %v3505_v59 = vadd.f32 %v3504_v18, %v7228_v56  ;;  %v4252_v56 = vld [vmem:[%s7834_s4 + $0x78] sm:$0xff]  ;;  %v6489_v32 = vld [vmem:[#allocation2 + $0x594] sm:$0xf]  ;;  %v4238_v18 = vld [vmem:[%s7834_s4 + $0x8] sm:$0xff] }
 0x37b   : > { %4330 = vperm.xlu2 %6639, %v4252_v56   ;;  %4280 = vperm.xlu0 %6637, %v4242_v10   ;;  %v5563_v43 = vor.u32 %v6489_v32, %v5560_v21 }
 0x37c   : > { %v4010_v24 = vadd.f32 %v4009_v42, %v3841_v39  ;;  %v3674_v55 = vadd.f32 %v3673_v63, %v3505_v59  ;;  %v5566_v39 = vld [vmem:[#allocation2 + $0x598] sm:$0xf]  ;;  %v5568_v59 = vld [vmem:[#allocation2 + $0x5b8] sm:$0xf0] }
 0x37d   : > { %v6494_v42 = vld [vmem:[#allocation2 + $0x5b4] sm:$0xf0]  ;;  %4260 = vperm.xlu1 %6638, %v4238_v18  }
 0x37e   : > { %v4133_v0 = vmax.f32 %v4010_v24, 0.0  ;;  %v6490_v24 = vld [vmem:[#allocation2 + $0x59c] sm:$0xf] }
 0x37f   : > { %v5571_v31 = vor.u32 %v6490_v24, %v5568_v59 }
 0x381   : > { %v3842_v57 = vpop.f32.mrf.mxu2  ;;  %v3507_v28 = vpop.f32.mrf.mxu0 }
 0x382   : > { %v3843_v41 = vadd.f32 %v3842_v57, %v3674_v55  ;;  %v4011_v3 = vpop.f32.mrf.mxu3  ;;  %v3676_v35 = vpop.f32.mrf.mxu1  ;;  %v3508_v17 = vadd.f32 %v3507_v28, %v7231_v45  ;;  %v5567_v55 = vor.u32 %v6494_v42, %v5566_v39  ;;  %v4241_v28 = vld [vmem:[%s7834_s4 + $0x20] sm:$0xff] }
 0x383   : > { %4305 = vperm.xlu2 %6639, %v4247_v62   ;;  %4255 = vperm.xlu0 %6637, %v4237_v25   ;;  %v6502_v62 = vld [vmem:[#allocation2 + $0x5f4] sm:$0xf0] }
 0x384   : > { %v4012_v48 = vadd.f32 %v4011_v3, %v3843_v41  ;;  %3546 = vmatmul.bf16.gmra.mxu0 %v5527_v29  ;;  %v3677_v53 = vadd.f32 %v3676_v35, %v3508_v17  ;;  %v6497_v17 = vld [vmem:[#allocation2 + $0x5d4] sm:$0xf] }
 0x385   : > { %3715 = vmatmul.bf16.gmra.mxu1 %v5531_v51 }
 0x386   : > { %v4134_v15 = vmax.f32 %v4012_v48, 0.0  ;;  %3884 = vmatmul.bf16.gmra.mxu2 %v5535_v36 }
 0x387   : > { %4053 = vmatmul.bf16.gmra.mxu3 %v5539_v34 }
 0x388   : > { %v7470_v20 = vpack.c.bf16 %v4134_v15, %v4133_v0  ;;  %v5590_v15 = vld [vmem:[#allocation2 + $0x5d0] sm:$0xf] }
 0x389   : > { %v3845_v23 = vpop.f32.mrf.mxu2  ;;  %v3509_v12 = vpop.f32.mrf.mxu0 }
 0x38a   : > { %v4014_v7 = vpop.f32.mrf.mxu3  ;;  %v3678_v16 = vpop.f32.mrf.mxu1  ;;  %v3510_v45 = vadd.f32 %v3509_v12, %v7234_v26  ;;  %v3846_v14 = vadd.f32 %v3845_v23, %v3677_v53  ;;  %v4246_v26 = vld [vmem:[%s7834_s4 + $0x48] sm:$0xff]  ;;  %v5592_v23 = vld [vmem:[#allocation2 + $0x5f0] sm:$0xf0]  ;;  %v5600_v12 = vld [vmem:[#allocation2 + $0x5f8] sm:$0xf0]  ;;  %v5591_v53 = vor.u32 %v6501_v37, %v5590_v15 }
 0x38b   : > { %4300 = vperm.xlu2 %6639, %v4246_v26   ;;  %v5595_v32 = vor.u32 %v6497_v17, %v5592_v23  ;;  %v4714_v26 = vld [vmem:[%s7836_s6] sm:$0xff] }
 0x38c   : > { %v3679_v63 = vadd.f32 %v3678_v16, %v3510_v45  ;;  %v4015_v33 = vadd.f32 %v4014_v7, %v3846_v14  ;;  %v6498_v7 = vld [vmem:[#allocation2 + $0x5dc] sm:$0xf] }
 0x38d   : > { %v4240_v45 = vld [vmem:[%s7834_s4 + $0x18] sm:$0xff]  ;;  %v5603_v42 = vor.u32 %v6498_v7, %v5600_v12 }
 0x38e   : > { %v4135_v29 = vmax.f32 %v4015_v33, 0.0 }
 0x391   : > { %v3847_v1 = vpop.f32.mrf.mxu2  ;;  %v3512_v46 = vpop.f32.mrf.mxu0 }
 0x392   : > { %v3848_v44 = vadd.f32 %v3847_v1, %v3679_v63  ;;  %v4016_v50 = vpop.f32.mrf.mxu3  ;;  %v3681_v47 = vpop.f32.mrf.mxu1  ;;  %v3513_v10 = vadd.f32 %v3512_v46, %v7237_v9  ;;  %v5598_v9 = vld [vmem:[#allocation2 + $0x5d8] sm:$0xf] }
 0x393   : > { %4275 = vperm.xlu2 %6639, %v4241_v28   ;;  %v5599_v21 = vor.u32 %v6502_v62, %v5598_v9  ;;  %v5632_v28 = vld [vmem:[#allocation2 + $0x638] sm:$0xf0] }
 0x394   : > { %v4017_v57 = vadd.f32 %v4016_v50, %v3848_v44  ;;  %3551 = vmatmul.bf16.gmra.mxu0 %v5559_v8  ;;  %v3682_v34 = vadd.f32 %v3681_v47, %v3513_v10  ;;  %v5622_v47 = vld [vmem:[#allocation2 + $0x610] sm:$0xf] }
 0x395   : > { %3720 = vmatmul.bf16.gmra.mxu1 %v5563_v43 }
 0x396   : > { %v4136_v56 = vmax.f32 %v4017_v57, 0.0  ;;  %3889 = vmatmul.bf16.gmra.mxu2 %v5567_v55  ;;  %v6505_v57 = vld [vmem:[#allocation2 + $0x614] sm:$0xf] }
 0x397   : > { %4058 = vmatmul.bf16.gmra.mxu3 %v5571_v31  ;;  %v6509_v31 = vld [vmem:[#allocation2 + $0x62c] sm:$0xf0] }
 0x398   : > { %v7486_v41 = vpack.c.bf16 %v4136_v56, %v4135_v29  ;;  %v5624_v29 = vld [vmem:[#allocation2 + $0x630] sm:$0xf0]  ;;  %v5630_v56 = vld [vmem:[#allocation2 + $0x618] sm:$0xf] }
 0x399   : > { %v3850_v3 = vpop.f32.mrf.mxu2  ;;  %v3514_v36 = vpop.f32.mrf.mxu0  ;;  %v5627_v15 = vor.u32 %v6505_v57, %v5624_v29 }
 0x39a   : > { %v4019_v51 = vpop.f32.mrf.mxu3  ;;  %v3683_v35 = vpop.f32.mrf.mxu1  ;;  %v3515_v48 = vadd.f32 %v3514_v36, %v7240_v60  ;;  %v3851_v0 = vadd.f32 %v3850_v3, %v3682_v34  ;;  %v6506_v3 = vld [vmem:[#allocation2 + $0x61c] sm:$0xf]  ;;  %v5623_v36 = vor.u32 %v6509_v31, %v5622_v47 }
 0x39b   : > { %4270 = vperm.xlu2 %6639, %v4240_v45   ;;  %v5635_v23 = vor.u32 %v6506_v3, %v5632_v28 }
 0x39c   : > { %v3684_v25 = vadd.f32 %v3683_v35, %v3515_v48  ;;  %v4020_v4 = vadd.f32 %v4019_v51, %v3851_v0 }
 0x39e   : > { %v4137_v63 = vmax.f32 %v4020_v4, 0.0 }
 0x3a1   : > { %v3852_v16 = vpop.f32.mrf.mxu2  ;;  %v3517_v60 = vpop.f32.mrf.mxu0 }
 0x3a2   : > { %v3853_v14 = vadd.f32 %v3852_v16, %v3684_v25  ;;  %v4021_v58 = vpop.f32.mrf.mxu3  ;;  %v3686_v39 = vpop.f32.mrf.mxu1  ;;  %v3518_v59 = vadd.f32 %v3517_v60, %v7246_v2  ;;  %v6510_v2 = vld [vmem:[#allocation2 + $0x634] sm:$0xf0] }
 0x3a3   : > { %4717 = vperm.xlu2 %6639, %v4714_v26   ;;  %v5631_v37 = vor.u32 %v6510_v2, %v5630_v56 }
 0x3a4   : > { %v4022_v18 = vadd.f32 %v4021_v58, %v3853_v14  ;;  %3556 = vmatmul.bf16.gmra.mxu0 %v5591_v53  ;;  %v3687_v46 = vadd.f32 %v3686_v39, %v3518_v59  ;;  %v6513_v39 = vld [vmem:[#allocation2 + $0x654] sm:$0xf]  ;;  %v5664_v59 = vld [vmem:[#allocation2 + $0x678] sm:$0xf0] }
 0x3a5   : > { %3725 = vmatmul.bf16.gmra.mxu1 %v5595_v32  ;;  %v5654_v32 = vld [vmem:[#allocation2 + $0x650] sm:$0xf] }
 0x3a6   : > { %v4138_v24 = vmax.f32 %v4022_v18, 0.0  ;;  %3894 = vmatmul.bf16.gmra.mxu2 %v5599_v21  ;;  %v6517_v21 = vld [vmem:[#allocation2 + $0x66c] sm:$0xf0]  ;;  %v5662_v18 = vld [vmem:[#allocation2 + $0x658] sm:$0xf] }
 0x3a7   : > { %4063 = vmatmul.bf16.gmra.mxu3 %v5603_v42  ;;  %v5656_v42 = vld [vmem:[#allocation2 + $0x670] sm:$0xf0]  ;;  %v5655_v26 = vor.u32 %v6517_v21, %v5654_v32  ;;  %v7919_v32 = vld [vmem:[#allocation34_spill] sm:$0xff] }
 0x3a8   : > { %v4187_v1 = vpack.c.bf16 %v4138_v24, %v4137_v63  ;;  %v6518_v63 = vld [vmem:[#allocation2 + $0x674] sm:$0xf0]  ;;  %v6514_v24 = vld [vmem:[#allocation2 + $0x65c] sm:$0xf] }
 0x3a9   : > { %v3855_v8 = vpop.f32.mrf.mxu2  ;;  %v3519_v44 = vpop.f32.mrf.mxu0 }
 0x3aa   : > { %v4024_v33 = vpop.f32.mrf.mxu3  ;;  %v3688_v50 = vpop.f32.mrf.mxu1  ;;  %v3520_v43 = vadd.f32 %v3519_v44, %v7249_v27  ;;  %v3856_v55 = vadd.f32 %v3855_v8, %v3687_v46  ;;  %v5663_v46 = vor.u32 %v6518_v63, %v5662_v18  ;;  %v5718_v18 = vld [vmem:[#allocation2 + $0x6d0] sm:$0xf] }
 0x3ab   : > { %v6533_v63 = vld [vmem:[#allocation2 + $0x6ec] sm:$0xf0] }
 0x3ac   : > { %v3689_v10 = vadd.f32 %v3688_v50, %v3520_v43  ;;  %v4025_v35 = vadd.f32 %v4024_v33, %v3856_v55  ;;  %v5667_v55 = vor.u32 %v6514_v24, %v5664_v59  ;;  %v6529_v24 = vld [vmem:[#allocation2 + $0x6d4] sm:$0xf] }
 0x3ad   : > { %v5720_v59 = vld [vmem:[#allocation2 + $0x6f0] sm:$0xf0] }
 0x3ae   : > { %v4139_v25 = vmax.f32 %v4025_v35, 0.0  ;;  %v5686_v35 = vld [vmem:[#allocation2 + $0x690] sm:$0xf] }
 0x3b1   : > { %v3857_v51 = vpop.f32.mrf.mxu2  ;;  %v3522_v0 = vpop.f32.mrf.mxu0 }
 0x3b2   : > { %v3858_v34 = vadd.f32 %v3857_v51, %v3689_v10  ;;  %v4026_v48 = vpop.f32.mrf.mxu3  ;;  %v3523_v27 = vadd.f32 %v3522_v0, %v7252_v5  ;;  %v3691_v17 = vpop.f32.mrf.mxu1  ;;  %v5688_v0 = vld [vmem:[#allocation2 + $0x6b0] sm:$0xf0] }
 0x3b4   : > { %v4027_v9 = vadd.f32 %v4026_v48, %v3858_v34  ;;  %v3692_v62 = vadd.f32 %v3691_v17, %v3523_v27  ;;  %3561 = vmatmul.bf16.gmra.mxu0 %v5623_v36  ;;  %v6525_v34 = vld [vmem:[#allocation2 + $0x6ac] sm:$0xf0]  ;;  %v6521_v48 = vld [vmem:[#allocation2 + $0x694] sm:$0xf]  ;;  %v5696_v27 = vld [vmem:[#allocation2 + $0x6b8] sm:$0xf0] }
 0x3b5   : > { %3730 = vmatmul.bf16.gmra.mxu1 %v5627_v15  ;;  %v6526_v15 = vld [vmem:[#allocation2 + $0x6b4] sm:$0xf0] }
 0x3b6   : > { %v4140_v7 = vmax.f32 %v4027_v9, 0.0  ;;  %3899 = vmatmul.bf16.gmra.mxu2 %v5631_v37  ;;  %v6522_v37 = vld [vmem:[#allocation2 + $0x69c] sm:$0xf] }
 0x3b7   : > { %4068 = vmatmul.bf16.gmra.mxu3 %v5635_v23  ;;  %v5687_v23 = vor.u32 %v6525_v34, %v5686_v35  ;;  %v7921_v34 = vld [vmem:[#allocation36_spill] sm:$0xff] }
 0x3b8   : > { %v4188_v12 = vpack.c.bf16 %v4140_v7, %v4139_v25  ;;  %v5691_v25 = vor.u32 %v6521_v48, %v5688_v0 }
 0x3b9   : > { %v3860_v16 = vpop.f32.mrf.mxu2  ;;  %v3524_v4 = vpop.f32.mrf.mxu0 }
 0x3ba   : > { %v3861_v53 = vadd.f32 %v3860_v16, %v3692_v62  ;;  %v4029_v45 = vpop.f32.mrf.mxu3  ;;  %4542 = vmatpush.bf16.msra.mxu1 %v4188_v12  ;;  %v3525_v14 = vadd.f32 %v3524_v4, %v7255_v49  ;;  %v3693_v58 = vpop.f32.mrf.mxu1  ;;  %v5659_v49 = vor.u32 %v6513_v39, %v5656_v42  ;;  %v5699_v16 = vor.u32 %v6522_v37, %v5696_v27  ;;  %v5750_v37 = vld [vmem:[#allocation2 + $0x710] sm:$0xf] }
 0x3bb   : > { %v6541_v27 = vld [vmem:[#allocation2 + $0x72c] sm:$0xf0] }
 0x3bc   : > { %v4030_v5 = vadd.f32 %v4029_v45, %v3861_v53  ;;  %v3694_v60 = vadd.f32 %v3693_v58, %v3525_v14 }
 0x3be   : > { %4543 = vmatpush.bf16.msra.mxu1 %v4187_v1  ;;  %v4141_v57 = vmax.f32 %v4030_v5, 0.0 }
 0x3c1   : > { %v3862_v8 = vpop.f32.mrf.mxu2  ;;  %v3527_v50 = vpop.f32.mrf.mxu0 }
 0x3c2   : > { %v3863_v33 = vadd.f32 %v3862_v8, %v3694_v60  ;;  %v4031_v44 = vpop.f32.mrf.mxu3  ;;  %4544 = vmatpush.bf16.msra.mxu1 %v7486_v41  ;;  %v3528_v43 = vadd.f32 %v3527_v50, %v7258_v6  ;;  %v3696_v1 = vpop.f32.mrf.mxu1  ;;  %v5726_v8 = vld [vmem:[#allocation2 + $0x6d8] sm:$0xf]  ;;  %v5719_v50 = vor.u32 %v6533_v63, %v5718_v18 }
 0x3c4   : > { %v4032_v47 = vadd.f32 %v4031_v44, %v3863_v33  ;;  %v3697_v31 = vadd.f32 %v3696_v1, %v3528_v43  ;;  %3566 = vmatmul.bf16.gmra.mxu0 %v5655_v26  ;;  %v6534_v26 = vld [vmem:[#allocation2 + $0x6f4] sm:$0xf0]  ;;  %v6530_v33 = vld [vmem:[#allocation2 + $0x6dc] sm:$0xf]  ;;  %v5723_v1 = vor.u32 %v6529_v24, %v5720_v59 }
 0x3c5   : > { %3735 = vmatmul.bf16.gmra.mxu1 %v5659_v49  ;;  %v5728_v44 = vld [vmem:[#allocation2 + $0x6f8] sm:$0xf0] }
 0x3c6   : > { %v4142_v29 = vmax.f32 %v4032_v47, 0.0  ;;  %3904 = vmatmul.bf16.gmra.mxu2 %v5663_v46  ;;  %4545 = vmatpush.bf16.msra.mxu1 %v7470_v20  ;;  %v5694_v20 = vld [vmem:[#allocation2 + $0x698] sm:$0xf]  ;;  %v7920_v47 = vld [vmem:[#allocation35_spill] sm:$0xff] }
 0x3c7   : > { %4073 = vmatmul.bf16.gmra.mxu3 %v5667_v55  ;;  %v5727_v55 = vor.u32 %v6534_v26, %v5726_v8  ;;  %v7923_v26 = vld [vmem:[#allocation15_spill] sm:$0xff] }
 0x3c8   : > { %v7505_v56 = vpack.c.bf16 %v4142_v29, %v4141_v57  ;;  %v5731_v29 = vor.u32 %v6530_v33, %v5728_v44  ;;  %v5782_v44 = vld [vmem:[#allocation2 + $0x750] sm:$0xf] }
 0x3c9   : > { %v3865_v41 = vpop.f32.mrf.mxu2  ;;  %v3529_v3 = vpop.f32.mrf.mxu0 }
 0x3ca   : > { %v3866_v2 = vadd.f32 %v3865_v41, %v3697_v31  ;;  %v4034_v10 = vpop.f32.mrf.mxu3  ;;  %4546 = vmatpush.bf16.msra.mxu1 %v7451_v11  ;;  %v3530_v6 = vadd.f32 %v3529_v3, %v7261_v52  ;;  %v3698_v28 = vpop.f32.mrf.mxu1  ;;  %v5695_v52 = vor.u32 %v6526_v15, %v5694_v20 }
 0x3cc   : > { %v4035_v51 = vadd.f32 %v4034_v10, %v3866_v2  ;;  %v3699_v36 = vadd.f32 %v3698_v28, %v3530_v6 }
 0x3ce   : > { %4547 = vmatpush.bf16.msra.mxu1 %v7435_v22  ;;  %v4143_v45 = vmax.f32 %v4035_v51, 0.0 }
 0x3d1   : > { %v3867_v17 = vpop.f32.mrf.mxu2  ;;  %v3532_v11 = vpop.f32.mrf.mxu0 }
 0x3d2   : > { %v3868_v9 = vadd.f32 %v3867_v17, %v3699_v36  ;;  %v4036_v62 = vpop.f32.mrf.mxu3  ;;  %4548 = vmatpush.bf16.msra.mxu1 %v7428_v61  ;;  %v3533_v7 = vadd.f32 %v3532_v11, %v7264_v13  ;;  %v3701_v12 = vpop.f32.mrf.mxu1  ;;  %v6537_v17 = vld [vmem:[#allocation2 + $0x714] sm:$0xf]  ;;  %v6538_v11 = vld [vmem:[#allocation2 + $0x71c] sm:$0xf] }
 0x3d4   : > { %v4037_v53 = vadd.f32 %v4036_v62, %v3868_v9  ;;  %v3702_v22 = vadd.f32 %v3701_v12, %v3533_v7  ;;  %3571 = vmatmul.bf16.gmra.mxu0 %v5687_v23  ;;  %v5752_v23 = vld [vmem:[#allocation2 + $0x730] sm:$0xf0]  ;;  %v5758_v9 = vld [vmem:[#allocation2 + $0x718] sm:$0xf]  ;;  %v5751_v7 = vor.u32 %v6541_v27, %v5750_v37 }
 0x3d5   : > { %3740 = vmatmul.bf16.gmra.mxu1 %v5691_v25  ;;  %v6542_v62 = vld [vmem:[#allocation2 + $0x734] sm:$0xf0]  ;;  %v5760_v25 = vld [vmem:[#allocation2 + $0x738] sm:$0xf0] }
 0x3d6   : > { %v4144_v4 = vmax.f32 %v4037_v53, 0.0  ;;  %3909 = vmatmul.bf16.gmra.mxu2 %v5695_v52  ;;  %4549 = vmatpush.bf16.msra.mxu1 %v7420_v30 }
 0x3d7   : > { %4078 = vmatmul.bf16.gmra.mxu3 %v5699_v16 }
 0x3d8   : > { %v7513_v14 = vpack.c.bf16 %v4144_v4, %v4143_v45  ;;  %v5759_v45 = vor.u32 %v6542_v62, %v5758_v9  ;;  %v7922_v4 = vld [vmem:[#allocation26_spill] sm:$0xff] }
 0x3d9   : > { %v3870_v58 = vpop.f32.mrf.mxu2  ;;  %v3534_v61 = vpop.f32.mrf.mxu0 }
 0x3da   : > { %v3871_v5 = vadd.f32 %v3870_v58, %v3702_v22  ;;  %v4039_v60 = vpop.f32.mrf.mxu3  ;;  %v3535_v13 = vadd.f32 %v3534_v61, %v7919_v32  ;;  %v3703_v21 = vpop.f32.mrf.mxu1  ;;  %v5755_v22 = vor.u32 %v6537_v17, %v5752_v23 }
 0x3dc   : > { %v4040_v39 = vadd.f32 %v4039_v60, %v3871_v5  ;;  %v3704_v42 = vadd.f32 %v3703_v21, %v3535_v13  ;;  %v5763_v60 = vor.u32 %v6538_v11, %v5760_v25  ;;  %v5814_v11 = vld [vmem:[#allocation2 + $0x790] sm:$0xf] }
 0x3dd   : > { %v6557_v25 = vld [vmem:[#allocation2 + $0x7ac] sm:$0xf0] }
 0x3de   : > { %v4145_v10 = vmax.f32 %v4040_v39, 0.0 }
 0x3e1   : > { %v3872_v30 = vpop.f32.mrf.mxu2  ;;  %v3537_v43 = vpop.f32.mrf.mxu0 }
 0x3e2   : > { %v3873_v49 = vadd.f32 %v3872_v30, %v3704_v42  ;;  %v4041_v46 = vpop.f32.mrf.mxu3  ;;  %v3538_v31 = vadd.f32 %v3537_v43, %v7920_v47  ;;  %v3706_v57 = vpop.f32.mrf.mxu1  ;;  %v6549_v30 = vld [vmem:[#allocation2 + $0x76c] sm:$0xf0]  ;;  %v6550_v43 = vld [vmem:[#allocation2 + $0x774] sm:$0xf0]  ;;  %v5792_v47 = vld [vmem:[#allocation2 + $0x778] sm:$0xf0] }
 0x3e4   : > { %v4042_v41 = vadd.f32 %v4041_v46, %v3873_v49  ;;  %v3707_v2 = vadd.f32 %v3706_v57, %v3538_v31  ;;  %3576 = vmatmul.bf16.gmra.mxu0 %v5719_v50  ;;  %v6545_v50 = vld [vmem:[#allocation2 + $0x754] sm:$0xf]  ;;  %v5790_v46 = vld [vmem:[#allocation2 + $0x758] sm:$0xf]  ;;  %v5783_v57 = vor.u32 %v6549_v30, %v5782_v44 }
 0x3e5   : > { %3745 = vmatmul.bf16.gmra.mxu1 %v5723_v1  ;;  %v5784_v49 = vld [vmem:[#allocation2 + $0x770] sm:$0xf0] }
 0x3e6   : > { %v4146_v3 = vmax.f32 %v4042_v41, 0.0  ;;  %3914 = vmatmul.bf16.gmra.mxu2 %v5727_v55  ;;  %v6546_v55 = vld [vmem:[#allocation2 + $0x75c] sm:$0xf] }
 0x3e7   : > { %4083 = vmatmul.bf16.gmra.mxu3 %v5731_v29 }
 0x3e8   : > { %v7517_v6 = vpack.c.bf16 %v4146_v3, %v4145_v10  ;;  %v5787_v10 = vor.u32 %v6545_v50, %v5784_v49  ;;  %v5791_v3 = vor.u32 %v6550_v43, %v5790_v46  ;;  %v7925_v49 = vld [vmem:[#allocation7_spill] sm:$0xff] }
 0x3e9   : > { %v3875_v28 = vpop.f32.mrf.mxu2  ;;  %v3539_v35 = vpop.f32.mrf.mxu0 }
 0x3ea   : > { %v3876_v51 = vadd.f32 %v3875_v28, %v3707_v2  ;;  %v4044_v36 = vpop.f32.mrf.mxu3  ;;  %v3540_v48 = vadd.f32 %v3539_v35, %v7921_v34  ;;  %v3708_v0 = vpop.f32.mrf.mxu1 }
 0x3ec   : > { %v4045_v20 = vadd.f32 %v4044_v36, %v3876_v51  ;;  %v3709_v15 = vadd.f32 %v3708_v0, %v3540_v48  ;;  %v5795_v51 = vor.u32 %v6546_v55, %v5792_v47  ;;  %v7924_v48 = vld [vmem:[#allocation10_spill] sm:$0xff]  ;;  %v6565_v55 = vld [vmem:[#allocation2 + $0x7ec] sm:$0xf0]  ;;  %v6561_v47 = vld [vmem:[#allocation2 + $0x7d4] sm:$0xf] }
 0x3ee   : > { %v4147_v13 = vmax.f32 %v4045_v20, 0.0 }
 0x3f1   : > { %v3877_v52 = vpop.f32.mrf.mxu2  ;;  %v3542_v53 = vpop.f32.mrf.mxu0 }
 0x3f2   : > { %v3878_v12 = vadd.f32 %v3877_v52, %v3709_v15  ;;  %v4046_v16 = vpop.f32.mrf.mxu3  ;;  %v3543_v58 = vadd.f32 %v3542_v53, %v7922_v4  ;;  %v3711_v5 = vpop.f32.mrf.mxu1  ;;  %v6553_v52 = vld [vmem:[#allocation2 + $0x794] sm:$0xf] }
 0x3f4   : > { %v4047_v61 = vadd.f32 %v4046_v16, %v3878_v12  ;;  %v3712_v32 = vadd.f32 %v3711_v5, %v3543_v58  ;;  %3581 = vmatmul.bf16.gmra.mxu0 %v5751_v7  ;;  %v5816_v7 = vld [vmem:[#allocation2 + $0x7b0] sm:$0xf0]  ;;  %v5822_v12 = vld [vmem:[#allocation2 + $0x798] sm:$0xf]  ;;  %v5815_v58 = vor.u32 %v6557_v25, %v5814_v11 }
 0x3f5   : > { %3750 = vmatmul.bf16.gmra.mxu1 %v5755_v22  ;;  %v6558_v16 = vld [vmem:[#allocation2 + $0x7b4] sm:$0xf0]  ;;  %v6554_v22 = vld [vmem:[#allocation2 + $0x79c] sm:$0xf] }
 0x3f6   : > { %v4148_v21 = vmax.f32 %v4047_v61, 0.0  ;;  %3919 = vmatmul.bf16.gmra.mxu2 %v5759_v45  ;;  %v5824_v45 = vld [vmem:[#allocation2 + $0x7b8] sm:$0xf0] }
 0x3f7   : > { %4088 = vmatmul.bf16.gmra.mxu3 %v5763_v60 }
 0x3f8   : > { %v7521_v39 = vpack.c.bf16 %v4148_v21, %v4147_v13  ;;  %v5819_v13 = vor.u32 %v6553_v52, %v5816_v7  ;;  %v5823_v21 = vor.u32 %v6558_v16, %v5822_v12 }
 0x3f9   : > { %v3880_v42 = vpop.f32.mrf.mxu2  ;;  %v3544_v24 = vpop.f32.mrf.mxu0 }
 0x3fa   : > { %v3881_v18 = vadd.f32 %v3880_v42, %v3712_v32  ;;  %v4049_v63 = vpop.f32.mrf.mxu3  ;;  %v3713_v59 = vpop.f32.mrf.mxu1  ;;  %v3545_v33 = vadd.f32 %v3544_v24, %v7923_v26 }
 0x3fc   : > { %v4050_v8 = vadd.f32 %v4049_v63, %v3881_v18  ;;  %v3714_v1 = vadd.f32 %v3713_v59, %v3545_v33 }
 0x3fe   : > { %v4149_v35 = vmax.f32 %v4050_v8, 0.0 }
 0x401   : > { %v3882_v31 = vpop.f32.mrf.mxu2  ;;  %v3547_v2 = vpop.f32.mrf.mxu0 }
 0x402   : > { %v3883_v29 = vadd.f32 %v3882_v31, %v3714_v1  ;;  %v4051_v41 = vpop.f32.mrf.mxu3  ;;  %v3716_v28 = vpop.f32.mrf.mxu1  ;;  %v3548_v0 = vadd.f32 %v3547_v2, %v7924_v48  ;;  %v5846_v1 = vld [vmem:[#allocation2 + $0x7d0] sm:$0xf]  ;;  %v5848_v31 = vld [vmem:[#allocation2 + $0x7f0] sm:$0xf0]  ;;  %v6562_v2 = vld [vmem:[#allocation2 + $0x7dc] sm:$0xf] }
 0x404   : > { %v4052_v36 = vadd.f32 %v4051_v41, %v3883_v29  ;;  %3586 = vmatmul.bf16.gmra.mxu0 %v5783_v57  ;;  %v3717_v23 = vadd.f32 %v3716_v28, %v3548_v0  ;;  %v5854_v57 = vld [vmem:[#allocation2 + $0x7d8] sm:$0xf] }
 0x405   : > { %3755 = vmatmul.bf16.gmra.mxu1 %v5787_v10  ;;  %v6566_v29 = vld [vmem:[#allocation2 + $0x7f4] sm:$0xf0]  ;;  %v5856_v10 = vld [vmem:[#allocation2 + $0x7f8] sm:$0xf0] }
 0x406   : > { %v4150_v34 = vmax.f32 %v4052_v36, 0.0  ;;  %3924 = vmatmul.bf16.gmra.mxu2 %v5791_v3  ;;  %v5847_v3 = vor.u32 %v6565_v55, %v5846_v1  ;;  %v5855_v48 = vor.u32 %v6566_v29, %v5854_v57  ;;  %v6134_v57 = vld [vmem:[%s7833_s3 + $0x20] sm:$0xf]  ;;  %v6573_v29 = vld [vmem:[%s7833_s3 + $0x2c] sm:$0xf0] }
 0x407   : > { %4093 = vmatmul.bf16.gmra.mxu3 %v5795_v51 }
 0x408   : > { %v7525_v20 = vpack.c.bf16 %v4150_v34, %v4149_v35  ;;  %v5851_v34 = vor.u32 %v6561_v47, %v5848_v31 }
 0x409   : > { %v3885_v15 = vpop.f32.mrf.mxu2  ;;  %v3549_v27 = vpop.f32.mrf.mxu0 }
 0x40a   : > { %v4054_v37 = vpop.f32.mrf.mxu3  ;;  %v3718_v17 = vpop.f32.mrf.mxu1  ;;  %v3550_v9 = vadd.f32 %v3549_v27, %v7316_v38  ;;  %v3886_v62 = vadd.f32 %v3885_v15, %v3717_v23  ;;  %v5827_v38 = vor.u32 %v6554_v22, %v5824_v45  ;;  %v5859_v15 = vor.u32 %v6562_v2, %v5856_v10  ;;  %v7926_v23 = vld [vmem:[#allocation11_spill] sm:$0xff]  ;;  %v6118_v22 = vld [vmem:[%s7833_s3] sm:$0xf] }
 0x40b   : > { %v6569_v45 = vld [vmem:[%s7833_s3 + $0xc] sm:$0xf0]  ;;  %v6136_v2 = vld [vmem:[%s7833_s3 + $0x30] sm:$0xf0] }
 0x40c   : > { %v3719_v53 = vadd.f32 %v3718_v17, %v3550_v9  ;;  %v4055_v5 = vadd.f32 %v4054_v37, %v3886_v62 }
 0x40e   : > { %v4151_v63 = vmax.f32 %v4055_v5, 0.0 }
 0x411   : > { %v3887_v4 = vpop.f32.mrf.mxu2  ;;  %v3552_v32 = vpop.f32.mrf.mxu0 }
 0x412   : > { %v3888_v60 = vadd.f32 %v3887_v4, %v3719_v53  ;;  %v4056_v61 = vpop.f32.mrf.mxu3  ;;  %v3721_v42 = vpop.f32.mrf.mxu1  ;;  %v3553_v59 = vadd.f32 %v3552_v32, %v7320_v54  ;;  %v6567_v4 = vld [vmem:[%s7833_s3 + $0x4] sm:$0xf] }
 0x414   : > { %v4057_v18 = vadd.f32 %v4056_v61, %v3888_v60  ;;  %3591 = vmatmul.bf16.gmra.mxu0 %v5815_v58  ;;  %v3722_v50 = vadd.f32 %v3721_v42, %v3553_v59  ;;  %v6120_v58 = vld [vmem:[%s7833_s3 + $0x10] sm:$0xf0] }
 0x415   : > { %3760 = vmatmul.bf16.gmra.mxu1 %v5819_v13  ;;  %v6123_v42 = vor.u32 %v6567_v4, %v6120_v58 }
 0x416   : > { %v4152_v24 = vmax.f32 %v4057_v18, 0.0  ;;  %3929 = vmatmul.bf16.gmra.mxu2 %v5823_v21 }
 0x417   : > { %4098 = vmatmul.bf16.gmra.mxu3 %v5827_v38  ;;  %v7927_v38 = vld [vmem:[#allocation8_spill] sm:$0xff] }
 0x418   : > { %v7529_v8 = vpack.c.bf16 %v4152_v24, %v4151_v63 }
 0x419   : > { %v3890_v26 = vpop.f32.mrf.mxu2  ;;  %v3554_v44 = vpop.f32.mrf.mxu0 }
 0x41a   : > { %v4059_v33 = vpop.f32.mrf.mxu3  ;;  %v3723_v30 = vpop.f32.mrf.mxu1  ;;  %v3555_v46 = vadd.f32 %v3554_v44, %v7925_v49  ;;  %v3891_v43 = vadd.f32 %v3890_v26, %v3722_v50 }
 0x41c   : > { %v3724_v41 = vadd.f32 %v3723_v30, %v3555_v46  ;;  %v4060_v28 = vadd.f32 %v4059_v33, %v3891_v43  ;;  %v7928_v43 = vld [vmem:[#allocation9_spill] sm:$0xff] }
 0x41e   : > { %v4153_v27 = vmax.f32 %v4060_v28, 0.0 }
 0x421   : > { %v3892_v54 = vpop.f32.mrf.mxu2  ;;  %v3557_v35 = vpop.f32.mrf.mxu0 }
 0x422   : > { %v3893_v51 = vadd.f32 %v3892_v54, %v3724_v41  ;;  %v4061_v36 = vpop.f32.mrf.mxu3  ;;  %v3726_v0 = vpop.f32.mrf.mxu1  ;;  %v3558_v9 = vadd.f32 %v3557_v35, %v7926_v23  ;;  %v6571_v41 = vld [vmem:[%s7833_s3 + $0x24] sm:$0xf]  ;;  %v6135_v54 = vor.u32 %v6573_v29, %v6134_v57 }
 0x423   : > { %v7929_v35 = vld [vmem:[#allocation37_spill] sm:$0xff] }
 0x424   : > { %v4062_v37 = vadd.f32 %v4061_v36, %v3893_v51  ;;  %3596 = vmatmul.bf16.gmra.mxu0 %v5847_v3  ;;  %v3727_v12 = vadd.f32 %v3726_v0, %v3558_v9  ;;  %v6139_v36 = vor.u32 %v6571_v41, %v6136_v2 }
 0x425   : > { %3765 = vmatmul.bf16.gmra.mxu1 %v5851_v34 }
 0x426   : > { %v4154_v17 = vmax.f32 %v4062_v37, 0.0  ;;  %3934 = vmatmul.bf16.gmra.mxu2 %v5855_v48 }
 0x427   : > { %4103 = vmatmul.bf16.gmra.mxu3 %v5859_v15 }
 0x428   : > { %v4195_v62 = vpack.c.bf16 %v4154_v17, %v4153_v27 }
 0x429   : > { %v3895_v11 = vpop.f32.mrf.mxu2  ;;  %v3559_v52 = vpop.f32.mrf.mxu0 }
 0x42a   : > { %v4064_v25 = vpop.f32.mrf.mxu3  ;;  %v3728_v7 = vpop.f32.mrf.mxu1  ;;  %v3560_v16 = vadd.f32 %v3559_v52, %v7331_v19  ;;  %v3896_v53 = vadd.f32 %v3895_v11, %v3727_v12  ;;  %v6119_v19 = vor.u32 %v6569_v45, %v6118_v22  ;;  %v7930_v11 = vld [vmem:[#allocation28_spill] sm:$0xff] }
 0x42c   : > { %v3729_v5 = vadd.f32 %v3728_v7, %v3560_v16  ;;  %v4065_v61 = vadd.f32 %v4064_v25, %v3896_v53  ;;  %v6577_v16 = vld [vmem:[%s7833_s3 + $0x4c] sm:$0xf0]  ;;  %v6152_v53 = vld [vmem:[%s7833_s3 + $0x50] sm:$0xf0] }
 0x42e   : > { %v4155_v26 = vmax.f32 %v4065_v61, 0.0  ;;  %v7931_v61 = vld [vmem:[#allocation38_spill] sm:$0xff] }
 0x431   : > { %v3897_v60 = vpop.f32.mrf.mxu2  ;;  %v3562_v21 = vpop.f32.mrf.mxu0 }
 0x432   : > { %v3898_v32 = vadd.f32 %v3897_v60, %v3729_v5  ;;  %v4066_v13 = vpop.f32.mrf.mxu3  ;;  %v3563_v18 = vadd.f32 %v3562_v21, %v7927_v38  ;;  %v3731_v63 = vpop.f32.mrf.mxu1  ;;  %v6126_v60 = vld [vmem:[%s7833_s3 + $0x8] sm:$0xf] }
 0x434   : > { %v4067_v24 = vadd.f32 %v4066_v13, %v3898_v32  ;;  %v3732_v59 = vadd.f32 %v3731_v63, %v3563_v18  ;;  %4501 = vmatmul.bf16.vlgmr.msra.gmra.mxu0 %v6119_v19  ;;  %v6570_v19 = vld [vmem:[%s7833_s3 + $0x14] sm:$0xf0] }
 0x435   : > { %4550 = vmatmul.bf16.vlgmr.msra.gmra.mxu1 %v6123_v42  ;;  %v6127_v38 = vor.u32 %v6570_v19, %v6126_v60  ;;  %v7935_v60 = vld [vmem:[#allocation18_spill] sm:$0xff] }
 0x436   : > { %v4156_v33 = vmax.f32 %v4067_v24, 0.0 }
 0x438   : > { %v4196_v44 = vpack.c.bf16 %v4156_v33, %v4155_v26 }
 0x439   : > { %v3900_v30 = vpop.f32.mrf.mxu2  ;;  %v3564_v46 = vpop.f32.mrf.mxu0 }
 0x43a   : > { %v3901_v50 = vadd.f32 %v3900_v30, %v3732_v59  ;;  %v4069_v49 = vpop.f32.mrf.mxu3  ;;  %4591 = vmatpush.bf16.msra.mxu2 %v4196_v44  ;;  %v3565_v1 = vadd.f32 %v3564_v46, %v7928_v43  ;;  %v3733_v55 = vpop.f32.mrf.mxu1  ;;  %v7932_v44 = vld [vmem:[#allocation29_spill] sm:$0xff] }
 0x43b   : > { %v6166_v43 = vld [vmem:[%s7833_s3 + $0x60] sm:$0xf] }
 0x43c   : > { %v4070_v47 = vadd.f32 %v4069_v49, %v3901_v50  ;;  %v3734_v31 = vadd.f32 %v3733_v55, %v3565_v1  ;;  %v6579_v1 = vld [vmem:[%s7833_s3 + $0x64] sm:$0xf]  ;;  %v6168_v55 = vld [vmem:[%s7833_s3 + $0x70] sm:$0xf0] }
 0x43d   : > { %v6171_v2 = vor.u32 %v6579_v1, %v6168_v55 }
 0x43e   : > { %4592 = vmatpush.bf16.msra.mxu2 %v4195_v62  ;;  %v4157_v37 = vmax.f32 %v4070_v47, 0.0 }
 0x441   : > { %v3902_v10 = vpop.f32.mrf.mxu2  ;;  %v3567_v51 = vpop.f32.mrf.mxu0 }
 0x442   : > { %v3903_v3 = vadd.f32 %v3902_v10, %v3734_v31  ;;  %v4071_v28 = vpop.f32.mrf.mxu3  ;;  %4593 = vmatpush.bf16.msra.mxu2 %v7529_v8  ;;  %v3568_v34 = vadd.f32 %v3567_v51, %v7929_v35  ;;  %v3736_v48 = vpop.f32.mrf.mxu1  ;;  %v6142_v10 = vld [vmem:[%s7833_s3 + $0x28] sm:$0xf] }
 0x444   : > { %v4072_v0 = vadd.f32 %v4071_v28, %v3903_v3  ;;  %v3737_v15 = vadd.f32 %v3736_v48, %v3568_v34  ;;  %4506 = vmatmul.bf16.gmra.mxu0 %v6135_v54  ;;  %v6574_v54 = vld [vmem:[%s7833_s3 + $0x34] sm:$0xf0]  ;;  %v7933_v3 = vld [vmem:[#allocation30_spill] sm:$0xff] }
 0x445   : > { %4555 = vmatmul.bf16.gmra.mxu1 %v6139_v36  ;;  %v6143_v34 = vor.u32 %v6574_v54, %v6142_v10  ;;  %v6582_v10 = vld [vmem:[%s7833_s3 + $0x74] sm:$0xf0] }
 0x446   : > { %v4158_v27 = vmax.f32 %v4072_v0, 0.0  ;;  %4594 = vmatpush.bf16.msra.mxu2 %v7525_v20  ;;  %v6150_v20 = vld [vmem:[%s7833_s3 + $0x40] sm:$0xf] }
 0x447   : > { %v6151_v45 = vor.u32 %v6577_v16, %v6150_v20  ;;  %v6583_v20 = vld [vmem:[%s7833_s3 + $0x84] sm:$0xf]  ;;  %v6184_v16 = vld [vmem:[%s7833_s3 + $0x90] sm:$0xf0] }
 0x448   : > { %v7563_v17 = vpack.c.bf16 %v4158_v27, %v4157_v37 }
 0x449   : > { %v3905_v23 = vpop.f32.mrf.mxu2  ;;  %v3569_v8 = vpop.f32.mrf.mxu0 }
 0x44a   : > { %v3906_v9 = vadd.f32 %v3905_v23, %v3737_v15  ;;  %v4074_v62 = vpop.f32.mrf.mxu3  ;;  %4595 = vmatpush.bf16.msra.mxu2 %v7521_v39  ;;  %v3570_v25 = vadd.f32 %v3569_v8, %v7930_v11  ;;  %v3738_v52 = vpop.f32.mrf.mxu1  ;;  %v6575_v39 = vld [vmem:[%s7833_s3 + $0x44] sm:$0xf] }
 0x44b   : > { %v6155_v5 = vor.u32 %v6575_v39, %v6152_v53 }
 0x44c   : > { %v4075_v7 = vadd.f32 %v4074_v62, %v3906_v9  ;;  %v3739_v12 = vadd.f32 %v3738_v52, %v3570_v25  ;;  %v7934_v62 = vld [vmem:[#allocation27_spill] sm:$0xff] }
 0x44e   : > { %4596 = vmatpush.bf16.msra.mxu2 %v7517_v6  ;;  %v4159_v18 = vmax.f32 %v4075_v7, 0.0  ;;  %v6182_v7 = vld [vmem:[%s7833_s3 + $0x80] sm:$0xf] }
 0x451   : > { %v3907_v22 = vpop.f32.mrf.mxu2  ;;  %v3572_v58 = vpop.f32.mrf.mxu0 }
 0x452   : > { %v3908_v4 = vadd.f32 %v3907_v22, %v3739_v12  ;;  %v4076_v6 = vpop.f32.mrf.mxu3  ;;  %4597 = vmatpush.bf16.msra.mxu2 %v7513_v14  ;;  %v3573_v32 = vadd.f32 %v3572_v58, %v7931_v61  ;;  %v3741_v13 = vpop.f32.mrf.mxu1  ;;  %v6585_v12 = vld [vmem:[%s7833_s3 + $0x8c] sm:$0xf0]  ;;  %v6158_v58 = vld [vmem:[%s7833_s3 + $0x48] sm:$0xf] }
 0x453   : > { %v6183_v53 = vor.u32 %v6585_v12, %v6182_v7  ;;  %v6214_v7 = vld [vmem:[%s7833_s3 + $0xc0] sm:$0xf]  ;;  %v6593_v12 = vld [vmem:[%s7833_s3 + $0xcc] sm:$0xf0] }
 0x454   : > { %v4077_v21 = vadd.f32 %v4076_v6, %v3908_v4  ;;  %v3742_v42 = vadd.f32 %v3741_v13, %v3573_v32  ;;  %4511 = vmatmul.bf16.gmra.mxu0 %v6151_v45  ;;  %v6187_v6 = vor.u32 %v6583_v20, %v6184_v16  ;;  %v6591_v20 = vld [vmem:[%s7833_s3 + $0xc4] sm:$0xf]  ;;  %v6216_v16 = vld [vmem:[%s7833_s3 + $0xd0] sm:$0xf0] }
 0x455   : > { %4560 = vmatmul.bf16.gmra.mxu1 %v6155_v5  ;;  %v6578_v5 = vld [vmem:[%s7833_s3 + $0x54] sm:$0xf0] }
 0x456   : > { %v4160_v63 = vmax.f32 %v4077_v21, 0.0  ;;  %4598 = vmatpush.bf16.msra.mxu2 %v7505_v56  ;;  %v6581_v56 = vld [vmem:[%s7833_s3 + $0x6c] sm:$0xf0]  ;;  %v6159_v21 = vor.u32 %v6578_v5, %v6158_v58 }
 0x457   : > { %v6167_v31 = vor.u32 %v6581_v56, %v6166_v43  ;;  %v6587_v43 = vld [vmem:[%s7833_s3 + $0xa4] sm:$0xf]  ;;  %v6200_v56 = vld [vmem:[%s7833_s3 + $0xb0] sm:$0xf0] }
 0x458   : > { %v7589_v14 = vpack.c.bf16 %v4160_v63, %v4159_v18 }
 0x459   : > { %v3910_v24 = vpop.f32.mrf.mxu2  ;;  %4599 = vmatmul.bf16.vlgmr.msra.gmra.mxu2 %v6127_v38  ;;  %v3574_v33 = vpop.f32.mrf.mxu0 }
 0x45a   : > { %v3911_v59 = vadd.f32 %v3910_v24, %v3742_v42  ;;  %v4079_v26 = vpop.f32.mrf.mxu3  ;;  %v3575_v30 = vadd.f32 %v3574_v33, %v7932_v44  ;;  %v3743_v50 = vpop.f32.mrf.mxu1 }
 0x45c   : > { %v4080_v49 = vadd.f32 %v4079_v26, %v3911_v59  ;;  %v3744_v46 = vadd.f32 %v3743_v50, %v3575_v30  ;;  %v7936_v30 = vld [vmem:[#allocation12_spill] sm:$0xff] }
 0x45e   : > { %v4161_v48 = vmax.f32 %v4080_v49, 0.0  ;;  %v6198_v49 = vld [vmem:[%s7833_s3 + $0xa0] sm:$0xf] }
 0x461   : > { %v3912_v47 = vpop.f32.mrf.mxu2  ;;  %v3577_v41 = vpop.f32.mrf.mxu0 }
 0x462   : > { %v3913_v57 = vadd.f32 %v3912_v47, %v3744_v46  ;;  %v4081_v29 = vpop.f32.mrf.mxu3  ;;  %v3578_v28 = vadd.f32 %v3577_v41, %v7933_v3  ;;  %v3746_v51 = vpop.f32.mrf.mxu1  ;;  %v6589_v46 = vld [vmem:[%s7833_s3 + $0xac] sm:$0xf0]  ;;  %v6203_v41 = vor.u32 %v6587_v43, %v6200_v56  ;;  %v7940_v43 = vld [vmem:[#allocation5_spill] sm:$0xff] }
 0x463   : > { %v6199_v47 = vor.u32 %v6589_v46, %v6198_v49 }
 0x464   : > { %v4082_v36 = vadd.f32 %v4081_v29, %v3913_v57  ;;  %v3747_v35 = vadd.f32 %v3746_v51, %v3578_v28  ;;  %4516 = vmatmul.bf16.gmra.mxu0 %v6167_v31 }
 0x465   : > { %4565 = vmatmul.bf16.gmra.mxu1 %v6171_v2  ;;  %v6174_v2 = vld [vmem:[%s7833_s3 + $0x68] sm:$0xf] }
 0x466   : > { %v4162_v0 = vmax.f32 %v4082_v36, 0.0  ;;  %v6175_v28 = vor.u32 %v6582_v10, %v6174_v2  ;;  %v7704_v2 = vpop.permute.xlu2 %4330 }
 0x468   : > { %v7611_v15 = vpack.c.bf16 %v4162_v0, %v4161_v48  ;;  %v7937_v48 = vld [vmem:[#allocation23_spill] sm:$0xff] }
 0x469   : > { %v3915_v37 = vpop.f32.mrf.mxu2  ;;  %4604 = vmatmul.bf16.gmra.mxu2 %v6143_v34  ;;  %v3579_v9 = vpop.f32.mrf.mxu0 }
 0x46a   : > { %v3916_v27 = vadd.f32 %v3915_v37, %v3747_v35  ;;  %v4084_v23 = vpop.f32.mrf.mxu3  ;;  %v3580_v8 = vadd.f32 %v3579_v9, %v7934_v62  ;;  %v3748_v11 = vpop.f32.mrf.mxu1 }
 0x46b   : > { %v7654_v35 = vpop.permute.xlu1 %4325  ;;  %v7659_v37 = vpop.permute.xlu0 %4315 }
 0x46c   : > { %v4085_v25 = vadd.f32 %v4084_v23, %v3916_v27  ;;  %v3749_v52 = vadd.f32 %v3748_v11, %v3580_v8  ;;  %v7938_v11 = vld [vmem:[#allocation13_spill] sm:$0xff] }
 0x46e   : > { %v4163_v42 = vmax.f32 %v4085_v25, 0.0 }
 0x471   : > { %v3917_v39 = vpop.f32.mrf.mxu2  ;;  %v3582_v4 = vpop.f32.mrf.mxu0 }
 0x472   : > { %v3918_v22 = vadd.f32 %v3917_v39, %v3749_v52  ;;  %v4086_v45 = vpop.f32.mrf.mxu3  ;;  %v3583_v19 = vadd.f32 %v3582_v4, %v7935_v60  ;;  %v3751_v61 = vpop.f32.mrf.mxu1  ;;  %v6219_v60 = vor.u32 %v6591_v20, %v6216_v16 }
 0x474   : > { %v4087_v32 = vadd.f32 %v4086_v45, %v3918_v22  ;;  %v3752_v13 = vadd.f32 %v3751_v61, %v3583_v19  ;;  %4521 = vmatmul.bf16.gmra.mxu0 %v6183_v53  ;;  %v7674_v53 = vpop.permute.xlu1 %4320  ;;  %v6215_v45 = vor.u32 %v6593_v12, %v6214_v7  ;;  %v6190_v19 = vld [vmem:[%s7833_s3 + $0x88] sm:$0xf]  ;;  %v6586_v61 = vld [vmem:[%s7833_s3 + $0x94] sm:$0xf0] }
 0x475   : > { %4570 = vmatmul.bf16.gmra.mxu1 %v6187_v6  ;;  %v7941_v12 = vld [vmem:[#allocation16_spill] sm:$0xff] }
 0x476   : > { %v4164_v38 = vmax.f32 %v4087_v32, 0.0 }
 0x478   : > { %v7633_v18 = vpack.c.bf16 %v4164_v38, %v4163_v42  ;;  %v6191_v42 = vor.u32 %v6586_v61, %v6190_v19 }
 0x479   : > { %v3920_v63 = vpop.f32.mrf.mxu2  ;;  %4609 = vmatmul.bf16.gmra.mxu2 %v6159_v21  ;;  %v3584_v26 = vpop.f32.mrf.mxu0 }
 0x47a   : > { %v3921_v24 = vadd.f32 %v3920_v63, %v3752_v13  ;;  %v4089_v59 = vpop.f32.mrf.mxu3  ;;  %v3753_v33 = vpop.f32.mrf.mxu1  ;;  %v3585_v50 = vadd.f32 %v3584_v26, %v7936_v30 }
 0x47b   : > { %v7682_v13 = vpop.permute.xlu0 %4310 }
 0x47c   : > { %v4090_v44 = vadd.f32 %v4089_v59, %v3921_v24  ;;  %v3754_v1 = vadd.f32 %v3753_v33, %v3585_v50  ;;  %v7939_v59 = vld [vmem:[#allocation14_spill] sm:$0xff]  ;;  %v7687_v49 = vpop.permute.xlu1 %4295 }
 0x47e   : > { %v4165_v51 = vmax.f32 %v4090_v44, 0.0 }
 0x481   : > { %v3922_v55 = vpop.f32.mrf.mxu2  ;;  %v3587_v29 = vpop.f32.mrf.mxu0 }
 0x482   : > { %v3923_v31 = vadd.f32 %v3922_v55, %v3754_v1  ;;  %v4091_v57 = vpop.f32.mrf.mxu3  ;;  %v3756_v54 = vpop.f32.mrf.mxu1  ;;  %v3588_v0 = vadd.f32 %v3587_v29, %v7937_v48  ;;  %v6232_v29 = vld [vmem:[%s7833_s3 + $0xf0] sm:$0xf0] }
 0x483   : > { %v7690_v1 = vpop.permute.xlu0 %4285 }
 0x484   : > { %v4092_v3 = vadd.f32 %v4091_v57, %v3923_v31  ;;  %4526 = vmatmul.bf16.gmra.mxu0 %v6199_v47  ;;  %v3757_v8 = vadd.f32 %v3756_v54, %v3588_v0  ;;  %v6230_v47 = vld [vmem:[%s7833_s3 + $0xe0] sm:$0xf]  ;;  %v6597_v31 = vld [vmem:[%s7833_s3 + $0xec] sm:$0xf0]  ;;  %v6595_v57 = vld [vmem:[%s7833_s3 + $0xe4] sm:$0xf] }
 0x485   : > { %4575 = vmatmul.bf16.gmra.mxu1 %v6203_v41  ;;  %v6231_v54 = vor.u32 %v6597_v31, %v6230_v47  ;;  %v6235_v48 = vor.u32 %v6595_v57, %v6232_v29  ;;  %v6206_v0 = vld [vmem:[%s7833_s3 + $0xa8] sm:$0xf] }
 0x486   : > { %v4166_v36 = vmax.f32 %v4092_v3, 0.0 }
 0x488   : > { %v7656_v34 = vpack.c.bf16 %v4166_v36, %v4165_v51 }
 0x489   : > { %v3925_v27 = vpop.f32.mrf.mxu2  ;;  %4614 = vmatmul.bf16.gmra.mxu2 %v6175_v28  ;;  %v3589_v9 = vpop.f32.mrf.mxu0 }
 0x48a   : > { %v4094_v23 = vpop.f32.mrf.mxu3  ;;  %v3758_v62 = vpop.f32.mrf.mxu1  ;;  %v3590_v25 = vadd.f32 %v3589_v9, %v7938_v11  ;;  %v3926_v52 = vadd.f32 %v3925_v27, %v3757_v8  ;;  %v6590_v27 = vld [vmem:[%s7833_s3 + $0xb4] sm:$0xf0] }
 0x48b   : > { %v7712_v8 = vpop.permute.xlu1 %4290 }
 0x48c   : > { %v3759_v39 = vadd.f32 %v3758_v62, %v3590_v25  ;;  %v4095_v4 = vadd.f32 %v4094_v23, %v3926_v52  ;;  %v6207_v62 = vor.u32 %v6590_v27, %v6206_v0  ;;  %v7714_v52 = vpop.permute.xlu0 %4280 }
 0x48e   : > { %v4167_v38 = vmax.f32 %v4095_v4, 0.0  ;;  %v7717_v4 = vpop.permute.xlu2 %4305 }
 0x491   : > { %v3927_v22 = vpop.f32.mrf.mxu2  ;;  %v3592_v5 = vpop.f32.mrf.mxu0 }
 0x492   : > { %v3928_v6 = vadd.f32 %v3927_v22, %v3759_v39  ;;  %v4096_v58 = vpop.f32.mrf.mxu3  ;;  %v3761_v32 = vpop.f32.mrf.mxu1  ;;  %v3593_v26 = vadd.f32 %v3592_v5, %v7939_v59  ;;  %v6594_v59 = vld [vmem:[%s7833_s3 + $0xd4] sm:$0xf0] }
 0x494   : > { %v4097_v21 = vadd.f32 %v4096_v58, %v3928_v6  ;;  %4531 = vmatmul.bf16.gmra.mxu0 %v6215_v45  ;;  %v3762_v46 = vadd.f32 %v3761_v32, %v3593_v26  ;;  %v4256_v32 = vpop.permute.xlu0 %4255 }
 0x495   : > { %4580 = vmatmul.bf16.gmra.mxu1 %v6219_v60  ;;  %v4266_v60 = vpop.permute.xlu1 %4265 }
 0x496   : > { %v4168_v63 = vmax.f32 %v4097_v21, 0.0 }
 0x498   : > { %v7684_v24 = vpack.c.bf16 %v4168_v63, %v4167_v38  ;;  %v6222_v63 = vld [vmem:[%s7833_s3 + $0xc8] sm:$0xf] }
 0x499   : > { %v3930_v33 = vpop.f32.mrf.mxu2  ;;  %4619 = vmatmul.bf16.gmra.mxu2 %v6191_v42  ;;  %v3594_v30 = vpop.f32.mrf.mxu0 }
 0x49a   : > { %v4099_v44 = vpop.f32.mrf.mxu3  ;;  %v3763_v50 = vpop.f32.mrf.mxu1  ;;  %v3595_v56 = vadd.f32 %v3594_v30, %v7940_v43  ;;  %v3931_v55 = vadd.f32 %v3930_v33, %v3762_v46 }
 0x49b   : > { %v7726_v46 = vpop.permute.xlu2 %4300 }
 0x49c   : > { %v3764_v41 = vadd.f32 %v3763_v50, %v3595_v56  ;;  %v4100_v3 = vadd.f32 %v4099_v44, %v3931_v55  ;;  %v6223_v50 = vor.u32 %v6594_v59, %v6222_v63 }
 0x49d   : > { %v4261_v47 = vpop.permute.xlu1 %4260 }
 0x49e   : > { %v4169_v11 = vmax.f32 %v4100_v3, 0.0  ;;  %v6238_v3 = vld [vmem:[%s7833_s3 + $0xe8] sm:$0xf] }
 0x4a1   : > { %v3932_v10 = vpop.f32.mrf.mxu2  ;;  %v3597_v36 = vpop.f32.mrf.mxu0 }
 0x4a2   : > { %v3933_v28 = vadd.f32 %v3932_v10, %v3764_v41  ;;  %v4101_v51 = vpop.f32.mrf.mxu3  ;;  %v3766_v23 = vpop.f32.mrf.mxu1  ;;  %v3598_v20 = vadd.f32 %v3597_v36, %v7941_v12 }
 0x4a3   : > { %v4276_v10 = vpop.permute.xlu2 %4275 }
 0x4a4   : > { %v4102_v9 = vadd.f32 %v4101_v51, %v3933_v28  ;;  %4536 = vmatmul.bf16.gmra.mxu0 %v6231_v54  ;;  %v3767_v6 = vadd.f32 %v3766_v23, %v3598_v20  ;;  %v6598_v28 = vld [vmem:[%s7833_s3 + $0xf4] sm:$0xf0] }
 0x4a5   : > { %4585 = vmatmul.bf16.gmra.mxu1 %v6235_v48  ;;  %v6239_v0 = vor.u32 %v6598_v28, %v6238_v3  ;;  %v6584_v3 = vld [vmem:[%s7833_s3 + $0x8c] sm:$0xf]  ;;  %v6192_v28 = vld [vmem:[%s7833_s3 + $0x98] sm:$0xf0] }
 0x4a6   : > { %v4170_v25 = vmax.f32 %v4102_v9, 0.0 }
 0x4a8   : > { %v4203_v7 = vpack.c.bf16 %v4170_v25, %v4169_v11  ;;  %v6568_v25 = vld [vmem:[%s7833_s3 + $0xc] sm:$0xf] }
 0x4a9   : > { %v3935_v16 = vpop.f32.mrf.mxu2  ;;  %4624 = vmatmul.bf16.gmra.mxu2 %v6207_v62  ;;  %v3599_v22 = vpop.f32.mrf.mxu0 }
 0x4aa   : > { %v4104_v39 = vpop.f32.mrf.mxu3  ;;  %v3768_v45 = vpop.f32.mrf.mxu1  ;;  %v3600_v58 = vadd.f32 %v3599_v22, %v7385_v40  ;;  %v3936_v5 = vadd.f32 %v3935_v16, %v3767_v6 }
 0x4ab   : > { %v4271_v27 = vpop.permute.xlu2 %4270 }
 0x4ac   : > { %v3769_v19 = vadd.f32 %v3768_v45, %v3600_v58  ;;  %v4105_v21 = vadd.f32 %v4104_v39, %v3936_v5  ;;  %v6572_v58 = vld [vmem:[%s7833_s3 + $0x2c] sm:$0xf]  ;;  %v6144_v5 = vld [vmem:[%s7833_s3 + $0x38] sm:$0xf0] }
 0x4ae   : > { %v4171_v43 = vmax.f32 %v4105_v21, 0.0 }
 0x4b1   : > { %v3937_v61 = vpop.f32.mrf.mxu2  ;;  %v4502_v38 = vpop.f32.mrf.mxu0 }
 0x4b2   : > { %v3938_v42 = vadd.f32 %v3937_v61, %v3769_v19  ;;  %v4106_v26 = vpop.f32.mrf.mxu3  ;;  %v4503_v33 = vadd.f32 %v4502_v38, %v4256_v32  ;;  %v4551_v44 = vpop.f32.mrf.mxu1 }
 0x4b4   : > { %v4107_v40 = vadd.f32 %v4106_v26, %v3938_v42  ;;  %v4552_v30 = vadd.f32 %v4551_v44, %v4503_v33  ;;  %v6576_v44 = vld [vmem:[%s7833_s3 + $0x4c] sm:$0xf] }
 0x4b6   : > { %v4172_v56 = vmax.f32 %v4107_v40, 0.0 }
 0x4b8   : > { %v4204_v55 = vpack.c.bf16 %v4172_v56, %v4171_v43 }
 0x4b9   : > { %4629 = vmatmul.bf16.gmra.mxu2 %v6223_v50  ;;  %v4504_v31 = vpop.f32.mrf.mxu0 }
 0x4ba   : > { %4640 = vmatpush.bf16.msra.mxu3 %v4204_v55  ;;  %v4505_v57 = vadd.f32 %v4504_v31, %v4261_v47  ;;  %v4553_v29 = vpop.f32.mrf.mxu1  ;;  %v6580_v31 = vld [vmem:[%s7833_s3 + $0x6c] sm:$0xf] }
 0x4bc   : > { %v4554_v41 = vadd.f32 %v4553_v29, %v4505_v57  ;;  %v6176_v57 = vld [vmem:[%s7833_s3 + $0x78] sm:$0xf0] }
 0x4be   : > { %4641 = vmatpush.bf16.msra.mxu3 %v4203_v7 }
 0x4c1   : > { %v4507_v54 = vpop.f32.mrf.mxu0 }
 0x4c2   : > { %4642 = vmatpush.bf16.msra.mxu3 %v7684_v24  ;;  %v4508_v51 = vadd.f32 %v4507_v54, %v4266_v60  ;;  %v4556_v36 = vpop.f32.mrf.mxu1 }
 0x4c4   : > { %v4557_v48 = vadd.f32 %v4556_v36, %v4508_v51 }
 0x4c6   : > { %4643 = vmatpush.bf16.msra.mxu3 %v7656_v34  ;;  %v6128_v34 = vld [vmem:[%s7833_s3 + $0x18] sm:$0xf0] }
 0x4c7   : > { %v6131_v20 = vor.u32 %v6568_v25, %v6128_v34  ;;  %v6596_v34 = vld [vmem:[%s7833_s3 + $0xec] sm:$0xf] }
 0x4c9   : > { %4634 = vmatmul.bf16.gmra.mxu2 %v6239_v0  ;;  %v4509_v24 = vpop.f32.mrf.mxu0 }
 0x4ca   : > { %4644 = vmatpush.bf16.msra.mxu3 %v7633_v18  ;;  %v4510_v23 = vadd.f32 %v4509_v24, %v4271_v27  ;;  %v4558_v9 = vpop.f32.mrf.mxu1  ;;  %v6588_v24 = vld [vmem:[%s7833_s3 + $0xac] sm:$0xf] }
 0x4cc   : > { %v4559_v62 = vadd.f32 %v4558_v9, %v4510_v23  ;;  %v6208_v23 = vld [vmem:[%s7833_s3 + $0xb8] sm:$0xf0] }
 0x4cd   : > { %v6211_v9 = vor.u32 %v6588_v24, %v6208_v23 }
 0x4ce   : > { %4645 = vmatpush.bf16.msra.mxu3 %v7611_v15 }
 0x4d1   : > { %v4512_v11 = vpop.f32.mrf.mxu0 }
 0x4d2   : > { %4646 = vmatpush.bf16.msra.mxu3 %v7589_v14  ;;  %v4513_v7 = vadd.f32 %v4512_v11, %v4276_v10  ;;  %v4561_v12 = vpop.f32.mrf.mxu1  ;;  %v6179_v10 = vor.u32 %v6580_v31, %v6176_v57  ;;  %v6224_v11 = vld [vmem:[%s7833_s3 + $0xd8] sm:$0xf0] }
 0x4d4   : > { %v4562_v18 = vadd.f32 %v4561_v12, %v4513_v7  ;;  %v6240_v7 = vld [vmem:[%s7833_s3 + $0xf8] sm:$0xf0] }
 0x4d5   : > { %v6243_v12 = vor.u32 %v6596_v34, %v6240_v7 }
 0x4d6   : > { %4647 = vmatpush.bf16.msra.mxu3 %v7563_v17 }
 0x4d9   : > { %4648 = vmatmul.bf16.vlgmr.msra.gmra.mxu3 %v6131_v20  ;;  %v4514_v16 = vpop.f32.mrf.mxu0 }
 0x4da   : > { %v4515_v15 = vadd.f32 %v4514_v16, %v7714_v52  ;;  %v4563_v14 = vpop.f32.mrf.mxu1  ;;  %v6147_v52 = vor.u32 %v6572_v58, %v6144_v5 }
 0x4dc   : > { %v4600_v39 = vpop.f32.mrf.mxu2  ;;  %v4564_v45 = vadd.f32 %v4563_v14, %v4515_v15 }
 0x4dd   : > { %v4601_v22 = vadd.f32 %v4600_v39, %v4552_v30 }
 0x4e1   : > { %v4517_v6 = vpop.f32.mrf.mxu0 }
 0x4e2   : > { %v4518_v60 = vadd.f32 %v4517_v6, %v7690_v1  ;;  %v4566_v17 = vpop.f32.mrf.mxu1  ;;  %v6160_v1 = vld [vmem:[%s7833_s3 + $0x58] sm:$0xf0] }
 0x4e4   : > { %v4602_v19 = vpop.f32.mrf.mxu2  ;;  %v4567_v32 = vadd.f32 %v4566_v17, %v4518_v60 }
 0x4e5   : > { %v4603_v61 = vadd.f32 %v4602_v19, %v4554_v41 }
 0x4e9   : > { %4653 = vmatmul.bf16.gmra.mxu3 %v6147_v52  ;;  %v4519_v21 = vpop.f32.mrf.mxu0 }
 0x4ea   : > { %v4520_v42 = vadd.f32 %v4519_v21, %v7712_v8  ;;  %v4568_v38 = vpop.f32.mrf.mxu1  ;;  %v6163_v8 = vor.u32 %v6576_v44, %v6160_v1 }
 0x4ec   : > { %v4605_v63 = vpop.f32.mrf.mxu2  ;;  %v4569_v26 = vadd.f32 %v4568_v38, %v4520_v42 }
 0x4ed   : > { %v4606_v59 = vadd.f32 %v4605_v63, %v4557_v48  ;;  %v6195_v48 = vor.u32 %v6584_v3, %v6192_v28 }
 0x4f1   : > { %v4522_v33 = vpop.f32.mrf.mxu0 }
 0x4f2   : > { %v4523_v40 = vadd.f32 %v4522_v33, %v7687_v49  ;;  %v4571_v30 = vpop.f32.mrf.mxu1 }
 0x4f4   : > { %v4607_v50 = vpop.f32.mrf.mxu2  ;;  %v4572_v56 = vadd.f32 %v4571_v30, %v4523_v40 }
 0x4f5   : > { %v4608_v43 = vadd.f32 %v4607_v50, %v4559_v62  ;;  %v6592_v62 = vld [vmem:[%s7833_s3 + $0xcc] sm:$0xf] }
 0x4f6   : > { %v6227_v25 = vor.u32 %v6592_v62, %v6224_v11 }
 0x4f9   : > { %4658 = vmatmul.bf16.gmra.mxu3 %v6163_v8  ;;  %v4524_v44 = vpop.f32.mrf.mxu0 }
 0x4fa   : > { %v4573_v1 = vpop.f32.mrf.mxu1 }
 0x4fc   : > { %v4610_v55 = vpop.f32.mrf.mxu2 }
 0x4fd   : > { %v4611_v47 = vadd.f32 %v4610_v55, %v4562_v18 }
 0x502   : > { %v4576_v55 = vpop.f32.mrf.mxu1 }
 0x504   : > { %v4612_v29 = vpop.f32.mrf.mxu2 }
 0x505   : > { %v4613_v41 = vadd.f32 %v4612_v29, %v4564_v45 }
 0x509   : > { %4663 = vmatmul.bf16.gmra.mxu3 %v6179_v10 }
 0x50a   : > { %v4578_v10 = vpop.f32.mrf.mxu1 }
 0x50c   : > { %v4615_v49 = vpop.f32.mrf.mxu2 }
 0x50d   : > { %v4616_v54 = vadd.f32 %v4615_v49, %v4567_v32 }
 0x512   : > { %v4581_v28 = vpop.f32.mrf.mxu1 }
 0x514   : > { %v4617_v51 = vpop.f32.mrf.mxu2 }
 0x515   : > { %v4618_v36 = vadd.f32 %v4617_v51, %v4569_v26 }
 0x519   : > { %4668 = vmatmul.bf16.gmra.mxu3 %v6195_v48 }
 0x51c   : > { %v4620_v0 = vpop.f32.mrf.mxu2 }
 0x51d   : > { %v4621_v27 = vadd.f32 %v4620_v0, %v4572_v56  ;;  %v4527_v56 = vpop.f32.mrf.mxu0  ;;  %v4583_v0 = vpop.f32.mrf.mxu1 }
 0x524   : > { %v4622_v40 = vpop.f32.mrf.mxu2 }
 0x525   : > { %v4529_v29 = vpop.f32.mrf.mxu0  ;;  %v4586_v62 = vpop.f32.mrf.mxu1 }
 0x529   : > { %4673 = vmatmul.bf16.gmra.mxu3 %v6211_v9 }
 0x52c   : > { %v4625_v57 = vpop.f32.mrf.mxu2 }
 0x534   : > { %v4627_v49 = vpop.f32.mrf.mxu2 }
 0x539   : > { %4678 = vmatmul.bf16.gmra.mxu3 %v6227_v25 }
 0x53c   : > { %v4630_v51 = vpop.f32.mrf.mxu2 }
 0x544   : > { %v4632_v24 = vpop.f32.mrf.mxu2 }
 0x549   : > { %4683 = vmatmul.bf16.gmra.mxu3 %v6243_v12 }
 0x54c   : > { %v4635_v25 = vpop.f32.mrf.mxu2 }
 0x55c   : > { %v4649_v18 = vpop.f32.mrf.mxu3 }
 0x55d   : > { %v4650_v20 = vadd.f32 %v4649_v18, %v4601_v22 }
 0x55f   : > { %v4689_v14 = vmax.f32 %v4650_v20, 0.0  ;;  %v4588_v20 = vpop.f32.mrf.mxu1 }
 0x564   : > { %v4651_v16 = vpop.f32.mrf.mxu3 }
 0x565   : > { %v4652_v15 = vadd.f32 %v4651_v16, %v4603_v61 }
 0x567   : > { %v4690_v39 = vmax.f32 %v4652_v15, 0.0 }
 0x569   : > { %v7792_v45 = vpack.c.bf16 %v4690_v39, %v4689_v14  ;;  %v4637_v14 = vpop.f32.mrf.mxu2  ;;  %v4530_v39 = vadd.f32 %v4529_v29, %v7682_v13 }
 0x56c   : > { %v4654_v6 = vpop.f32.mrf.mxu3 }
 0x56d   : > { %v4655_v58 = vadd.f32 %v4654_v6, %v4606_v59 }
 0x56f   : > { %v4691_v17 = vmax.f32 %v4655_v58, 0.0 }
 0x574   : > { %v4656_v5 = vpop.f32.mrf.mxu3 }
 0x575   : > { %v4657_v60 = vadd.f32 %v4656_v5, %v4608_v43 }
 0x577   : > { %v4692_v19 = vmax.f32 %v4657_v60, 0.0  ;;  %v4528_v60 = vadd.f32 %v4527_v56, %v7717_v4 }
 0x579   : > { %v7794_v32 = vpack.c.bf16 %v4692_v19, %v4691_v17 }
 0x57c   : > { %v4659_v52 = vpop.f32.mrf.mxu3 }
 0x57d   : > { %v4660_v21 = vadd.f32 %v4659_v52, %v4611_v47 }
 0x57f   : > { %v4693_v63 = vmax.f32 %v4660_v21, 0.0 }
 0x584   : > { %v4661_v42 = vpop.f32.mrf.mxu3 }
 0x585   : > { %v4662_v38 = vadd.f32 %v4661_v42, %v4613_v41 }
 0x587   : > { %v4694_v22 = vmax.f32 %v4662_v38, 0.0 }
 0x589   : > { %v7796_v26 = vpack.c.bf16 %v4694_v22, %v4693_v63  ;;  %v4577_v63 = vadd.f32 %v4576_v55, %v4528_v60 }
 0x58c   : > { %v4664_v61 = vpop.f32.mrf.mxu3 }
 0x58d   : > { %v4665_v33 = vadd.f32 %v4664_v61, %v4616_v54  ;;  %v4532_v54 = vpop.f32.mrf.mxu0 }
 0x58e   : > { %v4533_v16 = vadd.f32 %v4532_v54, %v7659_v37 }
 0x58f   : > { %v4695_v50 = vmax.f32 %v4665_v33, 0.0 }
 0x590   : > { %v4582_v17 = vadd.f32 %v4581_v28, %v4533_v16 }
 0x592   : > { %v4631_v42 = vadd.f32 %v4630_v51, %v4582_v17 }
 0x594   : > { %v4666_v59 = vpop.f32.mrf.mxu3 }
 0x595   : > { %v4667_v30 = vadd.f32 %v4666_v59, %v4618_v36  ;;  %v4534_v36 = vpop.f32.mrf.mxu0 }
 0x596   : > { %v4535_v12 = vadd.f32 %v4534_v36, %v7674_v53  ;;  %v4525_v53 = vadd.f32 %v4524_v44, %v7726_v46 }
 0x597   : > { %v4696_v43 = vmax.f32 %v4667_v30, 0.0  ;;  %v4626_v30 = vadd.f32 %v4625_v57, %v4577_v63  ;;  %v4718_v57 = vpop.permute.xlu2 %4717 }
 0x598   : > { %v4584_v6 = vadd.f32 %v4583_v0, %v4535_v12  ;;  %v4574_v59 = vadd.f32 %v4573_v1, %v4525_v53 }
 0x599   : > { %v7798_v8 = vpack.c.bf16 %v4696_v43, %v4695_v50 }
 0x59a   : > { %v4633_v19 = vadd.f32 %v4632_v24, %v4584_v6  ;;  %v4623_v56 = vadd.f32 %v4622_v40, %v4574_v59  ;;  %v4713_v40 = vld [vmem:[%s7835_s5] sm:$0xf] }
 0x59c   : > { %v4669_v47 = vpop.f32.mrf.mxu3 }
 0x59d   : > { %v7800_v31 = vadd.f32 %v4669_v47, %v4621_v27  ;;  %v4537_v9 = vpop.f32.mrf.mxu0 }
 0x59e   : > { %v4538_v34 = vadd.f32 %v4537_v9, %v7654_v35 }
 0x59f   : > { %v4697_v28 = vmax.f32 %v7800_v31, 0.0 }
 0x5a0   : > { %v4587_v15 = vadd.f32 %v4586_v62, %v4538_v34 }
 0x5a2   : > { %v4636_v5 = vadd.f32 %v4635_v25, %v4587_v15 }
 0x5a4   : > { %v4671_v41 = vpop.f32.mrf.mxu3 }
 0x5a5   : > { %v4539_v27 = vpop.f32.mrf.mxu0  ;;  %v4672_v46 = vadd.f32 %v4671_v41, %v4623_v56 }
 0x5a6   : > { %v4540_v18 = vadd.f32 %v4539_v27, %v7704_v2  ;;  %v4579_v2 = vadd.f32 %v4578_v10, %v4530_v39 }
 0x5a7   : > { %v4698_v55 = vmax.f32 %v4672_v46, 0.0 }
 0x5a8   : > { %v4589_v58 = vadd.f32 %v4588_v20, %v4540_v18  ;;  %v4628_v22 = vadd.f32 %v4627_v49, %v4579_v2 }
 0x5a9   : > { %v4709_v1 = vpack.c.bf16 %v4698_v55, %v4697_v28 }
 0x5aa   : > { %v4638_v35 = vadd.f32 %v4637_v14, %v4589_v58 }
 0x5ac   : > { %v4674_v3 = vpop.f32.mrf.mxu3 }
 0x5ad   : > { %v4675_v47 = vadd.f32 %v4674_v3, %v4626_v30 }
 0x5af   : > { %v4699_v54 = vmax.f32 %v4675_v47, 0.0 }
 0x5b4   : > { %v4676_v48 = vpop.f32.mrf.mxu3 }
 0x5b5   : > { %v4677_v50 = vadd.f32 %v4676_v48, %v4628_v22 }
 0x5b7   : > { %v4700_v44 = vmax.f32 %v4677_v50, 0.0 }
 0x5b9   : > { %v4710_v49 = vpack.c.bf16 %v4700_v44, %v4699_v54 }
 0x5bc   : > { %v4679_v23 = vpop.f32.mrf.mxu3 }
 0x5bd   : > { %v4680_v61 = vadd.f32 %v4679_v23, %v4631_v42 }
 0x5bf   : > { %v4701_v29 = vmax.f32 %v4680_v61, 0.0 }
 0x5c4   : > { %v4681_v11 = vpop.f32.mrf.mxu3 }
 0x5c5   : > { %v4682_v38 = vadd.f32 %v4681_v11, %v4633_v19 }
 0x5c7   : > { %v4702_v4 = vmax.f32 %v4682_v38, 0.0 }
 0x5c9   : > { %v4711_v10 = vpack.c.bf16 %v4702_v4, %v4701_v29 }
 0x5cc   : > { %v4684_v7 = vpop.f32.mrf.mxu3 }
 0x5cd   : > { %v4685_v52 = vadd.f32 %v4684_v7, %v4636_v5 }
 0x5cf   : > { %v4703_v13 = vmax.f32 %v4685_v52, 0.0 }
 0x5d4   : > { %v4686_v21 = vpop.f32.mrf.mxu3 }
 0x5d5   : > { %v4687_v37 = vadd.f32 %v4686_v21, %v4638_v35 }
 0x5d7   : > { %v4704_v33 = vmax.f32 %v4687_v37, 0.0 }
 0x5d9   : > { %v4712_v43 = vpack.c.bf16 %v4704_v33, %v4703_v13 }
 0x5db   : > { %4720 = vmatpush.bf16.msrb.mxu0 %v4712_v43 }
 0x5df   : > { %4721 = vmatpush.bf16.msrb.mxu0 %v4711_v10 }
 0x5e3   : > { %4722 = vmatpush.bf16.msrb.mxu0 %v4710_v49 }
 0x5e7   : > { %4723 = vmatpush.bf16.msrb.mxu0 %v4709_v1 }
 0x5eb   : > { %4724 = vmatpush.bf16.msrb.mxu0 %v7798_v8 }
 0x5ef   : > { %4725 = vmatpush.bf16.msrb.mxu0 %v7796_v26 }
 0x5f3   : > { %4726 = vmatpush.bf16.msrb.mxu0 %v7794_v32 }
 0x5f7   : > { %4727 = vmatpush.bf16.msrb.mxu0 %v7792_v45 }
 0x5fa   : > { %4728 = vmatmul.bf16.vlgmr.msrb.gmra.mxu0 %v4713_v40 }
 0x677   : > { %v4729_v41 = vpop.f32.mrf.mxu0 }
 0x678   : > { %v4730_v31 = vadd.f32 %v4729_v41, %v4718_v57 }
 0x67a   : > { %v4733_v8 = vpack.c.bf16 %v4730_v31, %v4730_v31 }
 0x67c   : > { %4735 = vst.msk [vmem:[%s324_s14] sm:$0xf] %vm4734_vm0, %v4733_v8 }
 0x67f   : > { %v4731_v26 = vpop.f32.mrf.mxu0 }
 0x680 PF: > { %s18_s26 = sadd.s32 1, %s6696_s26   ;;  %s7942_s24 = smov %s6692_s25 }
 0x681   : > { %p15_p8 = scmp.ge.s32.totalorder %s18_s26, 4   ;;  %s7943_s25 = smov %s7945_s28 }
 0x683   :  { %17 = sbr.rel (!%p15_p8) target bundleno = 2 (0x2), region = 83 }
 0x688   :  { %4761 = vsyncpa [#allocation3], 1 }
 0x689   :  { %4763 = vsyncpa [#allocation3 + $0x1], 1 }

</bundles_post_ra>
